<compile_context>
chip_gen: v7x
topology: tpu7x:2x2x1
jax: 0.10.0
libtpu: 0.0.40
codegen_flags: <defaults>
</compile_context>

<pallas_src>
import jax
import jax.numpy as jnp
from jax.experimental import pallas as pl
from jax.experimental.pallas import tpu as pltpu


_TAPS = tuple((dh, dw) for dh in range(3) for dw in range(3))   # conv tap order: k = dh*3 + dw


# ----------------------------------------------------------------------------------------------
# Fully fused kernel: one grid step = one image through all three conv/BN/ReLU/pool layers.
# ----------------------------------------------------------------------------------------------
def _fused_cnn_kernel(p1_ref, w1_ref, b1_ref, w2_ref, b2_ref, w3_ref, b3_ref,   # inputs
                      o_ref,                                                    # output (16,128)
                      acc1_s, a2_s, acc2_s, a3_s, acc3_s, p3_s):                # VMEM scratch
    f32 = jnp.float32

    # Zero the padded activation grids; their borders implement the conv / pool zero padding.
    a2_s[...] = jnp.zeros_like(a2_s)
    a3_s[...] = jnp.zeros_like(a3_s)
    p3_s[...] = jnp.zeros_like(p3_s)

    # ---------------- layer 1: conv(1->32) 28x28, then 2x2 pool -> 14x14 ------------------------
    # Single im2col matmul (K = 9); BN scale already folded into w1.
    acc1_s[...] = jnp.dot(p1_ref[...], w1_ref[...], preferred_element_type=f32)   # (784, 32)

    b1 = b1_ref[...]                                      # (1, 32)
    for p in range(14):                                   # pooled output rows
        r0 = (2 * p) * 28
        r1 = (2 * p + 1) * 28
        m = jnp.maximum(
            jnp.maximum(acc1_s[pl.ds(r0, 14, stride=2), :],
                        acc1_s[pl.ds(r0 + 1, 14, stride=2), :]),
            jnp.maximum(acc1_s[pl.ds(r1, 14, stride=2), :],
                        acc1_s[pl.ds(r1 + 1, 14, stride=2), :]))
        # bias + ReLU hoisted after the max (exact); write into the zero-padded 16x16 layer-2 grid.
        a2_s[pl.ds((p + 1) * 16 + 1, 14), :] = jnp.maximum(m + b1, 0.0)

    # ---------------- layer 2: conv(32->64) 14x14, then 2x2 pool -> 7x7 -------------------------
    # Conv = 9 shifted-slice matmuls over the flattened padded grid (row stride 16).
    acc2 = None
    for t, (dh, dw) in enumerate(_TAPS):
        y = jnp.dot(a2_s[pl.ds(dh * 16 + dw, 224), :], w2_ref[t],
                    preferred_element_type=f32)            # (224, 64)
        acc2 = y if acc2 is None else acc2 + y
    acc2_s[...] = acc2

    b2 = b2_ref[...]                                      # (1, 64)
    for p in range(7):
        r0 = (2 * p) * 16
        r1 = (2 * p + 1) * 16
        m = jnp.maximum(
            jnp.maximum(acc2_s[pl.ds(r0, 7, stride=2), :],
                        acc2_s[pl.ds(r0 + 1, 7, stride=2), :]),
            jnp.maximum(acc2_s[pl.ds(r1, 7, stride=2), :],
                        acc2_s[pl.ds(r1 + 1, 7, stride=2), :]))
        a3_s[pl.ds((p + 1) * 9 + 1, 7), :] = jnp.maximum(m + b2, 0.0)

    # ---------------- layer 3: conv(64->128) 7x7, then 2x2 pool (padding=1) -> 4x4 --------------
    acc3 = None
    for t, (dh, dw) in enumerate(_TAPS):
        y = jnp.dot(a3_s[pl.ds(dh * 9 + dw, 63), :], w3_ref[t],
                    preferred_element_type=f32)            # (63, 128), row stride 9
        acc3 = y if acc3 is None else acc3 + y
    # bias + ReLU BEFORE the pool here: the pool's padding=1 is a zero border, which is only
    # equivalent to PyTorch's padded max-pool because the pooled input is post-ReLU (>= 0).
    acc3_s[...] = jnp.maximum(acc3 + b3_ref[...], 0.0)

    # Copy the 7 valid columns of each conv row into the zeroed 8x8 pool grid (offset +1,+1).
    for i in range(7):
        p3_s[pl.ds((i + 1) * 8 + 1, 7), :] = acc3_s[pl.ds(i * 9, 7), :]

    for p in range(4):
        r0 = (2 * p) * 8
        r1 = (2 * p + 1) * 8
        m = jnp.maximum(
            jnp.maximum(p3_s[pl.ds(r0, 4, stride=2), :],
                        p3_s[pl.ds(r0 + 1, 4, stride=2), :]),
            jnp.maximum(p3_s[pl.ds(r1, 4, stride=2), :],
                        p3_s[pl.ds(r1 + 1, 4, stride=2), :]))
        o_ref[pl.ds(p * 4, 4), :] = m                      # lane-dense (4, 128) store


# ----------------------------------------------------------------------------------------------
# Wrapper glue (all tiny): layer-1 im2col, BN folding, final flatten.
# ----------------------------------------------------------------------------------------------
def _layer1_im2col(x_nhwc):
    """(N, 28, 28, 1) -> (N, 784, 9) patches, k = dh*3 + dw."""
    n, h, w, _ = x_nhwc.shape
    xp = jnp.pad(x_nhwc[..., 0], ((0, 0), (1, 1), (1, 1)))
    cols = [xp[:, dh:dh + h, dw:dw + w] for dh, dw in _TAPS]
    return jnp.stack(cols, axis=-1).reshape(n, h * w, 9)


def _fold_params(layers):
    (w1, s1, b1), (w2, s2, b2), (w3, s3, b3) = layers
    w1m = w1.reshape(9, 32) * s1[None, :]                  # fold eval-mode BN scale into weights
    w2m = w2.reshape(9, 32, 64) * s2[None, None, :]
    w3m = w3.reshape(9, 64, 128) * s3[None, None, :]
    return w1m, b1.reshape(1, 32), w2m, b2.reshape(1, 64), w3m, b3.reshape(1, 128)


@jax.jit
def model_forward(x_nchw, layers):
    # Dropout(p=0.2): identity in eval mode.
    n = x_nchw.shape[0]
    x = jnp.transpose(x_nchw, (0, 2, 3, 1)).astype(jnp.float32)      # NCHW -> NHWC
    p1 = _layer1_im2col(x)
    w1m, b1, w2m, b2, w3m, b3 = _fold_params(layers)

    out = pl.pallas_call(
        _fused_cnn_kernel,
        out_shape=jax.ShapeDtypeStruct((n, 16, 128), jnp.float32),
        grid_spec=pltpu.PrefetchScalarGridSpec(
            num_scalar_prefetch=0,
            grid=(n,),                                                # one step per image
            in_specs=[
                pl.BlockSpec((None, 784, 9), lambda i: (i, 0, 0)),    # per-image layer-1 patches
                pl.BlockSpec((9, 32), lambda i: (0, 0)),              # weights/biases: constant
                pl.BlockSpec((1, 32), lambda i: (0, 0)),              # block index -> fetched to
                pl.BlockSpec((9, 32, 64), lambda i: (0, 0, 0)),       # VMEM once, reused across
                pl.BlockSpec((1, 64), lambda i: (0, 0)),              # grid steps
                pl.BlockSpec((9, 64, 128), lambda i: (0, 0, 0)),
                pl.BlockSpec((1, 128), lambda i: (0, 0)),
            ],
            out_specs=pl.BlockSpec((None, 16, 128), lambda i: (i, 0, 0)),
            scratch_shapes=[
                pltpu.VMEM((784, 32), jnp.float32),   # layer-1 conv output (28*28, 32)
                pltpu.VMEM((264, 32), jnp.float32),   # layer-2 padded input, 16x16 grid (+8 spare)
                pltpu.VMEM((224, 64), jnp.float32),   # layer-2 conv output (14*16, 64)
                pltpu.VMEM((88, 64), jnp.float32),    # layer-3 padded input, 9x9 grid (+7 spare)
                pltpu.VMEM((63, 128), jnp.float32),   # layer-3 conv output (7*9, 128)
                pltpu.VMEM((64, 128), jnp.float32),   # layer-3 pool grid 8x8 (pool padding=1)
            ],
        ),
        compiler_params=pltpu.CompilerParams(dimension_semantics=("parallel",)),
    )(p1, w1m, b1, w2m, b2, w3m, b3)

    # PyTorch x.view(N, -1) flattens in (C, H, W) order: (N,16,128) -> (N,128,16) -> (N,2048).
    return jnp.transpose(out, (0, 2, 1)).reshape(n, 4 * 4 * 128)


# ----------------------------------------------------------------------------------------------
# Parameters (deterministic, synthetic) — shapes follow the PyTorch module's __init__.
# ----------------------------------------------------------------------------------------------
def init_params(key, eps=1e-5):
    layers = []
    for cin, cout in ((1, 32), (32, 64), (64, 128)):
        key, k1, k2, k3, k4, k5, k6 = jax.random.split(key, 7)
        w = jax.random.normal(k1, (3, 3, cin, cout), jnp.float32) / jnp.sqrt(9.0 * cin)
        conv_b = 0.1 * jax.random.normal(k2, (cout,), jnp.float32)
        gamma = 1.0 + 0.1 * jax.random.normal(k3, (cout,), jnp.float32)
        beta = 0.1 * jax.random.normal(k4, (cout,), jnp.float32)
        run_mean = 0.1 * jax.random.normal(k5, (cout,), jnp.float32)
        run_var = 1.0 + 0.1 * jax.random.uniform(k6, (cout,), jnp.float32)
        scale = gamma / jnp.sqrt(run_var + eps)              # folded eval-mode BatchNorm
        bias = (conv_b - run_mean) * scale + beta
        layers.append((w, scale, bias))
    return layers


_POOL_PADS = (0, 0, 1)   # layer3 uses MaxPool2d(kernel=2, stride=2, padding=1)


# Pure-JAX reference for correctness checking (no Pallas).
def _ref_forward(x_nchw, layers):
    x = jnp.transpose(x_nchw, (0, 2, 3, 1)).astype(jnp.float32)
    for (w, s, b), pp in zip(layers, _POOL_PADS):
        y = jax.lax.conv_general_dilated(
            x, w, (1, 1), ((1, 1), (1, 1)),
            dimension_numbers=("NHWC", "HWIO", "NHWC"),
            precision=jax.lax.Precision.HIGHEST)
        y = jnp.maximum(y * s + b, 0.0)
        y = jax.lax.reduce_window(
            y, -jnp.inf, jax.lax.max,
            (1, 2, 2, 1), (1, 2, 2, 1),
            ((0, 0), (pp, pp), (pp, pp), (0, 0)))
        x = y
    x = jnp.transpose(x, (0, 3, 1, 2))
    return x.reshape(x.shape[0], -1)


if __name__ == "__main__":
    key = jax.random.PRNGKey(0)
    kx, kp = jax.random.split(key)
    # Input implied by _to_linear = 4*4*128 with three 2x pools: (N, 1, 28, 28)
    x = jax.random.normal(kx, (2, 1, 28, 28), jnp.float32)
    layers = init_params(kp)

    out = jax.block_until_ready(model_forward(x, layers))
    assert out.shape == (2, 4 * 4 * 128), out.shape

    ref = _ref_forward(x, layers)
    if not bool(jnp.allclose(out, ref, rtol=1e-3, atol=1e-3)):
        raise AssertionError(
            f"mismatch vs reference, max abs diff = {float(jnp.max(jnp.abs(out - ref)))}")

    print("KERNEL_OK")
</pallas_src>

<mosaic_0001>
module attributes {stable_mosaic.version = 11 : i64} {
  func.func @_fused_cnn_kernel(%arg0: i32, %arg1: memref<1x784x9xf32, #tpu.memory_space<vmem>>, %arg2: memref<9x32xf32, #tpu.memory_space<vmem>>, %arg3: memref<1x32xf32, #tpu.memory_space<vmem>>, %arg4: memref<9x32x64xf32, #tpu.memory_space<vmem>>, %arg5: memref<1x64xf32, #tpu.memory_space<vmem>>, %arg6: memref<9x64x128xf32, #tpu.memory_space<vmem>>, %arg7: memref<1x128xf32, #tpu.memory_space<vmem>>, %arg8: memref<1x16x128xf32, #tpu.memory_space<vmem>>, %arg9: memref<784x32xf32, #tpu.memory_space<vmem>>, %arg10: memref<264x32xf32, #tpu.memory_space<vmem>>, %arg11: memref<224x64xf32, #tpu.memory_space<vmem>>, %arg12: memref<88x64xf32, #tpu.memory_space<vmem>>, %arg13: memref<63x128xf32, #tpu.memory_space<vmem>>, %arg14: memref<64x128xf32, #tpu.memory_space<vmem>>) attributes {dimension_semantics = [#tpu.dimension_semantics<parallel>], iteration_bounds = array<i64: 2>, scalar_prefetch = 0 : i64, scratch_operands = 6 : i64, tpu.core_type = #tpu.core_type<tc>, window_params = [{transform_indices = @transform_0, window_bounds = array<i64: 1, 784, 9>}, {pipeline_mode = #tpu.pipeline_mode<synchronous>, transform_indices = @transform_1, window_bounds = array<i64: 9, 32>}, {pipeline_mode = #tpu.pipeline_mode<synchronous>, transform_indices = @transform_2, window_bounds = array<i64: 1, 32>}, {pipeline_mode = #tpu.pipeline_mode<synchronous>, transform_indices = @transform_3, window_bounds = array<i64: 9, 32, 64>}, {pipeline_mode = #tpu.pipeline_mode<synchronous>, transform_indices = @transform_4, window_bounds = array<i64: 1, 64>}, {pipeline_mode = #tpu.pipeline_mode<synchronous>, transform_indices = @transform_5, window_bounds = array<i64: 9, 64, 128>}, {pipeline_mode = #tpu.pipeline_mode<synchronous>, transform_indices = @transform_6, window_bounds = array<i64: 1, 128>}, {transform_indices = @transform_7, window_bounds = array<i64: 1, 16, 128>}]} {
    %cst = arith.constant 0.000000e+00 : f32
    %0 = vector.broadcast %cst : f32 to vector<264x32xf32>
    %c0 = arith.constant 0 : index
    %c0_0 = arith.constant 0 : index
    %1 = vector.load %arg10[%c0, %c0_0] : memref<264x32xf32, #tpu.memory_space<vmem>>, vector<264x32xf32>
    tpu.vector_store %arg10[%c0, %c0_0], %0 {strides = array<i32>} : memref<264x32xf32, #tpu.memory_space<vmem>>, vector<264x32xf32>,
    %cst_1 = arith.constant 0.000000e+00 : f32
    %2 = vector.broadcast %cst_1 : f32 to vector<88x64xf32>
    %c0_2 = arith.constant 0 : index
    %c0_3 = arith.constant 0 : index
    %3 = vector.load %arg12[%c0_2, %c0_3] : memref<88x64xf32, #tpu.memory_space<vmem>>, vector<88x64xf32>
    tpu.vector_store %arg12[%c0_2, %c0_3], %2 {strides = array<i32>} : memref<88x64xf32, #tpu.memory_space<vmem>>, vector<88x64xf32>,
    %cst_4 = arith.constant 0.000000e+00 : f32
    %4 = vector.broadcast %cst_4 : f32 to vector<64x128xf32>
    %c0_5 = arith.constant 0 : index
    %c0_6 = arith.constant 0 : index
    %5 = vector.load %arg14[%c0_5, %c0_6] : memref<64x128xf32, #tpu.memory_space<vmem>>, vector<64x128xf32>
    tpu.vector_store %arg14[%c0_5, %c0_6], %4 {strides = array<i32>} : memref<64x128xf32, #tpu.memory_space<vmem>>, vector<64x128xf32>,
    %c0_7 = arith.constant 0 : index
    %c0_8 = arith.constant 0 : index
    %c0_9 = arith.constant 0 : index
    %6 = vector.load %arg1[%c0_7, %c0_8, %c0_9] : memref<1x784x9xf32, #tpu.memory_space<vmem>>, vector<1x784x9xf32>
    %7 = vector.shape_cast %6 : vector<1x784x9xf32> to vector<784x9xf32>
    %c0_10 = arith.constant 0 : index
    %c0_11 = arith.constant 0 : index
    %8 = vector.load %arg2[%c0_10, %c0_11] : memref<9x32xf32, #tpu.memory_space<vmem>>, vector<9x32xf32>
    %cst_12 = arith.constant dense<0.000000e+00> : vector<784x32xf32>
    %9 = tpu.matmul %7, %8, %cst_12 {dimension_numbers = #tpu.dot_dimension_numbers<[1], [0], [0], [1], [0, 0, 1, 1], [], []>} : vector<784x9xf32>, vector<9x32xf32>, vector<784x32xf32> -> vector<784x32xf32>
    %c0_13 = arith.constant 0 : index
    %c0_14 = arith.constant 0 : index
    %10 = vector.load %arg9[%c0_13, %c0_14] : memref<784x32xf32, #tpu.memory_space<vmem>>, vector<784x32xf32>
    tpu.vector_store %arg9[%c0_13, %c0_14], %9 {strides = array<i32>} : memref<784x32xf32, #tpu.memory_space<vmem>>, vector<784x32xf32>,
    %c0_15 = arith.constant 0 : index
    %c0_16 = arith.constant 0 : index
    %11 = vector.load %arg3[%c0_15, %c0_16] : memref<1x32xf32, #tpu.memory_space<vmem>>, vector<1x32xf32>
    %c0_17 = arith.constant 0 : index
    %c0_18 = arith.constant 0 : index
    %12 = tpu.strided_load %arg9[%c0_17, %c0_18] {strides = array<i32: 2, 1>} : memref<784x32xf32, #tpu.memory_space<vmem>>, vector<14x32xf32>
    %c1 = arith.constant 1 : index
    %c0_19 = arith.constant 0 : index
    %13 = tpu.strided_load %arg9[%c1, %c0_19] {strides = array<i32: 2, 1>} : memref<784x32xf32, #tpu.memory_space<vmem>>, vector<14x32xf32>
    %14 = arith.maximumf %12, %13 : vector<14x32xf32>
    %c28 = arith.constant 28 : index
    %c0_20 = arith.constant 0 : index
    %15 = tpu.strided_load %arg9[%c28, %c0_20] {strides = array<i32: 2, 1>} : memref<784x32xf32, #tpu.memory_space<vmem>>, vector<14x32xf32>
    %c29 = arith.constant 29 : index
    %c0_21 = arith.constant 0 : index
    %16 = tpu.strided_load %arg9[%c29, %c0_21] {strides = array<i32: 2, 1>} : memref<784x32xf32, #tpu.memory_space<vmem>>, vector<14x32xf32>
    %17 = arith.maximumf %15, %16 : vector<14x32xf32>
    %18 = arith.maximumf %14, %17 : vector<14x32xf32>
    %19 = vector.broadcast %11 : vector<1x32xf32> to vector<14x32xf32>
    %20 = arith.addf %18, %19 : vector<14x32xf32>
    %cst_22 = arith.constant 0.000000e+00 : f32
    %21 = vector.broadcast %cst_22 : f32 to vector<14x32xf32>
    %22 = arith.maximumf %20, %21 : vector<14x32xf32>
    %c17 = arith.constant 17 : index
    %c0_23 = arith.constant 0 : index
    %23 = vector.load %arg10[%c17, %c0_23] : memref<264x32xf32, #tpu.memory_space<vmem>>, vector<14x32xf32>
    tpu.vector_store %arg10[%c17, %c0_23], %22 {strides = array<i32>} : memref<264x32xf32, #tpu.memory_space<vmem>>, vector<14x32xf32>,
    %c56 = arith.constant 56 : index
    %c0_24 = arith.constant 0 : index
    %24 = tpu.strided_load %arg9[%c56, %c0_24] {strides = array<i32: 2, 1>} : memref<784x32xf32, #tpu.memory_space<vmem>>, vector<14x32xf32>
    %c57 = arith.constant 57 : index
    %c0_25 = arith.constant 0 : index
    %25 = tpu.strided_load %arg9[%c57, %c0_25] {strides = array<i32: 2, 1>} : memref<784x32xf32, #tpu.memory_space<vmem>>, vector<14x32xf32>
    %26 = arith.maximumf %24, %25 : vector<14x32xf32>
    %c84 = arith.constant 84 : index
    %c0_26 = arith.constant 0 : index
    %27 = tpu.strided_load %arg9[%c84, %c0_26] {strides = array<i32: 2, 1>} : memref<784x32xf32, #tpu.memory_space<vmem>>, vector<14x32xf32>
    %c85 = arith.constant 85 : index
    %c0_27 = arith.constant 0 : index
    %28 = tpu.strided_load %arg9[%c85, %c0_27] {strides = array<i32: 2, 1>} : memref<784x32xf32, #tpu.memory_space<vmem>>, vector<14x32xf32>
    %29 = arith.maximumf %27, %28 : vector<14x32xf32>
    %30 = arith.maximumf %26, %29 : vector<14x32xf32>
    %31 = vector.broadcast %11 : vector<1x32xf32> to vector<14x32xf32>
    %32 = arith.addf %30, %31 : vector<14x32xf32>
    %cst_28 = arith.constant 0.000000e+00 : f32
    %33 = vector.broadcast %cst_28 : f32 to vector<14x32xf32>
    %34 = arith.maximumf %32, %33 : vector<14x32xf32>
    %c33 = arith.constant 33 : index
    %c0_29 = arith.constant 0 : index
    %35 = vector.load %arg10[%c33, %c0_29] : memref<264x32xf32, #tpu.memory_space<vmem>>, vector<14x32xf32>
    tpu.vector_store %arg10[%c33, %c0_29], %34 {strides = array<i32>} : memref<264x32xf32, #tpu.memory_space<vmem>>, vector<14x32xf32>,
    %c112 = arith.constant 112 : index
    %c0_30 = arith.constant 0 : index
    %36 = tpu.strided_load %arg9[%c112, %c0_30] {strides = array<i32: 2, 1>} : memref<784x32xf32, #tpu.memory_space<vmem>>, vector<14x32xf32>
    %c113 = arith.constant 113 : index
    %c0_31 = arith.constant 0 : index
    %37 = tpu.strided_load %arg9[%c113, %c0_31] {strides = array<i32: 2, 1>} : memref<784x32xf32, #tpu.memory_space<vmem>>, vector<14x32xf32>
    %38 = arith.maximumf %36, %37 : vector<14x32xf32>
    %c140 = arith.constant 140 : index
    %c0_32 = arith.constant 0 : index
    %39 = tpu.strided_load %arg9[%c140, %c0_32] {strides = array<i32: 2, 1>} : memref<784x32xf32, #tpu.memory_space<vmem>>, vector<14x32xf32>
    %c141 = arith.constant 141 : index
    %c0_33 = arith.constant 0 : index
    %40 = tpu.strided_load %arg9[%c141, %c0_33] {strides = array<i32: 2, 1>} : memref<784x32xf32, #tpu.memory_space<vmem>>, vector<14x32xf32>
    %41 = arith.maximumf %39, %40 : vector<14x32xf32>
    %42 = arith.maximumf %38, %41 : vector<14x32xf32>
    %43 = vector.broadcast %11 : vector<1x32xf32> to vector<14x32xf32>
    %44 = arith.addf %42, %43 : vector<14x32xf32>
    %cst_34 = arith.constant 0.000000e+00 : f32
    %45 = vector.broadcast %cst_34 : f32 to vector<14x32xf32>
    %46 = arith.maximumf %44, %45 : vector<14x32xf32>
    %c49 = arith.constant 49 : index
    %c0_35 = arith.constant 0 : index
    %47 = vector.load %arg10[%c49, %c0_35] : memref<264x32xf32, #tpu.memory_space<vmem>>, vector<14x32xf32>
    tpu.vector_store %arg10[%c49, %c0_35], %46 {strides = array<i32>} : memref<264x32xf32, #tpu.memory_space<vmem>>, vector<14x32xf32>,
    %c168 = arith.constant 168 : index
    %c0_36 = arith.constant 0 : index
    %48 = tpu.strided_load %arg9[%c168, %c0_36] {strides = array<i32: 2, 1>} : memref<784x32xf32, #tpu.memory_space<vmem>>, vector<14x32xf32>
    %c169 = arith.constant 169 : index
    %c0_37 = arith.constant 0 : index
    %49 = tpu.strided_load %arg9[%c169, %c0_37] {strides = array<i32: 2, 1>} : memref<784x32xf32, #tpu.memory_space<vmem>>, vector<14x32xf32>
    %50 = arith.maximumf %48, %49 : vector<14x32xf32>
    %c196 = arith.constant 196 : index
    %c0_38 = arith.constant 0 : index
    %51 = tpu.strided_load %arg9[%c196, %c0_38] {strides = array<i32: 2, 1>} : memref<784x32xf32, #tpu.memory_space<vmem>>, vector<14x32xf32>
    %c197 = arith.constant 197 : index
    %c0_39 = arith.constant 0 : index
    %52 = tpu.strided_load %arg9[%c197, %c0_39] {strides = array<i32: 2, 1>} : memref<784x32xf32, #tpu.memory_space<vmem>>, vector<14x32xf32>
    %53 = arith.maximumf %51, %52 : vector<14x32xf32>
    %54 = arith.maximumf %50, %53 : vector<14x32xf32>
    %55 = vector.broadcast %11 : vector<1x32xf32> to vector<14x32xf32>
    %56 = arith.addf %54, %55 : vector<14x32xf32>
    %cst_40 = arith.constant 0.000000e+00 : f32
    %57 = vector.broadcast %cst_40 : f32 to vector<14x32xf32>
    %58 = arith.maximumf %56, %57 : vector<14x32xf32>
    %c65 = arith.constant 65 : index
    %c0_41 = arith.constant 0 : index
    %59 = vector.load %arg10[%c65, %c0_41] : memref<264x32xf32, #tpu.memory_space<vmem>>, vector<14x32xf32>
    tpu.vector_store %arg10[%c65, %c0_41], %58 {strides = array<i32>} : memref<264x32xf32, #tpu.memory_space<vmem>>, vector<14x32xf32>,
    %c224 = arith.constant 224 : index
    %c0_42 = arith.constant 0 : index
    %60 = tpu.strided_load %arg9[%c224, %c0_42] {strides = array<i32: 2, 1>} : memref<784x32xf32, #tpu.memory_space<vmem>>, vector<14x32xf32>
    %c225 = arith.constant 225 : index
    %c0_43 = arith.constant 0 : index
    %61 = tpu.strided_load %arg9[%c225, %c0_43] {strides = array<i32: 2, 1>} : memref<784x32xf32, #tpu.memory_space<vmem>>, vector<14x32xf32>
    %62 = arith.maximumf %60, %61 : vector<14x32xf32>
    %c252 = arith.constant 252 : index
    %c0_44 = arith.constant 0 : index
    %63 = tpu.strided_load %arg9[%c252, %c0_44] {strides = array<i32: 2, 1>} : memref<784x32xf32, #tpu.memory_space<vmem>>, vector<14x32xf32>
    %c253 = arith.constant 253 : index
    %c0_45 = arith.constant 0 : index
    %64 = tpu.strided_load %arg9[%c253, %c0_45] {strides = array<i32: 2, 1>} : memref<784x32xf32, #tpu.memory_space<vmem>>, vector<14x32xf32>
    %65 = arith.maximumf %63, %64 : vector<14x32xf32>
    %66 = arith.maximumf %62, %65 : vector<14x32xf32>
    %67 = vector.broadcast %11 : vector<1x32xf32> to vector<14x32xf32>
    %68 = arith.addf %66, %67 : vector<14x32xf32>
    %cst_46 = arith.constant 0.000000e+00 : f32
    %69 = vector.broadcast %cst_46 : f32 to vector<14x32xf32>
    %70 = arith.maximumf %68, %69 : vector<14x32xf32>
    %c81 = arith.constant 81 : index
    %c0_47 = arith.constant 0 : index
    %71 = vector.load %arg10[%c81, %c0_47] : memref<264x32xf32, #tpu.memory_space<vmem>>, vector<14x32xf32>
    tpu.vector_store %arg10[%c81, %c0_47], %70 {strides = array<i32>} : memref<264x32xf32, #tpu.memory_space<vmem>>, vector<14x32xf32>,
    %c280 = arith.constant 280 : index
    %c0_48 = arith.constant 0 : index
    %72 = tpu.strided_load %arg9[%c280, %c0_48] {strides = array<i32: 2, 1>} : memref<784x32xf32, #tpu.memory_space<vmem>>, vector<14x32xf32>
    %c281 = arith.constant 281 : index
    %c0_49 = arith.constant 0 : index
    %73 = tpu.strided_load %arg9[%c281, %c0_49] {strides = array<i32: 2, 1>} : memref<784x32xf32, #tpu.memory_space<vmem>>, vector<14x32xf32>
    %74 = arith.maximumf %72, %73 : vector<14x32xf32>
    %c308 = arith.constant 308 : index
    %c0_50 = arith.constant 0 : index
    %75 = tpu.strided_load %arg9[%c308, %c0_50] {strides = array<i32: 2, 1>} : memref<784x32xf32, #tpu.memory_space<vmem>>, vector<14x32xf32>
    %c309 = arith.constant 309 : index
    %c0_51 = arith.constant 0 : index
    %76 = tpu.strided_load %arg9[%c309, %c0_51] {strides = array<i32: 2, 1>} : memref<784x32xf32, #tpu.memory_space<vmem>>, vector<14x32xf32>
    %77 = arith.maximumf %75, %76 : vector<14x32xf32>
    %78 = arith.maximumf %74, %77 : vector<14x32xf32>
    %79 = vector.broadcast %11 : vector<1x32xf32> to vector<14x32xf32>
    %80 = arith.addf %78, %79 : vector<14x32xf32>
    %cst_52 = arith.constant 0.000000e+00 : f32
    %81 = vector.broadcast %cst_52 : f32 to vector<14x32xf32>
    %82 = arith.maximumf %80, %81 : vector<14x32xf32>
    %c97 = arith.constant 97 : index
    %c0_53 = arith.constant 0 : index
    %83 = vector.load %arg10[%c97, %c0_53] : memref<264x32xf32, #tpu.memory_space<vmem>>, vector<14x32xf32>
    tpu.vector_store %arg10[%c97, %c0_53], %82 {strides = array<i32>} : memref<264x32xf32, #tpu.memory_space<vmem>>, vector<14x32xf32>,
    %c336 = arith.constant 336 : index
    %c0_54 = arith.constant 0 : index
    %84 = tpu.strided_load %arg9[%c336, %c0_54] {strides = array<i32: 2, 1>} : memref<784x32xf32, #tpu.memory_space<vmem>>, vector<14x32xf32>
    %c337 = arith.constant 337 : index
    %c0_55 = arith.constant 0 : index
    %85 = tpu.strided_load %arg9[%c337, %c0_55] {strides = array<i32: 2, 1>} : memref<784x32xf32, #tpu.memory_space<vmem>>, vector<14x32xf32>
    %86 = arith.maximumf %84, %85 : vector<14x32xf32>
    %c364 = arith.constant 364 : index
    %c0_56 = arith.constant 0 : index
    %87 = tpu.strided_load %arg9[%c364, %c0_56] {strides = array<i32: 2, 1>} : memref<784x32xf32, #tpu.memory_space<vmem>>, vector<14x32xf32>
    %c365 = arith.constant 365 : index
    %c0_57 = arith.constant 0 : index
    %88 = tpu.strided_load %arg9[%c365, %c0_57] {strides = array<i32: 2, 1>} : memref<784x32xf32, #tpu.memory_space<vmem>>, vector<14x32xf32>
    %89 = arith.maximumf %87, %88 : vector<14x32xf32>
    %90 = arith.maximumf %86, %89 : vector<14x32xf32>
    %91 = vector.broadcast %11 : vector<1x32xf32> to vector<14x32xf32>
    %92 = arith.addf %90, %91 : vector<14x32xf32>
    %cst_58 = arith.constant 0.000000e+00 : f32
    %93 = vector.broadcast %cst_58 : f32 to vector<14x32xf32>
    %94 = arith.maximumf %92, %93 : vector<14x32xf32>
    %c113_59 = arith.constant 113 : index
    %c0_60 = arith.constant 0 : index
    %95 = vector.load %arg10[%c113_59, %c0_60] : memref<264x32xf32, #tpu.memory_space<vmem>>, vector<14x32xf32>
    tpu.vector_store %arg10[%c113_59, %c0_60], %94 {strides = array<i32>} : memref<264x32xf32, #tpu.memory_space<vmem>>, vector<14x32xf32>,
    %c392 = arith.constant 392 : index
    %c0_61 = arith.constant 0 : index
    %96 = tpu.strided_load %arg9[%c392, %c0_61] {strides = array<i32: 2, 1>} : memref<784x32xf32, #tpu.memory_space<vmem>>, vector<14x32xf32>
    %c393 = arith.constant 393 : index
    %c0_62 = arith.constant 0 : index
    %97 = tpu.strided_load %arg9[%c393, %c0_62] {strides = array<i32: 2, 1>} : memref<784x32xf32, #tpu.memory_space<vmem>>, vector<14x32xf32>
    %98 = arith.maximumf %96, %97 : vector<14x32xf32>
    %c420 = arith.constant 420 : index
    %c0_63 = arith.constant 0 : index
    %99 = tpu.strided_load %arg9[%c420, %c0_63] {strides = array<i32: 2, 1>} : memref<784x32xf32, #tpu.memory_space<vmem>>, vector<14x32xf32>
    %c421 = arith.constant 421 : index
    %c0_64 = arith.constant 0 : index
    %100 = tpu.strided_load %arg9[%c421, %c0_64] {strides = array<i32: 2, 1>} : memref<784x32xf32, #tpu.memory_space<vmem>>, vector<14x32xf32>
    %101 = arith.maximumf %99, %100 : vector<14x32xf32>
    %102 = arith.maximumf %98, %101 : vector<14x32xf32>
    %103 = vector.broadcast %11 : vector<1x32xf32> to vector<14x32xf32>
    %104 = arith.addf %102, %103 : vector<14x32xf32>
    %cst_65 = arith.constant 0.000000e+00 : f32
    %105 = vector.broadcast %cst_65 : f32 to vector<14x32xf32>
    %106 = arith.maximumf %104, %105 : vector<14x32xf32>
    %c129 = arith.constant 129 : index
    %c0_66 = arith.constant 0 : index
    %107 = vector.load %arg10[%c129, %c0_66] : memref<264x32xf32, #tpu.memory_space<vmem>>, vector<14x32xf32>
    tpu.vector_store %arg10[%c129, %c0_66], %106 {strides = array<i32>} : memref<264x32xf32, #tpu.memory_space<vmem>>, vector<14x32xf32>,
    %c448 = arith.constant 448 : index
    %c0_67 = arith.constant 0 : index
    %108 = tpu.strided_load %arg9[%c448, %c0_67] {strides = array<i32: 2, 1>} : memref<784x32xf32, #tpu.memory_space<vmem>>, vector<14x32xf32>
    %c449 = arith.constant 449 : index
    %c0_68 = arith.constant 0 : index
    %109 = tpu.strided_load %arg9[%c449, %c0_68] {strides = array<i32: 2, 1>} : memref<784x32xf32, #tpu.memory_space<vmem>>, vector<14x32xf32>
    %110 = arith.maximumf %108, %109 : vector<14x32xf32>
    %c476 = arith.constant 476 : index
    %c0_69 = arith.constant 0 : index
    %111 = tpu.strided_load %arg9[%c476, %c0_69] {strides = array<i32: 2, 1>} : memref<784x32xf32, #tpu.memory_space<vmem>>, vector<14x32xf32>
    %c477 = arith.constant 477 : index
    %c0_70 = arith.constant 0 : index
    %112 = tpu.strided_load %arg9[%c477, %c0_70] {strides = array<i32: 2, 1>} : memref<784x32xf32, #tpu.memory_space<vmem>>, vector<14x32xf32>
    %113 = arith.maximumf %111, %112 : vector<14x32xf32>
    %114 = arith.maximumf %110, %113 : vector<14x32xf32>
    %115 = vector.broadcast %11 : vector<1x32xf32> to vector<14x32xf32>
    %116 = arith.addf %114, %115 : vector<14x32xf32>
    %cst_71 = arith.constant 0.000000e+00 : f32
    %117 = vector.broadcast %cst_71 : f32 to vector<14x32xf32>
    %118 = arith.maximumf %116, %117 : vector<14x32xf32>
    %c145 = arith.constant 145 : index
    %c0_72 = arith.constant 0 : index
    %119 = vector.load %arg10[%c145, %c0_72] : memref<264x32xf32, #tpu.memory_space<vmem>>, vector<14x32xf32>
    tpu.vector_store %arg10[%c145, %c0_72], %118 {strides = array<i32>} : memref<264x32xf32, #tpu.memory_space<vmem>>, vector<14x32xf32>,
    %c504 = arith.constant 504 : index
    %c0_73 = arith.constant 0 : index
    %120 = tpu.strided_load %arg9[%c504, %c0_73] {strides = array<i32: 2, 1>} : memref<784x32xf32, #tpu.memory_space<vmem>>, vector<14x32xf32>
    %c505 = arith.constant 505 : index
    %c0_74 = arith.constant 0 : index
    %121 = tpu.strided_load %arg9[%c505, %c0_74] {strides = array<i32: 2, 1>} : memref<784x32xf32, #tpu.memory_space<vmem>>, vector<14x32xf32>
    %122 = arith.maximumf %120, %121 : vector<14x32xf32>
    %c532 = arith.constant 532 : index
    %c0_75 = arith.constant 0 : index
    %123 = tpu.strided_load %arg9[%c532, %c0_75] {strides = array<i32: 2, 1>} : memref<784x32xf32, #tpu.memory_space<vmem>>, vector<14x32xf32>
    %c533 = arith.constant 533 : index
    %c0_76 = arith.constant 0 : index
    %124 = tpu.strided_load %arg9[%c533, %c0_76] {strides = array<i32: 2, 1>} : memref<784x32xf32, #tpu.memory_space<vmem>>, vector<14x32xf32>
    %125 = arith.maximumf %123, %124 : vector<14x32xf32>
    %126 = arith.maximumf %122, %125 : vector<14x32xf32>
    %127 = vector.broadcast %11 : vector<1x32xf32> to vector<14x32xf32>
    %128 = arith.addf %126, %127 : vector<14x32xf32>
    %cst_77 = arith.constant 0.000000e+00 : f32
    %129 = vector.broadcast %cst_77 : f32 to vector<14x32xf32>
    %130 = arith.maximumf %128, %129 : vector<14x32xf32>
    %c161 = arith.constant 161 : index
    %c0_78 = arith.constant 0 : index
    %131 = vector.load %arg10[%c161, %c0_78] : memref<264x32xf32, #tpu.memory_space<vmem>>, vector<14x32xf32>
    tpu.vector_store %arg10[%c161, %c0_78], %130 {strides = array<i32>} : memref<264x32xf32, #tpu.memory_space<vmem>>, vector<14x32xf32>,
    %c560 = arith.constant 560 : index
    %c0_79 = arith.constant 0 : index
    %132 = tpu.strided_load %arg9[%c560, %c0_79] {strides = array<i32: 2, 1>} : memref<784x32xf32, #tpu.memory_space<vmem>>, vector<14x32xf32>
    %c561 = arith.constant 561 : index
    %c0_80 = arith.constant 0 : index
    %133 = tpu.strided_load %arg9[%c561, %c0_80] {strides = array<i32: 2, 1>} : memref<784x32xf32, #tpu.memory_space<vmem>>, vector<14x32xf32>
    %134 = arith.maximumf %132, %133 : vector<14x32xf32>
    %c588 = arith.constant 588 : index
    %c0_81 = arith.constant 0 : index
    %135 = tpu.strided_load %arg9[%c588, %c0_81] {strides = array<i32: 2, 1>} : memref<784x32xf32, #tpu.memory_space<vmem>>, vector<14x32xf32>
    %c589 = arith.constant 589 : index
    %c0_82 = arith.constant 0 : index
    %136 = tpu.strided_load %arg9[%c589, %c0_82] {strides = array<i32: 2, 1>} : memref<784x32xf32, #tpu.memory_space<vmem>>, vector<14x32xf32>
    %137 = arith.maximumf %135, %136 : vector<14x32xf32>
    %138 = arith.maximumf %134, %137 : vector<14x32xf32>
    %139 = vector.broadcast %11 : vector<1x32xf32> to vector<14x32xf32>
    %140 = arith.addf %138, %139 : vector<14x32xf32>
    %cst_83 = arith.constant 0.000000e+00 : f32
    %141 = vector.broadcast %cst_83 : f32 to vector<14x32xf32>
    %142 = arith.maximumf %140, %141 : vector<14x32xf32>
    %c177 = arith.constant 177 : index
    %c0_84 = arith.constant 0 : index
    %143 = vector.load %arg10[%c177, %c0_84] : memref<264x32xf32, #tpu.memory_space<vmem>>, vector<14x32xf32>
    tpu.vector_store %arg10[%c177, %c0_84], %142 {strides = array<i32>} : memref<264x32xf32, #tpu.memory_space<vmem>>, vector<14x32xf32>,
    %c616 = arith.constant 616 : index
    %c0_85 = arith.constant 0 : index
    %144 = tpu.strided_load %arg9[%c616, %c0_85] {strides = array<i32: 2, 1>} : memref<784x32xf32, #tpu.memory_space<vmem>>, vector<14x32xf32>
    %c617 = arith.constant 617 : index
    %c0_86 = arith.constant 0 : index
    %145 = tpu.strided_load %arg9[%c617, %c0_86] {strides = array<i32: 2, 1>} : memref<784x32xf32, #tpu.memory_space<vmem>>, vector<14x32xf32>
    %146 = arith.maximumf %144, %145 : vector<14x32xf32>
    %c644 = arith.constant 644 : index
    %c0_87 = arith.constant 0 : index
    %147 = tpu.strided_load %arg9[%c644, %c0_87] {strides = array<i32: 2, 1>} : memref<784x32xf32, #tpu.memory_space<vmem>>, vector<14x32xf32>
    %c645 = arith.constant 645 : index
    %c0_88 = arith.constant 0 : index
    %148 = tpu.strided_load %arg9[%c645, %c0_88] {strides = array<i32: 2, 1>} : memref<784x32xf32, #tpu.memory_space<vmem>>, vector<14x32xf32>
    %149 = arith.maximumf %147, %148 : vector<14x32xf32>
    %150 = arith.maximumf %146, %149 : vector<14x32xf32>
    %151 = vector.broadcast %11 : vector<1x32xf32> to vector<14x32xf32>
    %152 = arith.addf %150, %151 : vector<14x32xf32>
    %cst_89 = arith.constant 0.000000e+00 : f32
    %153 = vector.broadcast %cst_89 : f32 to vector<14x32xf32>
    %154 = arith.maximumf %152, %153 : vector<14x32xf32>
    %c193 = arith.constant 193 : index
    %c0_90 = arith.constant 0 : index
    %155 = vector.load %arg10[%c193, %c0_90] : memref<264x32xf32, #tpu.memory_space<vmem>>, vector<14x32xf32>
    tpu.vector_store %arg10[%c193, %c0_90], %154 {strides = array<i32>} : memref<264x32xf32, #tpu.memory_space<vmem>>, vector<14x32xf32>,
    %c672 = arith.constant 672 : index
    %c0_91 = arith.constant 0 : index
    %156 = tpu.strided_load %arg9[%c672, %c0_91] {strides = array<i32: 2, 1>} : memref<784x32xf32, #tpu.memory_space<vmem>>, vector<14x32xf32>
    %c673 = arith.constant 673 : index
    %c0_92 = arith.constant 0 : index
    %157 = tpu.strided_load %arg9[%c673, %c0_92] {strides = array<i32: 2, 1>} : memref<784x32xf32, #tpu.memory_space<vmem>>, vector<14x32xf32>
    %158 = arith.maximumf %156, %157 : vector<14x32xf32>
    %c700 = arith.constant 700 : index
    %c0_93 = arith.constant 0 : index
    %159 = tpu.strided_load %arg9[%c700, %c0_93] {strides = array<i32: 2, 1>} : memref<784x32xf32, #tpu.memory_space<vmem>>, vector<14x32xf32>
    %c701 = arith.constant 701 : index
    %c0_94 = arith.constant 0 : index
    %160 = tpu.strided_load %arg9[%c701, %c0_94] {strides = array<i32: 2, 1>} : memref<784x32xf32, #tpu.memory_space<vmem>>, vector<14x32xf32>
    %161 = arith.maximumf %159, %160 : vector<14x32xf32>
    %162 = arith.maximumf %158, %161 : vector<14x32xf32>
    %163 = vector.broadcast %11 : vector<1x32xf32> to vector<14x32xf32>
    %164 = arith.addf %162, %163 : vector<14x32xf32>
    %cst_95 = arith.constant 0.000000e+00 : f32
    %165 = vector.broadcast %cst_95 : f32 to vector<14x32xf32>
    %166 = arith.maximumf %164, %165 : vector<14x32xf32>
    %c209 = arith.constant 209 : index
    %c0_96 = arith.constant 0 : index
    %167 = vector.load %arg10[%c209, %c0_96] : memref<264x32xf32, #tpu.memory_space<vmem>>, vector<14x32xf32>
    tpu.vector_store %arg10[%c209, %c0_96], %166 {strides = array<i32>} : memref<264x32xf32, #tpu.memory_space<vmem>>, vector<14x32xf32>,
    %c728 = arith.constant 728 : index
    %c0_97 = arith.constant 0 : index
    %168 = tpu.strided_load %arg9[%c728, %c0_97] {strides = array<i32: 2, 1>} : memref<784x32xf32, #tpu.memory_space<vmem>>, vector<14x32xf32>
    %c729 = arith.constant 729 : index
    %c0_98 = arith.constant 0 : index
    %169 = tpu.strided_load %arg9[%c729, %c0_98] {strides = array<i32: 2, 1>} : memref<784x32xf32, #tpu.memory_space<vmem>>, vector<14x32xf32>
    %170 = arith.maximumf %168, %169 : vector<14x32xf32>
    %c756 = arith.constant 756 : index
    %c0_99 = arith.constant 0 : index
    %171 = tpu.strided_load %arg9[%c756, %c0_99] {strides = array<i32: 2, 1>} : memref<784x32xf32, #tpu.memory_space<vmem>>, vector<14x32xf32>
    %c757 = arith.constant 757 : index
    %c0_100 = arith.constant 0 : index
    %172 = tpu.strided_load %arg9[%c757, %c0_100] {strides = array<i32: 2, 1>} : memref<784x32xf32, #tpu.memory_space<vmem>>, vector<14x32xf32>
    %173 = arith.maximumf %171, %172 : vector<14x32xf32>
    %174 = arith.maximumf %170, %173 : vector<14x32xf32>
    %175 = vector.broadcast %11 : vector<1x32xf32> to vector<14x32xf32>
    %176 = arith.addf %174, %175 : vector<14x32xf32>
    %cst_101 = arith.constant 0.000000e+00 : f32
    %177 = vector.broadcast %cst_101 : f32 to vector<14x32xf32>
    %178 = arith.maximumf %176, %177 : vector<14x32xf32>
    %c225_102 = arith.constant 225 : index
    %c0_103 = arith.constant 0 : index
    %179 = vector.load %arg10[%c225_102, %c0_103] : memref<264x32xf32, #tpu.memory_space<vmem>>, vector<14x32xf32>
    tpu.vector_store %arg10[%c225_102, %c0_103], %178 {strides = array<i32>} : memref<264x32xf32, #tpu.memory_space<vmem>>, vector<14x32xf32>,
    %c0_104 = arith.constant 0 : index
    %c0_105 = arith.constant 0 : index
    %180 = vector.load %arg10[%c0_104, %c0_105] : memref<264x32xf32, #tpu.memory_space<vmem>>, vector<224x32xf32>
    %c0_106 = arith.constant 0 : index
    %c0_107 = arith.constant 0 : index
    %c0_108 = arith.constant 0 : index
    %181 = vector.load %arg4[%c0_106, %c0_107, %c0_108] : memref<9x32x64xf32, #tpu.memory_space<vmem>>, vector<1x32x64xf32>
    %182 = vector.shape_cast %181 : vector<1x32x64xf32> to vector<32x64xf32>
    %cst_109 = arith.constant dense<0.000000e+00> : vector<224x64xf32>
    %183 = tpu.matmul %180, %182, %cst_109 {dimension_numbers = #tpu.dot_dimension_numbers<[1], [0], [0], [1], [0, 0, 1, 1], [], []>} : vector<224x32xf32>, vector<32x64xf32>, vector<224x64xf32> -> vector<224x64xf32>
    %c1_110 = arith.constant 1 : index
    %c0_111 = arith.constant 0 : index
    %184 = vector.load %arg10[%c1_110, %c0_111] : memref<264x32xf32, #tpu.memory_space<vmem>>, vector<224x32xf32>
    %c1_112 = arith.constant 1 : index
    %c0_113 = arith.constant 0 : index
    %c0_114 = arith.constant 0 : index
    %185 = vector.load %arg4[%c1_112, %c0_113, %c0_114] : memref<9x32x64xf32, #tpu.memory_space<vmem>>, vector<1x32x64xf32>
    %186 = vector.shape_cast %185 : vector<1x32x64xf32> to vector<32x64xf32>
    %cst_115 = arith.constant dense<0.000000e+00> : vector<224x64xf32>
    %187 = tpu.matmul %184, %186, %cst_115 {dimension_numbers = #tpu.dot_dimension_numbers<[1], [0], [0], [1], [0, 0, 1, 1], [], []>} : vector<224x32xf32>, vector<32x64xf32>, vector<224x64xf32> -> vector<224x64xf32>
    %188 = arith.addf %183, %187 : vector<224x64xf32>
    %c2 = arith.constant 2 : index
    %c0_116 = arith.constant 0 : index
    %189 = vector.load %arg10[%c2, %c0_116] : memref<264x32xf32, #tpu.memory_space<vmem>>, vector<224x32xf32>
    %c2_117 = arith.constant 2 : index
    %c0_118 = arith.constant 0 : index
    %c0_119 = arith.constant 0 : index
    %190 = vector.load %arg4[%c2_117, %c0_118, %c0_119] : memref<9x32x64xf32, #tpu.memory_space<vmem>>, vector<1x32x64xf32>
    %191 = vector.shape_cast %190 : vector<1x32x64xf32> to vector<32x64xf32>
    %cst_120 = arith.constant dense<0.000000e+00> : vector<224x64xf32>
    %192 = tpu.matmul %189, %191, %cst_120 {dimension_numbers = #tpu.dot_dimension_numbers<[1], [0], [0], [1], [0, 0, 1, 1], [], []>} : vector<224x32xf32>, vector<32x64xf32>, vector<224x64xf32> -> vector<224x64xf32>
    %193 = arith.addf %188, %192 : vector<224x64xf32>
    %c16 = arith.constant 16 : index
    %c0_121 = arith.constant 0 : index
    %194 = vector.load %arg10[%c16, %c0_121] : memref<264x32xf32, #tpu.memory_space<vmem>>, vector<224x32xf32>
    %c3 = arith.constant 3 : index
    %c0_122 = arith.constant 0 : index
    %c0_123 = arith.constant 0 : index
    %195 = vector.load %arg4[%c3, %c0_122, %c0_123] : memref<9x32x64xf32, #tpu.memory_space<vmem>>, vector<1x32x64xf32>
    %196 = vector.shape_cast %195 : vector<1x32x64xf32> to vector<32x64xf32>
    %cst_124 = arith.constant dense<0.000000e+00> : vector<224x64xf32>
    %197 = tpu.matmul %194, %196, %cst_124 {dimension_numbers = #tpu.dot_dimension_numbers<[1], [0], [0], [1], [0, 0, 1, 1], [], []>} : vector<224x32xf32>, vector<32x64xf32>, vector<224x64xf32> -> vector<224x64xf32>
    %198 = arith.addf %193, %197 : vector<224x64xf32>
    %c17_125 = arith.constant 17 : index
    %c0_126 = arith.constant 0 : index
    %199 = vector.load %arg10[%c17_125, %c0_126] : memref<264x32xf32, #tpu.memory_space<vmem>>, vector<224x32xf32>
    %c4 = arith.constant 4 : index
    %c0_127 = arith.constant 0 : index
    %c0_128 = arith.constant 0 : index
    %200 = vector.load %arg4[%c4, %c0_127, %c0_128] : memref<9x32x64xf32, #tpu.memory_space<vmem>>, vector<1x32x64xf32>
    %201 = vector.shape_cast %200 : vector<1x32x64xf32> to vector<32x64xf32>
    %cst_129 = arith.constant dense<0.000000e+00> : vector<224x64xf32>
    %202 = tpu.matmul %199, %201, %cst_129 {dimension_numbers = #tpu.dot_dimension_numbers<[1], [0], [0], [1], [0, 0, 1, 1], [], []>} : vector<224x32xf32>, vector<32x64xf32>, vector<224x64xf32> -> vector<224x64xf32>
    %203 = arith.addf %198, %202 : vector<224x64xf32>
    %c18 = arith.constant 18 : index
    %c0_130 = arith.constant 0 : index
    %204 = vector.load %arg10[%c18, %c0_130] : memref<264x32xf32, #tpu.memory_space<vmem>>, vector<224x32xf32>
    %c5 = arith.constant 5 : index
    %c0_131 = arith.constant 0 : index
    %c0_132 = arith.constant 0 : index
    %205 = vector.load %arg4[%c5, %c0_131, %c0_132] : memref<9x32x64xf32, #tpu.memory_space<vmem>>, vector<1x32x64xf32>
    %206 = vector.shape_cast %205 : vector<1x32x64xf32> to vector<32x64xf32>
    %cst_133 = arith.constant dense<0.000000e+00> : vector<224x64xf32>
    %207 = tpu.matmul %204, %206, %cst_133 {dimension_numbers = #tpu.dot_dimension_numbers<[1], [0], [0], [1], [0, 0, 1, 1], [], []>} : vector<224x32xf32>, vector<32x64xf32>, vector<224x64xf32> -> vector<224x64xf32>
    %208 = arith.addf %203, %207 : vector<224x64xf32>
    %c32 = arith.constant 32 : index
    %c0_134 = arith.constant 0 : index
    %209 = vector.load %arg10[%c32, %c0_134] : memref<264x32xf32, #tpu.memory_space<vmem>>, vector<224x32xf32>
    %c6 = arith.constant 6 : index
    %c0_135 = arith.constant 0 : index
    %c0_136 = arith.constant 0 : index
    %210 = vector.load %arg4[%c6, %c0_135, %c0_136] : memref<9x32x64xf32, #tpu.memory_space<vmem>>, vector<1x32x64xf32>
    %211 = vector.shape_cast %210 : vector<1x32x64xf32> to vector<32x64xf32>
    %cst_137 = arith.constant dense<0.000000e+00> : vector<224x64xf32>
    %212 = tpu.matmul %209, %211, %cst_137 {dimension_numbers = #tpu.dot_dimension_numbers<[1], [0], [0], [1], [0, 0, 1, 1], [], []>} : vector<224x32xf32>, vector<32x64xf32>, vector<224x64xf32> -> vector<224x64xf32>
    %213 = arith.addf %208, %212 : vector<224x64xf32>
    %c33_138 = arith.constant 33 : index
    %c0_139 = arith.constant 0 : index
    %214 = vector.load %arg10[%c33_138, %c0_139] : memref<264x32xf32, #tpu.memory_space<vmem>>, vector<224x32xf32>
    %c7 = arith.constant 7 : index
    %c0_140 = arith.constant 0 : index
    %c0_141 = arith.constant 0 : index
    %215 = vector.load %arg4[%c7, %c0_140, %c0_141] : memref<9x32x64xf32, #tpu.memory_space<vmem>>, vector<1x32x64xf32>
    %216 = vector.shape_cast %215 : vector<1x32x64xf32> to vector<32x64xf32>
    %cst_142 = arith.constant dense<0.000000e+00> : vector<224x64xf32>
    %217 = tpu.matmul %214, %216, %cst_142 {dimension_numbers = #tpu.dot_dimension_numbers<[1], [0], [0], [1], [0, 0, 1, 1], [], []>} : vector<224x32xf32>, vector<32x64xf32>, vector<224x64xf32> -> vector<224x64xf32>
    %218 = arith.addf %213, %217 : vector<224x64xf32>
    %c34 = arith.constant 34 : index
    %c0_143 = arith.constant 0 : index
    %219 = vector.load %arg10[%c34, %c0_143] : memref<264x32xf32, #tpu.memory_space<vmem>>, vector<224x32xf32>
    %c8 = arith.constant 8 : index
    %c0_144 = arith.constant 0 : index
    %c0_145 = arith.constant 0 : index
    %220 = vector.load %arg4[%c8, %c0_144, %c0_145] : memref<9x32x64xf32, #tpu.memory_space<vmem>>, vector<1x32x64xf32>
    %221 = vector.shape_cast %220 : vector<1x32x64xf32> to vector<32x64xf32>
    %cst_146 = arith.constant dense<0.000000e+00> : vector<224x64xf32>
    %222 = tpu.matmul %219, %221, %cst_146 {dimension_numbers = #tpu.dot_dimension_numbers<[1], [0], [0], [1], [0, 0, 1, 1], [], []>} : vector<224x32xf32>, vector<32x64xf32>, vector<224x64xf32> -> vector<224x64xf32>
    %223 = arith.addf %218, %222 : vector<224x64xf32>
    %c0_147 = arith.constant 0 : index
    %c0_148 = arith.constant 0 : index
    %224 = vector.load %arg11[%c0_147, %c0_148] : memref<224x64xf32, #tpu.memory_space<vmem>>, vector<224x64xf32>
    tpu.vector_store %arg11[%c0_147, %c0_148], %223 {strides = array<i32>} : memref<224x64xf32, #tpu.memory_space<vmem>>, vector<224x64xf32>,
    %c0_149 = arith.constant 0 : index
    %c0_150 = arith.constant 0 : index
    %225 = vector.load %arg5[%c0_149, %c0_150] : memref<1x64xf32, #tpu.memory_space<vmem>>, vector<1x64xf32>
    %c0_151 = arith.constant 0 : index
    %c0_152 = arith.constant 0 : index
    %226 = tpu.strided_load %arg11[%c0_151, %c0_152] {strides = array<i32: 2, 1>} : memref<224x64xf32, #tpu.memory_space<vmem>>, vector<7x64xf32>
    %c1_153 = arith.constant 1 : index
    %c0_154 = arith.constant 0 : index
    %227 = tpu.strided_load %arg11[%c1_153, %c0_154] {strides = array<i32: 2, 1>} : memref<224x64xf32, #tpu.memory_space<vmem>>, vector<7x64xf32>
    %228 = arith.maximumf %226, %227 : vector<7x64xf32>
    %c16_155 = arith.constant 16 : index
    %c0_156 = arith.constant 0 : index
    %229 = tpu.strided_load %arg11[%c16_155, %c0_156] {strides = array<i32: 2, 1>} : memref<224x64xf32, #tpu.memory_space<vmem>>, vector<7x64xf32>
    %c17_157 = arith.constant 17 : index
    %c0_158 = arith.constant 0 : index
    %230 = tpu.strided_load %arg11[%c17_157, %c0_158] {strides = array<i32: 2, 1>} : memref<224x64xf32, #tpu.memory_space<vmem>>, vector<7x64xf32>
    %231 = arith.maximumf %229, %230 : vector<7x64xf32>
    %232 = arith.maximumf %228, %231 : vector<7x64xf32>
    %233 = vector.broadcast %225 : vector<1x64xf32> to vector<7x64xf32>
    %234 = arith.addf %232, %233 : vector<7x64xf32>
    %cst_159 = arith.constant 0.000000e+00 : f32
    %235 = vector.broadcast %cst_159 : f32 to vector<7x64xf32>
    %236 = arith.maximumf %234, %235 : vector<7x64xf32>
    %c10 = arith.constant 10 : index
    %c0_160 = arith.constant 0 : index
    %237 = vector.load %arg12[%c10, %c0_160] : memref<88x64xf32, #tpu.memory_space<vmem>>, vector<7x64xf32>
    tpu.vector_store %arg12[%c10, %c0_160], %236 {strides = array<i32>} : memref<88x64xf32, #tpu.memory_space<vmem>>, vector<7x64xf32>,
    %c32_161 = arith.constant 32 : index
    %c0_162 = arith.constant 0 : index
    %238 = tpu.strided_load %arg11[%c32_161, %c0_162] {strides = array<i32: 2, 1>} : memref<224x64xf32, #tpu.memory_space<vmem>>, vector<7x64xf32>
    %c33_163 = arith.constant 33 : index
    %c0_164 = arith.constant 0 : index
    %239 = tpu.strided_load %arg11[%c33_163, %c0_164] {strides = array<i32: 2, 1>} : memref<224x64xf32, #tpu.memory_space<vmem>>, vector<7x64xf32>
    %240 = arith.maximumf %238, %239 : vector<7x64xf32>
    %c48 = arith.constant 48 : index
    %c0_165 = arith.constant 0 : index
    %241 = tpu.strided_load %arg11[%c48, %c0_165] {strides = array<i32: 2, 1>} : memref<224x64xf32, #tpu.memory_space<vmem>>, vector<7x64xf32>
    %c49_166 = arith.constant 49 : index
    %c0_167 = arith.constant 0 : index
    %242 = tpu.strided_load %arg11[%c49_166, %c0_167] {strides = array<i32: 2, 1>} : memref<224x64xf32, #tpu.memory_space<vmem>>, vector<7x64xf32>
    %243 = arith.maximumf %241, %242 : vector<7x64xf32>
    %244 = arith.maximumf %240, %243 : vector<7x64xf32>
    %245 = vector.broadcast %225 : vector<1x64xf32> to vector<7x64xf32>
    %246 = arith.addf %244, %245 : vector<7x64xf32>
    %cst_168 = arith.constant 0.000000e+00 : f32
    %247 = vector.broadcast %cst_168 : f32 to vector<7x64xf32>
    %248 = arith.maximumf %246, %247 : vector<7x64xf32>
    %c19 = arith.constant 19 : index
    %c0_169 = arith.constant 0 : index
    %249 = vector.load %arg12[%c19, %c0_169] : memref<88x64xf32, #tpu.memory_space<vmem>>, vector<7x64xf32>
    tpu.vector_store %arg12[%c19, %c0_169], %248 {strides = array<i32>} : memref<88x64xf32, #tpu.memory_space<vmem>>, vector<7x64xf32>,
    %c64 = arith.constant 64 : index
    %c0_170 = arith.constant 0 : index
    %250 = tpu.strided_load %arg11[%c64, %c0_170] {strides = array<i32: 2, 1>} : memref<224x64xf32, #tpu.memory_space<vmem>>, vector<7x64xf32>
    %c65_171 = arith.constant 65 : index
    %c0_172 = arith.constant 0 : index
    %251 = tpu.strided_load %arg11[%c65_171, %c0_172] {strides = array<i32: 2, 1>} : memref<224x64xf32, #tpu.memory_space<vmem>>, vector<7x64xf32>
    %252 = arith.maximumf %250, %251 : vector<7x64xf32>
    %c80 = arith.constant 80 : index
    %c0_173 = arith.constant 0 : index
    %253 = tpu.strided_load %arg11[%c80, %c0_173] {strides = array<i32: 2, 1>} : memref<224x64xf32, #tpu.memory_space<vmem>>, vector<7x64xf32>
    %c81_174 = arith.constant 81 : index
    %c0_175 = arith.constant 0 : index
    %254 = tpu.strided_load %arg11[%c81_174, %c0_175] {strides = array<i32: 2, 1>} : memref<224x64xf32, #tpu.memory_space<vmem>>, vector<7x64xf32>
    %255 = arith.maximumf %253, %254 : vector<7x64xf32>
    %256 = arith.maximumf %252, %255 : vector<7x64xf32>
    %257 = vector.broadcast %225 : vector<1x64xf32> to vector<7x64xf32>
    %258 = arith.addf %256, %257 : vector<7x64xf32>
    %cst_176 = arith.constant 0.000000e+00 : f32
    %259 = vector.broadcast %cst_176 : f32 to vector<7x64xf32>
    %260 = arith.maximumf %258, %259 : vector<7x64xf32>
    %c28_177 = arith.constant 28 : index
    %c0_178 = arith.constant 0 : index
    %261 = vector.load %arg12[%c28_177, %c0_178] : memref<88x64xf32, #tpu.memory_space<vmem>>, vector<7x64xf32>
    tpu.vector_store %arg12[%c28_177, %c0_178], %260 {strides = array<i32>} : memref<88x64xf32, #tpu.memory_space<vmem>>, vector<7x64xf32>,
    %c96 = arith.constant 96 : index
    %c0_179 = arith.constant 0 : index
    %262 = tpu.strided_load %arg11[%c96, %c0_179] {strides = array<i32: 2, 1>} : memref<224x64xf32, #tpu.memory_space<vmem>>, vector<7x64xf32>
    %c97_180 = arith.constant 97 : index
    %c0_181 = arith.constant 0 : index
    %263 = tpu.strided_load %arg11[%c97_180, %c0_181] {strides = array<i32: 2, 1>} : memref<224x64xf32, #tpu.memory_space<vmem>>, vector<7x64xf32>
    %264 = arith.maximumf %262, %263 : vector<7x64xf32>
    %c112_182 = arith.constant 112 : index
    %c0_183 = arith.constant 0 : index
    %265 = tpu.strided_load %arg11[%c112_182, %c0_183] {strides = array<i32: 2, 1>} : memref<224x64xf32, #tpu.memory_space<vmem>>, vector<7x64xf32>
    %c113_184 = arith.constant 113 : index
    %c0_185 = arith.constant 0 : index
    %266 = tpu.strided_load %arg11[%c113_184, %c0_185] {strides = array<i32: 2, 1>} : memref<224x64xf32, #tpu.memory_space<vmem>>, vector<7x64xf32>
    %267 = arith.maximumf %265, %266 : vector<7x64xf32>
    %268 = arith.maximumf %264, %267 : vector<7x64xf32>
    %269 = vector.broadcast %225 : vector<1x64xf32> to vector<7x64xf32>
    %270 = arith.addf %268, %269 : vector<7x64xf32>
    %cst_186 = arith.constant 0.000000e+00 : f32
    %271 = vector.broadcast %cst_186 : f32 to vector<7x64xf32>
    %272 = arith.maximumf %270, %271 : vector<7x64xf32>
    %c37 = arith.constant 37 : index
    %c0_187 = arith.constant 0 : index
    %273 = vector.load %arg12[%c37, %c0_187] : memref<88x64xf32, #tpu.memory_space<vmem>>, vector<7x64xf32>
    tpu.vector_store %arg12[%c37, %c0_187], %272 {strides = array<i32>} : memref<88x64xf32, #tpu.memory_space<vmem>>, vector<7x64xf32>,
    %c128 = arith.constant 128 : index
    %c0_188 = arith.constant 0 : index
    %274 = tpu.strided_load %arg11[%c128, %c0_188] {strides = array<i32: 2, 1>} : memref<224x64xf32, #tpu.memory_space<vmem>>, vector<7x64xf32>
    %c129_189 = arith.constant 129 : index
    %c0_190 = arith.constant 0 : index
    %275 = tpu.strided_load %arg11[%c129_189, %c0_190] {strides = array<i32: 2, 1>} : memref<224x64xf32, #tpu.memory_space<vmem>>, vector<7x64xf32>
    %276 = arith.maximumf %274, %275 : vector<7x64xf32>
    %c144 = arith.constant 144 : index
    %c0_191 = arith.constant 0 : index
    %277 = tpu.strided_load %arg11[%c144, %c0_191] {strides = array<i32: 2, 1>} : memref<224x64xf32, #tpu.memory_space<vmem>>, vector<7x64xf32>
    %c145_192 = arith.constant 145 : index
    %c0_193 = arith.constant 0 : index
    %278 = tpu.strided_load %arg11[%c145_192, %c0_193] {strides = array<i32: 2, 1>} : memref<224x64xf32, #tpu.memory_space<vmem>>, vector<7x64xf32>
    %279 = arith.maximumf %277, %278 : vector<7x64xf32>
    %280 = arith.maximumf %276, %279 : vector<7x64xf32>
    %281 = vector.broadcast %225 : vector<1x64xf32> to vector<7x64xf32>
    %282 = arith.addf %280, %281 : vector<7x64xf32>
    %cst_194 = arith.constant 0.000000e+00 : f32
    %283 = vector.broadcast %cst_194 : f32 to vector<7x64xf32>
    %284 = arith.maximumf %282, %283 : vector<7x64xf32>
    %c46 = arith.constant 46 : index
    %c0_195 = arith.constant 0 : index
    %285 = vector.load %arg12[%c46, %c0_195] : memref<88x64xf32, #tpu.memory_space<vmem>>, vector<7x64xf32>
    tpu.vector_store %arg12[%c46, %c0_195], %284 {strides = array<i32>} : memref<88x64xf32, #tpu.memory_space<vmem>>, vector<7x64xf32>,
    %c160 = arith.constant 160 : index
    %c0_196 = arith.constant 0 : index
    %286 = tpu.strided_load %arg11[%c160, %c0_196] {strides = array<i32: 2, 1>} : memref<224x64xf32, #tpu.memory_space<vmem>>, vector<7x64xf32>
    %c161_197 = arith.constant 161 : index
    %c0_198 = arith.constant 0 : index
    %287 = tpu.strided_load %arg11[%c161_197, %c0_198] {strides = array<i32: 2, 1>} : memref<224x64xf32, #tpu.memory_space<vmem>>, vector<7x64xf32>
    %288 = arith.maximumf %286, %287 : vector<7x64xf32>
    %c176 = arith.constant 176 : index
    %c0_199 = arith.constant 0 : index
    %289 = tpu.strided_load %arg11[%c176, %c0_199] {strides = array<i32: 2, 1>} : memref<224x64xf32, #tpu.memory_space<vmem>>, vector<7x64xf32>
    %c177_200 = arith.constant 177 : index
    %c0_201 = arith.constant 0 : index
    %290 = tpu.strided_load %arg11[%c177_200, %c0_201] {strides = array<i32: 2, 1>} : memref<224x64xf32, #tpu.memory_space<vmem>>, vector<7x64xf32>
    %291 = arith.maximumf %289, %290 : vector<7x64xf32>
    %292 = arith.maximumf %288, %291 : vector<7x64xf32>
    %293 = vector.broadcast %225 : vector<1x64xf32> to vector<7x64xf32>
    %294 = arith.addf %292, %293 : vector<7x64xf32>
    %cst_202 = arith.constant 0.000000e+00 : f32
    %295 = vector.broadcast %cst_202 : f32 to vector<7x64xf32>
    %296 = arith.maximumf %294, %295 : vector<7x64xf32>
    %c55 = arith.constant 55 : index
    %c0_203 = arith.constant 0 : index
    %297 = vector.load %arg12[%c55, %c0_203] : memref<88x64xf32, #tpu.memory_space<vmem>>, vector<7x64xf32>
    tpu.vector_store %arg12[%c55, %c0_203], %296 {strides = array<i32>} : memref<88x64xf32, #tpu.memory_space<vmem>>, vector<7x64xf32>,
    %c192 = arith.constant 192 : index
    %c0_204 = arith.constant 0 : index
    %298 = tpu.strided_load %arg11[%c192, %c0_204] {strides = array<i32: 2, 1>} : memref<224x64xf32, #tpu.memory_space<vmem>>, vector<7x64xf32>
    %c193_205 = arith.constant 193 : index
    %c0_206 = arith.constant 0 : index
    %299 = tpu.strided_load %arg11[%c193_205, %c0_206] {strides = array<i32: 2, 1>} : memref<224x64xf32, #tpu.memory_space<vmem>>, vector<7x64xf32>
    %300 = arith.maximumf %298, %299 : vector<7x64xf32>
    %c208 = arith.constant 208 : index
    %c0_207 = arith.constant 0 : index
    %301 = tpu.strided_load %arg11[%c208, %c0_207] {strides = array<i32: 2, 1>} : memref<224x64xf32, #tpu.memory_space<vmem>>, vector<7x64xf32>
    %c209_208 = arith.constant 209 : index
    %c0_209 = arith.constant 0 : index
    %302 = tpu.strided_load %arg11[%c209_208, %c0_209] {strides = array<i32: 2, 1>} : memref<224x64xf32, #tpu.memory_space<vmem>>, vector<7x64xf32>
    %303 = arith.maximumf %301, %302 : vector<7x64xf32>
    %304 = arith.maximumf %300, %303 : vector<7x64xf32>
    %305 = vector.broadcast %225 : vector<1x64xf32> to vector<7x64xf32>
    %306 = arith.addf %304, %305 : vector<7x64xf32>
    %cst_210 = arith.constant 0.000000e+00 : f32
    %307 = vector.broadcast %cst_210 : f32 to vector<7x64xf32>
    %308 = arith.maximumf %306, %307 : vector<7x64xf32>
    %c64_211 = arith.constant 64 : index
    %c0_212 = arith.constant 0 : index
    %309 = vector.load %arg12[%c64_211, %c0_212] : memref<88x64xf32, #tpu.memory_space<vmem>>, vector<7x64xf32>
    tpu.vector_store %arg12[%c64_211, %c0_212], %308 {strides = array<i32>} : memref<88x64xf32, #tpu.memory_space<vmem>>, vector<7x64xf32>,
    %c0_213 = arith.constant 0 : index
    %c0_214 = arith.constant 0 : index
    %310 = vector.load %arg12[%c0_213, %c0_214] : memref<88x64xf32, #tpu.memory_space<vmem>>, vector<63x64xf32>
    %c0_215 = arith.constant 0 : index
    %c0_216 = arith.constant 0 : index
    %c0_217 = arith.constant 0 : index
    %311 = vector.load %arg6[%c0_215, %c0_216, %c0_217] : memref<9x64x128xf32, #tpu.memory_space<vmem>>, vector<1x64x128xf32>
    %312 = vector.shape_cast %311 : vector<1x64x128xf32> to vector<64x128xf32>
    %cst_218 = arith.constant dense<0.000000e+00> : vector<63x128xf32>
    %313 = tpu.matmul %310, %312, %cst_218 {dimension_numbers = #tpu.dot_dimension_numbers<[1], [0], [0], [1], [0, 0, 1, 1], [], []>} : vector<63x64xf32>, vector<64x128xf32>, vector<63x128xf32> -> vector<63x128xf32>
    %c1_219 = arith.constant 1 : index
    %c0_220 = arith.constant 0 : index
    %314 = vector.load %arg12[%c1_219, %c0_220] : memref<88x64xf32, #tpu.memory_space<vmem>>, vector<63x64xf32>
    %c1_221 = arith.constant 1 : index
    %c0_222 = arith.constant 0 : index
    %c0_223 = arith.constant 0 : index
    %315 = vector.load %arg6[%c1_221, %c0_222, %c0_223] : memref<9x64x128xf32, #tpu.memory_space<vmem>>, vector<1x64x128xf32>
    %316 = vector.shape_cast %315 : vector<1x64x128xf32> to vector<64x128xf32>
    %cst_224 = arith.constant dense<0.000000e+00> : vector<63x128xf32>
    %317 = tpu.matmul %314, %316, %cst_224 {dimension_numbers = #tpu.dot_dimension_numbers<[1], [0], [0], [1], [0, 0, 1, 1], [], []>} : vector<63x64xf32>, vector<64x128xf32>, vector<63x128xf32> -> vector<63x128xf32>
    %318 = arith.addf %313, %317 : vector<63x128xf32>
    %c2_225 = arith.constant 2 : index
    %c0_226 = arith.constant 0 : index
    %319 = vector.load %arg12[%c2_225, %c0_226] : memref<88x64xf32, #tpu.memory_space<vmem>>, vector<63x64xf32>
    %c2_227 = arith.constant 2 : index
    %c0_228 = arith.constant 0 : index
    %c0_229 = arith.constant 0 : index
    %320 = vector.load %arg6[%c2_227, %c0_228, %c0_229] : memref<9x64x128xf32, #tpu.memory_space<vmem>>, vector<1x64x128xf32>
    %321 = vector.shape_cast %320 : vector<1x64x128xf32> to vector<64x128xf32>
    %cst_230 = arith.constant dense<0.000000e+00> : vector<63x128xf32>
    %322 = tpu.matmul %319, %321, %cst_230 {dimension_numbers = #tpu.dot_dimension_numbers<[1], [0], [0], [1], [0, 0, 1, 1], [], []>} : vector<63x64xf32>, vector<64x128xf32>, vector<63x128xf32> -> vector<63x128xf32>
    %323 = arith.addf %318, %322 : vector<63x128xf32>
    %c9 = arith.constant 9 : index
    %c0_231 = arith.constant 0 : index
    %324 = vector.load %arg12[%c9, %c0_231] : memref<88x64xf32, #tpu.memory_space<vmem>>, vector<63x64xf32>
    %c3_232 = arith.constant 3 : index
    %c0_233 = arith.constant 0 : index
    %c0_234 = arith.constant 0 : index
    %325 = vector.load %arg6[%c3_232, %c0_233, %c0_234] : memref<9x64x128xf32, #tpu.memory_space<vmem>>, vector<1x64x128xf32>
    %326 = vector.shape_cast %325 : vector<1x64x128xf32> to vector<64x128xf32>
    %cst_235 = arith.constant dense<0.000000e+00> : vector<63x128xf32>
    %327 = tpu.matmul %324, %326, %cst_235 {dimension_numbers = #tpu.dot_dimension_numbers<[1], [0], [0], [1], [0, 0, 1, 1], [], []>} : vector<63x64xf32>, vector<64x128xf32>, vector<63x128xf32> -> vector<63x128xf32>
    %328 = arith.addf %323, %327 : vector<63x128xf32>
    %c10_236 = arith.constant 10 : index
    %c0_237 = arith.constant 0 : index
    %329 = vector.load %arg12[%c10_236, %c0_237] : memref<88x64xf32, #tpu.memory_space<vmem>>, vector<63x64xf32>
    %c4_238 = arith.constant 4 : index
    %c0_239 = arith.constant 0 : index
    %c0_240 = arith.constant 0 : index
    %330 = vector.load %arg6[%c4_238, %c0_239, %c0_240] : memref<9x64x128xf32, #tpu.memory_space<vmem>>, vector<1x64x128xf32>
    %331 = vector.shape_cast %330 : vector<1x64x128xf32> to vector<64x128xf32>
    %cst_241 = arith.constant dense<0.000000e+00> : vector<63x128xf32>
    %332 = tpu.matmul %329, %331, %cst_241 {dimension_numbers = #tpu.dot_dimension_numbers<[1], [0], [0], [1], [0, 0, 1, 1], [], []>} : vector<63x64xf32>, vector<64x128xf32>, vector<63x128xf32> -> vector<63x128xf32>
    %333 = arith.addf %328, %332 : vector<63x128xf32>
    %c11 = arith.constant 11 : index
    %c0_242 = arith.constant 0 : index
    %334 = vector.load %arg12[%c11, %c0_242] : memref<88x64xf32, #tpu.memory_space<vmem>>, vector<63x64xf32>
    %c5_243 = arith.constant 5 : index
    %c0_244 = arith.constant 0 : index
    %c0_245 = arith.constant 0 : index
    %335 = vector.load %arg6[%c5_243, %c0_244, %c0_245] : memref<9x64x128xf32, #tpu.memory_space<vmem>>, vector<1x64x128xf32>
    %336 = vector.shape_cast %335 : vector<1x64x128xf32> to vector<64x128xf32>
    %cst_246 = arith.constant dense<0.000000e+00> : vector<63x128xf32>
    %337 = tpu.matmul %334, %336, %cst_246 {dimension_numbers = #tpu.dot_dimension_numbers<[1], [0], [0], [1], [0, 0, 1, 1], [], []>} : vector<63x64xf32>, vector<64x128xf32>, vector<63x128xf32> -> vector<63x128xf32>
    %338 = arith.addf %333, %337 : vector<63x128xf32>
    %c18_247 = arith.constant 18 : index
    %c0_248 = arith.constant 0 : index
    %339 = vector.load %arg12[%c18_247, %c0_248] : memref<88x64xf32, #tpu.memory_space<vmem>>, vector<63x64xf32>
    %c6_249 = arith.constant 6 : index
    %c0_250 = arith.constant 0 : index
    %c0_251 = arith.constant 0 : index
    %340 = vector.load %arg6[%c6_249, %c0_250, %c0_251] : memref<9x64x128xf32, #tpu.memory_space<vmem>>, vector<1x64x128xf32>
    %341 = vector.shape_cast %340 : vector<1x64x128xf32> to vector<64x128xf32>
    %cst_252 = arith.constant dense<0.000000e+00> : vector<63x128xf32>
    %342 = tpu.matmul %339, %341, %cst_252 {dimension_numbers = #tpu.dot_dimension_numbers<[1], [0], [0], [1], [0, 0, 1, 1], [], []>} : vector<63x64xf32>, vector<64x128xf32>, vector<63x128xf32> -> vector<63x128xf32>
    %343 = arith.addf %338, %342 : vector<63x128xf32>
    %c19_253 = arith.constant 19 : index
    %c0_254 = arith.constant 0 : index
    %344 = vector.load %arg12[%c19_253, %c0_254] : memref<88x64xf32, #tpu.memory_space<vmem>>, vector<63x64xf32>
    %c7_255 = arith.constant 7 : index
    %c0_256 = arith.constant 0 : index
    %c0_257 = arith.constant 0 : index
    %345 = vector.load %arg6[%c7_255, %c0_256, %c0_257] : memref<9x64x128xf32, #tpu.memory_space<vmem>>, vector<1x64x128xf32>
    %346 = vector.shape_cast %345 : vector<1x64x128xf32> to vector<64x128xf32>
    %cst_258 = arith.constant dense<0.000000e+00> : vector<63x128xf32>
    %347 = tpu.matmul %344, %346, %cst_258 {dimension_numbers = #tpu.dot_dimension_numbers<[1], [0], [0], [1], [0, 0, 1, 1], [], []>} : vector<63x64xf32>, vector<64x128xf32>, vector<63x128xf32> -> vector<63x128xf32>
    %348 = arith.addf %343, %347 : vector<63x128xf32>
    %c20 = arith.constant 20 : index
    %c0_259 = arith.constant 0 : index
    %349 = vector.load %arg12[%c20, %c0_259] : memref<88x64xf32, #tpu.memory_space<vmem>>, vector<63x64xf32>
    %c8_260 = arith.constant 8 : index
    %c0_261 = arith.constant 0 : index
    %c0_262 = arith.constant 0 : index
    %350 = vector.load %arg6[%c8_260, %c0_261, %c0_262] : memref<9x64x128xf32, #tpu.memory_space<vmem>>, vector<1x64x128xf32>
    %351 = vector.shape_cast %350 : vector<1x64x128xf32> to vector<64x128xf32>
    %cst_263 = arith.constant dense<0.000000e+00> : vector<63x128xf32>
    %352 = tpu.matmul %349, %351, %cst_263 {dimension_numbers = #tpu.dot_dimension_numbers<[1], [0], [0], [1], [0, 0, 1, 1], [], []>} : vector<63x64xf32>, vector<64x128xf32>, vector<63x128xf32> -> vector<63x128xf32>
    %353 = arith.addf %348, %352 : vector<63x128xf32>
    %c0_264 = arith.constant 0 : index
    %c0_265 = arith.constant 0 : index
    %354 = vector.load %arg7[%c0_264, %c0_265] : memref<1x128xf32, #tpu.memory_space<vmem>>, vector<1x128xf32>
    %355 = vector.broadcast %354 : vector<1x128xf32> to vector<63x128xf32>
    %356 = arith.addf %353, %355 : vector<63x128xf32>
    %cst_266 = arith.constant 0.000000e+00 : f32
    %357 = vector.broadcast %cst_266 : f32 to vector<63x128xf32>
    %358 = arith.maximumf %356, %357 : vector<63x128xf32>
    %c0_267 = arith.constant 0 : index
    %c0_268 = arith.constant 0 : index
    %359 = vector.load %arg13[%c0_267, %c0_268] : memref<63x128xf32, #tpu.memory_space<vmem>>, vector<63x128xf32>
    tpu.vector_store %arg13[%c0_267, %c0_268], %358 {strides = array<i32>} : memref<63x128xf32, #tpu.memory_space<vmem>>, vector<63x128xf32>,
    %c0_269 = arith.constant 0 : index
    %c0_270 = arith.constant 0 : index
    %360 = vector.load %arg13[%c0_269, %c0_270] : memref<63x128xf32, #tpu.memory_space<vmem>>, vector<7x128xf32>
    %c9_271 = arith.constant 9 : index
    %c0_272 = arith.constant 0 : index
    %361 = vector.load %arg14[%c9_271, %c0_272] : memref<64x128xf32, #tpu.memory_space<vmem>>, vector<7x128xf32>
    tpu.vector_store %arg14[%c9_271, %c0_272], %360 {strides = array<i32>} : memref<64x128xf32, #tpu.memory_space<vmem>>, vector<7x128xf32>,
    %c9_273 = arith.constant 9 : index
    %c0_274 = arith.constant 0 : index
    %362 = vector.load %arg13[%c9_273, %c0_274] : memref<63x128xf32, #tpu.memory_space<vmem>>, vector<7x128xf32>
    %c17_275 = arith.constant 17 : index
    %c0_276 = arith.constant 0 : index
    %363 = vector.load %arg14[%c17_275, %c0_276] : memref<64x128xf32, #tpu.memory_space<vmem>>, vector<7x128xf32>
    tpu.vector_store %arg14[%c17_275, %c0_276], %362 {strides = array<i32>} : memref<64x128xf32, #tpu.memory_space<vmem>>, vector<7x128xf32>,
    %c18_277 = arith.constant 18 : index
    %c0_278 = arith.constant 0 : index
    %364 = vector.load %arg13[%c18_277, %c0_278] : memref<63x128xf32, #tpu.memory_space<vmem>>, vector<7x128xf32>
    %c25 = arith.constant 25 : index
    %c0_279 = arith.constant 0 : index
    %365 = vector.load %arg14[%c25, %c0_279] : memref<64x128xf32, #tpu.memory_space<vmem>>, vector<7x128xf32>
    tpu.vector_store %arg14[%c25, %c0_279], %364 {strides = array<i32>} : memref<64x128xf32, #tpu.memory_space<vmem>>, vector<7x128xf32>,
    %c27 = arith.constant 27 : index
    %c0_280 = arith.constant 0 : index
    %366 = vector.load %arg13[%c27, %c0_280] : memref<63x128xf32, #tpu.memory_space<vmem>>, vector<7x128xf32>
    %c33_281 = arith.constant 33 : index
    %c0_282 = arith.constant 0 : index
    %367 = vector.load %arg14[%c33_281, %c0_282] : memref<64x128xf32, #tpu.memory_space<vmem>>, vector<7x128xf32>
    tpu.vector_store %arg14[%c33_281, %c0_282], %366 {strides = array<i32>} : memref<64x128xf32, #tpu.memory_space<vmem>>, vector<7x128xf32>,
    %c36 = arith.constant 36 : index
    %c0_283 = arith.constant 0 : index
    %368 = vector.load %arg13[%c36, %c0_283] : memref<63x128xf32, #tpu.memory_space<vmem>>, vector<7x128xf32>
    %c41 = arith.constant 41 : index
    %c0_284 = arith.constant 0 : index
    %369 = vector.load %arg14[%c41, %c0_284] : memref<64x128xf32, #tpu.memory_space<vmem>>, vector<7x128xf32>
    tpu.vector_store %arg14[%c41, %c0_284], %368 {strides = array<i32>} : memref<64x128xf32, #tpu.memory_space<vmem>>, vector<7x128xf32>,
    %c45 = arith.constant 45 : index
    %c0_285 = arith.constant 0 : index
    %370 = vector.load %arg13[%c45, %c0_285] : memref<63x128xf32, #tpu.memory_space<vmem>>, vector<7x128xf32>
    %c49_286 = arith.constant 49 : index
    %c0_287 = arith.constant 0 : index
    %371 = vector.load %arg14[%c49_286, %c0_287] : memref<64x128xf32, #tpu.memory_space<vmem>>, vector<7x128xf32>
    tpu.vector_store %arg14[%c49_286, %c0_287], %370 {strides = array<i32>} : memref<64x128xf32, #tpu.memory_space<vmem>>, vector<7x128xf32>,
    %c54 = arith.constant 54 : index
    %c0_288 = arith.constant 0 : index
    %372 = vector.load %arg13[%c54, %c0_288] : memref<63x128xf32, #tpu.memory_space<vmem>>, vector<7x128xf32>
    %c57_289 = arith.constant 57 : index
    %c0_290 = arith.constant 0 : index
    %373 = vector.load %arg14[%c57_289, %c0_290] : memref<64x128xf32, #tpu.memory_space<vmem>>, vector<7x128xf32>
    tpu.vector_store %arg14[%c57_289, %c0_290], %372 {strides = array<i32>} : memref<64x128xf32, #tpu.memory_space<vmem>>, vector<7x128xf32>,
    %c0_291 = arith.constant 0 : index
    %c0_292 = arith.constant 0 : index
    %374 = tpu.strided_load %arg14[%c0_291, %c0_292] {strides = array<i32: 2, 1>} : memref<64x128xf32, #tpu.memory_space<vmem>>, vector<4x128xf32>
    %c1_293 = arith.constant 1 : index
    %c0_294 = arith.constant 0 : index
    %375 = tpu.strided_load %arg14[%c1_293, %c0_294] {strides = array<i32: 2, 1>} : memref<64x128xf32, #tpu.memory_space<vmem>>, vector<4x128xf32>
    %376 = arith.maximumf %374, %375 : vector<4x128xf32>
    %c8_295 = arith.constant 8 : index
    %c0_296 = arith.constant 0 : index
    %377 = tpu.strided_load %arg14[%c8_295, %c0_296] {strides = array<i32: 2, 1>} : memref<64x128xf32, #tpu.memory_space<vmem>>, vector<4x128xf32>
    %c9_297 = arith.constant 9 : index
    %c0_298 = arith.constant 0 : index
    %378 = tpu.strided_load %arg14[%c9_297, %c0_298] {strides = array<i32: 2, 1>} : memref<64x128xf32, #tpu.memory_space<vmem>>, vector<4x128xf32>
    %379 = arith.maximumf %377, %378 : vector<4x128xf32>
    %380 = arith.maximumf %376, %379 : vector<4x128xf32>
    %c0_299 = arith.constant 0 : index
    %c0_300 = arith.constant 0 : index
    %c0_301 = arith.constant 0 : index
    %381 = vector.load %arg8[%c0_299, %c0_300, %c0_301] : memref<1x16x128xf32, #tpu.memory_space<vmem>>, vector<1x4x128xf32>
    %382 = vector.shape_cast %381 : vector<1x4x128xf32> to vector<4x128xf32>
    %383 = vector.shape_cast %380 : vector<4x128xf32> to vector<1x4x128xf32>
    tpu.vector_store %arg8[%c0_299, %c0_300, %c0_301], %383 {strides = array<i32>} : memref<1x16x128xf32, #tpu.memory_space<vmem>>, vector<1x4x128xf32>,
    %c16_302 = arith.constant 16 : index
    %c0_303 = arith.constant 0 : index
    %384 = tpu.strided_load %arg14[%c16_302, %c0_303] {strides = array<i32: 2, 1>} : memref<64x128xf32, #tpu.memory_space<vmem>>, vector<4x128xf32>
    %c17_304 = arith.constant 17 : index
    %c0_305 = arith.constant 0 : index
    %385 = tpu.strided_load %arg14[%c17_304, %c0_305] {strides = array<i32: 2, 1>} : memref<64x128xf32, #tpu.memory_space<vmem>>, vector<4x128xf32>
    %386 = arith.maximumf %384, %385 : vector<4x128xf32>
    %c24 = arith.constant 24 : index
    %c0_306 = arith.constant 0 : index
    %387 = tpu.strided_load %arg14[%c24, %c0_306] {strides = array<i32: 2, 1>} : memref<64x128xf32, #tpu.memory_space<vmem>>, vector<4x128xf32>
    %c25_307 = arith.constant 25 : index
    %c0_308 = arith.constant 0 : index
    %388 = tpu.strided_load %arg14[%c25_307, %c0_308] {strides = array<i32: 2, 1>} : memref<64x128xf32, #tpu.memory_space<vmem>>, vector<4x128xf32>
    %389 = arith.maximumf %387, %388 : vector<4x128xf32>
    %390 = arith.maximumf %386, %389 : vector<4x128xf32>
    %c0_309 = arith.constant 0 : index
    %c4_310 = arith.constant 4 : index
    %c0_311 = arith.constant 0 : index
    %391 = vector.load %arg8[%c0_309, %c4_310, %c0_311] : memref<1x16x128xf32, #tpu.memory_space<vmem>>, vector<1x4x128xf32>
    %392 = vector.shape_cast %391 : vector<1x4x128xf32> to vector<4x128xf32>
    %393 = vector.shape_cast %390 : vector<4x128xf32> to vector<1x4x128xf32>
    tpu.vector_store %arg8[%c0_309, %c4_310, %c0_311], %393 {strides = array<i32>} : memref<1x16x128xf32, #tpu.memory_space<vmem>>, vector<1x4x128xf32>,
    %c32_312 = arith.constant 32 : index
    %c0_313 = arith.constant 0 : index
    %394 = tpu.strided_load %arg14[%c32_312, %c0_313] {strides = array<i32: 2, 1>} : memref<64x128xf32, #tpu.memory_space<vmem>>, vector<4x128xf32>
    %c33_314 = arith.constant 33 : index
    %c0_315 = arith.constant 0 : index
    %395 = tpu.strided_load %arg14[%c33_314, %c0_315] {strides = array<i32: 2, 1>} : memref<64x128xf32, #tpu.memory_space<vmem>>, vector<4x128xf32>
    %396 = arith.maximumf %394, %395 : vector<4x128xf32>
    %c40 = arith.constant 40 : index
    %c0_316 = arith.constant 0 : index
    %397 = tpu.strided_load %arg14[%c40, %c0_316] {strides = array<i32: 2, 1>} : memref<64x128xf32, #tpu.memory_space<vmem>>, vector<4x128xf32>
    %c41_317 = arith.constant 41 : index
    %c0_318 = arith.constant 0 : index
    %398 = tpu.strided_load %arg14[%c41_317, %c0_318] {strides = array<i32: 2, 1>} : memref<64x128xf32, #tpu.memory_space<vmem>>, vector<4x128xf32>
    %399 = arith.maximumf %397, %398 : vector<4x128xf32>
    %400 = arith.maximumf %396, %399 : vector<4x128xf32>
    %c0_319 = arith.constant 0 : index
    %c8_320 = arith.constant 8 : index
    %c0_321 = arith.constant 0 : index
    %401 = vector.load %arg8[%c0_319, %c8_320, %c0_321] : memref<1x16x128xf32, #tpu.memory_space<vmem>>, vector<1x4x128xf32>
    %402 = vector.shape_cast %401 : vector<1x4x128xf32> to vector<4x128xf32>
    %403 = vector.shape_cast %400 : vector<4x128xf32> to vector<1x4x128xf32>
    tpu.vector_store %arg8[%c0_319, %c8_320, %c0_321], %403 {strides = array<i32>} : memref<1x16x128xf32, #tpu.memory_space<vmem>>, vector<1x4x128xf32>,
    %c48_322 = arith.constant 48 : index
    %c0_323 = arith.constant 0 : index
    %404 = tpu.strided_load %arg14[%c48_322, %c0_323] {strides = array<i32: 2, 1>} : memref<64x128xf32, #tpu.memory_space<vmem>>, vector<4x128xf32>
    %c49_324 = arith.constant 49 : index
    %c0_325 = arith.constant 0 : index
    %405 = tpu.strided_load %arg14[%c49_324, %c0_325] {strides = array<i32: 2, 1>} : memref<64x128xf32, #tpu.memory_space<vmem>>, vector<4x128xf32>
    %406 = arith.maximumf %404, %405 : vector<4x128xf32>
    %c56_326 = arith.constant 56 : index
    %c0_327 = arith.constant 0 : index
    %407 = tpu.strided_load %arg14[%c56_326, %c0_327] {strides = array<i32: 2, 1>} : memref<64x128xf32, #tpu.memory_space<vmem>>, vector<4x128xf32>
    %c57_328 = arith.constant 57 : index
    %c0_329 = arith.constant 0 : index
    %408 = tpu.strided_load %arg14[%c57_328, %c0_329] {strides = array<i32: 2, 1>} : memref<64x128xf32, #tpu.memory_space<vmem>>, vector<4x128xf32>
    %409 = arith.maximumf %407, %408 : vector<4x128xf32>
    %410 = arith.maximumf %406, %409 : vector<4x128xf32>
    %c0_330 = arith.constant 0 : index
    %c12 = arith.constant 12 : index
    %c0_331 = arith.constant 0 : index
    %411 = vector.load %arg8[%c0_330, %c12, %c0_331] : memref<1x16x128xf32, #tpu.memory_space<vmem>>, vector<1x4x128xf32>
    %412 = vector.shape_cast %411 : vector<1x4x128xf32> to vector<4x128xf32>
    %413 = vector.shape_cast %410 : vector<4x128xf32> to vector<1x4x128xf32>
    tpu.vector_store %arg8[%c0_330, %c12, %c0_331], %413 {strides = array<i32>} : memref<1x16x128xf32, #tpu.memory_space<vmem>>, vector<1x4x128xf32>,
    return
  }
  func.func @transform_0(%arg0: i32) -> (i32, i32, i32) {
    %c0_i32 = arith.constant 0 : i32
    %c0_i32_0 = arith.constant 0 : i32
    %c0_i32_1 = arith.constant 0 : i32
    return %arg0, %c0_i32, %c0_i32_0 : i32, i32, i32
  }
  func.func @transform_1(%arg0: i32) -> (i32, i32) {
    %c0_i32 = arith.constant 0 : i32
    %c0_i32_0 = arith.constant 0 : i32
    %c0_i32_1 = arith.constant 0 : i32
    return %c0_i32, %c0_i32_0 : i32, i32
  }
  func.func @transform_2(%arg0: i32) -> (i32, i32) {
    %c0_i32 = arith.constant 0 : i32
    %c0_i32_0 = arith.constant 0 : i32
    %c0_i32_1 = arith.constant 0 : i32
    return %c0_i32, %c0_i32_0 : i32, i32
  }
  func.func @transform_3(%arg0: i32) -> (i32, i32, i32) {
    %c0_i32 = arith.constant 0 : i32
    %c0_i32_0 = arith.constant 0 : i32
    %c0_i32_1 = arith.constant 0 : i32
    %c0_i32_2 = arith.constant 0 : i32
    return %c0_i32, %c0_i32_0, %c0_i32_1 : i32, i32, i32
  }
  func.func @transform_4(%arg0: i32) -> (i32, i32) {
    %c0_i32 = arith.constant 0 : i32
    %c0_i32_0 = arith.constant 0 : i32
    %c0_i32_1 = arith.constant 0 : i32
    return %c0_i32, %c0_i32_0 : i32, i32
  }
  func.func @transform_5(%arg0: i32) -> (i32, i32, i32) {
    %c0_i32 = arith.constant 0 : i32
    %c0_i32_0 = arith.constant 0 : i32
    %c0_i32_1 = arith.constant 0 : i32
    %c0_i32_2 = arith.constant 0 : i32
    return %c0_i32, %c0_i32_0, %c0_i32_1 : i32, i32, i32
  }
  func.func @transform_6(%arg0: i32) -> (i32, i32) {
    %c0_i32 = arith.constant 0 : i32
    %c0_i32_0 = arith.constant 0 : i32
    %c0_i32_1 = arith.constant 0 : i32
    return %c0_i32, %c0_i32_0 : i32, i32
  }
  func.func @transform_7(%arg0: i32) -> (i32, i32, i32) {
    %c0_i32 = arith.constant 0 : i32
    %c0_i32_0 = arith.constant 0 : i32
    %c0_i32_1 = arith.constant 0 : i32
    return %arg0, %c0_i32, %c0_i32_0 : i32, i32, i32
  }
}

</mosaic_0001>

<bundles_post_ra>
// kernel: model_forward.1
= control target key start
LH: loop header
LB: loop body
LE: loop exit
PB: predicated region body
PF: predicated region fallthrough
CT: control target
= control target key end

     0   :  { %s9021_s24 = smov 0   ;;  %s10683_s0 = inlined_call_operand.vmem [shape: f32[2,784,9], index: 0, kind: input, shape index: {}]   ;;  %s10684_s1 = inlined_call_operand.vmem [shape: f32[9,32], index: 1, kind: input, shape index: {}]   ;;  %s10685_s2 = inlined_call_operand.vmem [shape: f32[1,32], index: 2, kind: input, shape index: {}]   ;;  %s10686_s3 = inlined_call_operand.vmem [shape: f32[9,32,64], index: 3, kind: input, shape index: {}]   ;;  %s10687_s4 = inlined_call_operand.vmem [shape: f32[1,64], index: 4, kind: input, shape index: {}]   ;;  %s10688_s5 = inlined_call_operand.vmem [shape: f32[9,64,128], index: 5, kind: input, shape index: {}]   ;;  %s10689_s6 = inlined_call_operand.vmem [shape: f32[1,128], index: 6, kind: input, shape index: {}]   ;;  %s10690_s7 = inlined_call_operand.vmem [shape: f32[2,16,128], index: 7, kind: output, shape index: {}]  }
   0x1 LB: > { %s6526_s25 = sadd.s32 4294967295, %s8977_s24   ;;  %p6530_p0 = scmp.ge.s32.totalorder %s8977_s24, 1  ;;  %s8977_s24 = sphi %s9021_s24, %s17_s24  }
   0x2   : > { %p237_p1 = scmp.lt.s32.totalorder %s8977_s24, 3 }
   0x4   : > { %p238_p2 = pnand %p6530_p0, %p237_p1 }
   0x6   : > { %241 = sbr.rel (%p238_p2) target bundleno = 1431 (0x597), region = 48 }
   0xd   : > { %v431_v0 = vld [vmem:[%s10684_s1] sm:$0xff]  ;;  %v432_v1 = vld [vmem:[%s10684_s1 + $0x8] sm:$0x1]  ;;  %vm728_vm0 = vcmask 1040384   ;;  %p269_p3 = scmp.lt.s32.totalorder %s6526_s25, 1  ;;  %vm8979_vm1 = vmmov 1  }
   0xe   : > { %v8444_v2 = vpack.c.bf16 %v432_v1, %v431_v0  ;;  %vm8445_vm2 = vmpackc.low %vm728_vm0, %vm8979_vm1  ;;  %vm433_vm3 = vcmask 72704   ;;  %v6634_v60 = vld [vmem:[%s10686_s3 + $0x20] sm:$0xff]  ;;  %v6635_v61 = vld [vmem:[%s10686_s3 + $0x28] sm:$0xff]  ;;  %vm279_vm4 = vcmask 261120   ;;  %v8980_v63 = vmov 0.0  }
   0xf   : > { %s10784_s25 = smov (!%p269_p3, %s6526_s25), 1  ;;  %v8450_v62 = vpack.c.bf16 %v6635_v61, %v6634_v60  ;;  %280 = vst.msk [vmem:[#allocation3] sm:$0xff] %vm279_vm4, %v8980_v63  ;;  %281 = vst.msk [vmem:[#allocation3 + $0x8] sm:$0xff] %vm279_vm4, %v8980_v63  ;;  %vm1418_vm5 = vcmask 259072   ;;  %vm313_vm6 = vcmask 523264   ;;  %vm4924_vm7 = vcmask 522240  }
  0x10   : > { %8446 = vmatprep.subr.msk.bf16.mxu0 %vm8445_vm2, %v8444_v2  ;;  %s8958_s30 = smul.u32 784, %s10784_s25  ;;  %282 = vst.msk [vmem:[#allocation3 + $0x10] sm:$0xff] %vm279_vm4, %v8980_v63  ;;  %283 = vst.msk [vmem:[#allocation3 + $0x18] sm:$0xff] %vm279_vm4, %v8980_v63  ;;  %s7058_s27 = sshll.u32 %s10784_s25, 4 }
  0x11   : > { %8449 = vmatpush3.bf16.msk.msra.mxu0 %vm8445_vm2, %v8444_v2  ;;  %284 = vst.msk [vmem:[#allocation3 + $0x20] sm:$0xff] %vm279_vm4, %v8980_v63  ;;  %285 = vst.msk [vmem:[#allocation3 + $0x28] sm:$0xff] %vm279_vm4, %v8980_v63  ;;  %v6636_v2 = vld [vmem:[%s10686_s3 + $0x30] sm:$0xff] }
  0x12   : > { %s9041_s10 = scalar_lea.vmem %s10683_s0, %s8958_s30  ;;  %286 = vst.msk [vmem:[#allocation3 + $0x30] sm:$0xff] %vm279_vm4, %v8980_v63  ;;  %287 = vst.msk [vmem:[#allocation3 + $0x38] sm:$0xff] %vm279_vm4, %v8980_v63  ;;  %8451 = vmatprep.subr.bf16.mxu0 %v8450_v62  ;;  %s278_s30 = scalar_lea.vmem %s10690_s7, %s7058_s27 }
  0x13   : > { %v333_v3 = vld [vmem:[%s9041_s10] sm:$0xff]  ;;  %v334_v4 = vld [vmem:[%s9041_s10 + $0x8] sm:$0xff]  ;;  %v335_v5 = vld [vmem:[%s9041_s10 + $0x10] sm:$0xff]  ;;  %288 = vst.msk [vmem:[#allocation3 + $0x40] sm:$0xff] %vm279_vm4, %v8980_v63 }
  0x14   : > { %7595 = vmatprep.mubr.msk.f32.mxu0 %vm433_vm3, %v333_v3  ;;  %v336_v6 = vld [vmem:[%s9041_s10 + $0x18] sm:$0xff]  ;;  %v337_v7 = vld [vmem:[%s9041_s10 + $0x20] sm:$0xff]  ;;  %v338_v8 = vld [vmem:[%s9041_s10 + $0x28] sm:$0xff]  ;;  %289 = vst.msk [vmem:[#allocation3 + $0x48] sm:$0xff] %vm279_vm4, %v8980_v63 }
  0x15   : > { %7596 = vmatmul.mubr.msk.f32.vlgmr.msra.gmra.mrb[0].mxu0 %vm433_vm3, %v334_v4  ;;  %v339_v9 = vld [vmem:[%s9041_s10 + $0x30] sm:$0xff]  ;;  %v340_v10 = vld [vmem:[%s9041_s10 + $0x38] sm:$0xff]  ;;  %v341_v11 = vld [vmem:[%s9041_s10 + $0x40] sm:$0xff]  ;;  %290 = vst.msk [vmem:[#allocation3 + $0x50] sm:$0xff] %vm279_vm4, %v8980_v63 }
  0x16   : > { %7598 = vmatprep.mubr.msk.f32.mxu0 %vm433_vm3, %v335_v5  ;;  %v342_v12 = vld [vmem:[%s9041_s10 + $0x48] sm:$0xff]  ;;  %v343_v13 = vld [vmem:[%s9041_s10 + $0x50] sm:$0xff]  ;;  %v344_v14 = vld [vmem:[%s9041_s10 + $0x58] sm:$0xff]  ;;  %291 = vst.msk [vmem:[#allocation3 + $0x58] sm:$0xff] %vm279_vm4, %v8980_v63  ;;  %8453 = vmatpush3.bf16.msra.mxu0 %v8450_v62 }
  0x17   : > { %v345_v15 = vld [vmem:[%s9041_s10 + $0x60] sm:$0xff]  ;;  %v346_v16 = vld [vmem:[%s9041_s10 + $0x68] sm:$0xff]  ;;  %v347_v17 = vld [vmem:[%s9041_s10 + $0x70] sm:$0xff]  ;;  %292 = vst.msk [vmem:[#allocation3 + $0x60] sm:$0xff] %vm279_vm4, %v8980_v63 }
  0x18   : > { %v348_v18 = vld [vmem:[%s9041_s10 + $0x78] sm:$0xff]  ;;  %v349_v19 = vld [vmem:[%s9041_s10 + $0x80] sm:$0xff]  ;;  %v350_v20 = vld [vmem:[%s9041_s10 + $0x88] sm:$0xff]  ;;  %293 = vst.msk [vmem:[#allocation3 + $0x68] sm:$0xff] %vm279_vm4, %v8980_v63 }
  0x19   : > { %7599 = vmatmul.mubr.msk.f32.gmra.mrb[2].mxu0 %vm433_vm3, %v336_v6  ;;  %v351_v21 = vld [vmem:[%s9041_s10 + $0x90] sm:$0xff]  ;;  %v352_v22 = vld [vmem:[%s9041_s10 + $0x98] sm:$0xff]  ;;  %v353_v23 = vld [vmem:[%s9041_s10 + $0xa0] sm:$0xff]  ;;  %294 = vst.msk [vmem:[#allocation3 + $0x70] sm:$0xff] %vm279_vm4, %v8980_v63 }
  0x1a   : > { %7601 = vmatprep.mubr.msk.f32.mxu0 %vm433_vm3, %v337_v7  ;;  %v354_v24 = vld [vmem:[%s9041_s10 + $0xa8] sm:$0xff]  ;;  %v355_v25 = vld [vmem:[%s9041_s10 + $0xb0] sm:$0xff]  ;;  %v356_v26 = vld [vmem:[%s9041_s10 + $0xb8] sm:$0xff]  ;;  %295 = vst.msk [vmem:[#allocation3 + $0x78] sm:$0xff] %vm279_vm4, %v8980_v63 }
  0x1b   : > { %v357_v27 = vld [vmem:[%s9041_s10 + $0xc0] sm:$0xff]  ;;  %v358_v28 = vld [vmem:[%s9041_s10 + $0xc8] sm:$0xff]  ;;  %v359_v29 = vld [vmem:[%s9041_s10 + $0xd0] sm:$0xff]  ;;  %296 = vst.msk [vmem:[#allocation3 + $0x80] sm:$0xff] %vm279_vm4, %v8980_v63 }
  0x1c   : > { %v360_v30 = vld [vmem:[%s9041_s10 + $0xd8] sm:$0xff]  ;;  %v361_v31 = vld [vmem:[%s9041_s10 + $0xe0] sm:$0xff]  ;;  %v362_v32 = vld [vmem:[%s9041_s10 + $0xe8] sm:$0xff]  ;;  %297 = vst.msk [vmem:[#allocation3 + $0x88] sm:$0xff] %vm279_vm4, %v8980_v63 }
  0x1d   : > { %7602 = vmatmul.mubr.msk.f32.gmra.mrb[4].mxu0 %vm433_vm3, %v338_v8  ;;  %v363_v33 = vld [vmem:[%s9041_s10 + $0xf0] sm:$0xff]  ;;  %v364_v34 = vld [vmem:[%s9041_s10 + $0xf8] sm:$0xff]  ;;  %v365_v35 = vld [vmem:[%s9041_s10 + $0x100] sm:$0xff]  ;;  %298 = vst.msk [vmem:[#allocation3 + $0x90] sm:$0xff] %vm279_vm4, %v8980_v63 }
  0x1e   : > { %7604 = vmatprep.mubr.msk.f32.mxu0 %vm433_vm3, %v339_v9  ;;  %v366_v36 = vld [vmem:[%s9041_s10 + $0x108] sm:$0xff]  ;;  %v367_v37 = vld [vmem:[%s9041_s10 + $0x110] sm:$0xff]  ;;  %v368_v38 = vld [vmem:[%s9041_s10 + $0x118] sm:$0xff]  ;;  %299 = vst.msk [vmem:[#allocation3 + $0x98] sm:$0xff] %vm279_vm4, %v8980_v63 }
  0x1f   : > { %v369_v39 = vld [vmem:[%s9041_s10 + $0x120] sm:$0xff]  ;;  %v370_v40 = vld [vmem:[%s9041_s10 + $0x128] sm:$0xff]  ;;  %v371_v41 = vld [vmem:[%s9041_s10 + $0x130] sm:$0xff]  ;;  %300 = vst.msk [vmem:[#allocation3 + $0xa0] sm:$0xff] %vm279_vm4, %v8980_v63 }
  0x20   : > { %v372_v42 = vld [vmem:[%s9041_s10 + $0x138] sm:$0xff]  ;;  %v373_v43 = vld [vmem:[%s9041_s10 + $0x140] sm:$0xff]  ;;  %v374_v44 = vld [vmem:[%s9041_s10 + $0x148] sm:$0xff]  ;;  %301 = vst.msk [vmem:[#allocation3 + $0xa8] sm:$0xff] %vm279_vm4, %v8980_v63 }
  0x21   : > { %7605 = vmatmul.mubr.msk.f32.gmra.mrb[6].mxu0 %vm433_vm3, %v340_v10  ;;  %v375_v45 = vld [vmem:[%s9041_s10 + $0x150] sm:$0xff]  ;;  %v376_v46 = vld [vmem:[%s9041_s10 + $0x158] sm:$0xff]  ;;  %v377_v47 = vld [vmem:[%s9041_s10 + $0x160] sm:$0xff]  ;;  %302 = vst.msk [vmem:[#allocation3 + $0xb0] sm:$0xff] %vm279_vm4, %v8980_v63 }
  0x22   : > { %7607 = vmatprep.mubr.msk.f32.mxu0 %vm433_vm3, %v341_v11  ;;  %v378_v48 = vld [vmem:[%s9041_s10 + $0x168] sm:$0xff]  ;;  %v379_v49 = vld [vmem:[%s9041_s10 + $0x170] sm:$0xff]  ;;  %v380_v50 = vld [vmem:[%s9041_s10 + $0x178] sm:$0xff]  ;;  %303 = vst.msk [vmem:[#allocation3 + $0xb8] sm:$0xff] %vm279_vm4, %v8980_v63 }
  0x23   : > { %v381_v51 = vld [vmem:[%s9041_s10 + $0x180] sm:$0xff]  ;;  %v382_v52 = vld [vmem:[%s9041_s10 + $0x188] sm:$0xff]  ;;  %v383_v53 = vld [vmem:[%s9041_s10 + $0x190] sm:$0xff]  ;;  %304 = vst.msk [vmem:[#allocation3 + $0xc0] sm:$0xff] %vm279_vm4, %v8980_v63 }
  0x24   : > { %v384_v54 = vld [vmem:[%s9041_s10 + $0x198] sm:$0xff]  ;;  %v385_v55 = vld [vmem:[%s9041_s10 + $0x1a0] sm:$0xff]  ;;  %v386_v56 = vld [vmem:[%s9041_s10 + $0x1a8] sm:$0xff]  ;;  %305 = vst.msk [vmem:[#allocation3 + $0xc8] sm:$0xff] %vm279_vm4, %v8980_v63 }
  0x25   : > { %7608 = vmatmul.mubr.msk.f32.gmra.mrb[8].mxu0 %vm433_vm3, %v342_v12  ;;  %v387_v57 = vld [vmem:[%s9041_s10 + $0x1b0] sm:$0xff]  ;;  %v388_v58 = vld [vmem:[%s9041_s10 + $0x1b8] sm:$0xff]  ;;  %v389_v59 = vld [vmem:[%s9041_s10 + $0x1c0] sm:$0xff]  ;;  %306 = vst.msk [vmem:[#allocation3 + $0xd0] sm:$0xff] %vm279_vm4, %v8980_v63 }
  0x26   : > { %7610 = vmatprep.mubr.msk.f32.mxu0 %vm433_vm3, %v343_v13  ;;  %307 = vst.msk [vmem:[#allocation3 + $0xd8] sm:$0xff] %vm279_vm4, %v8980_v63  ;;  %308 = vst.msk [vmem:[#allocation3 + $0xe0] sm:$0xff] %vm279_vm4, %v8980_v63  ;;  %v390_v0 = vld [vmem:[%s9041_s10 + $0x1c8] sm:$0xff]  ;;  %v391_v1 = vld [vmem:[%s9041_s10 + $0x1d0] sm:$0xff] }
  0x27   : > { %309 = vst.msk [vmem:[#allocation3 + $0xe8] sm:$0xff] %vm279_vm4, %v8980_v63  ;;  %310 = vst.msk [vmem:[#allocation3 + $0xf0] sm:$0xff] %vm279_vm4, %v8980_v63  ;;  %v6637_v3 = vld [vmem:[%s10686_s3 + $0x38] sm:$0xff]  ;;  %v393_v6 = vld [vmem:[%s9041_s10 + $0x1e0] sm:$0xff] }
  0x28   : > { %311 = vst.msk [vmem:[#allocation3 + $0xf8] sm:$0xff] %vm279_vm4, %v8980_v63  ;;  %312 = vst.msk [vmem:[#allocation3 + $0x100] sm:$0xff] %vm279_vm4, %v8980_v63  ;;  %v8454_v4 = vpack.c.bf16 %v6637_v3, %v6636_v2  ;;  %v392_v5 = vld [vmem:[%s9041_s10 + $0x1d8] sm:$0xff]  ;;  %v394_v7 = vld [vmem:[%s9041_s10 + $0x1e8] sm:$0xff] }
  0x29   : > { %7611 = vmatmul.mubr.msk.f32.gmra.mrb[10].mxu0 %vm433_vm3, %v344_v14  ;;  %325 = vst [vmem:[#allocation7] sm:$0xff] %v8980_v63  ;;  %326 = vst [vmem:[#allocation7 + $0x8] sm:$0xff] %v8980_v63  ;;  %v395_v8 = vld [vmem:[%s9041_s10 + $0x1f0] sm:$0xff]  ;;  %v396_v9 = vld [vmem:[%s9041_s10 + $0x1f8] sm:$0xff] }
  0x2a   : > { %7613 = vmatprep.mubr.msk.f32.mxu0 %vm433_vm3, %v345_v15  ;;  %327 = vst [vmem:[#allocation7 + $0x10] sm:$0xff] %v8980_v63  ;;  %328 = vst [vmem:[#allocation7 + $0x18] sm:$0xff] %v8980_v63  ;;  %8455 = vmatprep.subr.bf16.mxu0 %v8454_v4  ;;  %v397_v10 = vld [vmem:[%s9041_s10 + $0x200] sm:$0xff]  ;;  %v398_v11 = vld [vmem:[%s9041_s10 + $0x208] sm:$0xff] }
  0x2b   : > { %329 = vst [vmem:[#allocation7 + $0x20] sm:$0xff] %v8980_v63  ;;  %330 = vst [vmem:[#allocation7 + $0x28] sm:$0xff] %v8980_v63  ;;  %8457 = vmatpush3.bf16.msra.mxu0 %v8454_v4  ;;  %v399_v12 = vld [vmem:[%s9041_s10 + $0x210] sm:$0xff]  ;;  %v400_v13 = vld [vmem:[%s9041_s10 + $0x218] sm:$0xff] }
  0x2c   : > { %331 = vst [vmem:[#allocation7 + $0x30] sm:$0xff] %v8980_v63  ;;  %332 = vst [vmem:[#allocation7 + $0x38] sm:$0xff] %v8980_v63  ;;  %v401_v14 = vld [vmem:[%s9041_s10 + $0x220] sm:$0xff]  ;;  %v402_v15 = vld [vmem:[%s9041_s10 + $0x228] sm:$0xff] }
  0x2d   : > { %7614 = vmatmul.mubr.msk.f32.gmra.mrb[12].mxu0 %vm433_vm3, %v346_v16  ;;  %v403_v16 = vld [vmem:[%s9041_s10 + $0x230] sm:$0xff] }
  0x2e   : > { %7616 = vmatprep.mubr.msk.f32.mxu0 %vm433_vm3, %v347_v17  ;;  %v404_v17 = vld [vmem:[%s9041_s10 + $0x238] sm:$0xff] }
  0x31   : > { %7617 = vmatmul.mubr.msk.f32.gmra.mrb[14].mxu0 %vm433_vm3, %v348_v18  ;;  %v405_v18 = vld [vmem:[%s9041_s10 + $0x240] sm:$0xff] }
  0x32   : > { %7619 = vmatprep.mubr.msk.f32.mxu0 %vm433_vm3, %v349_v19  ;;  %v406_v19 = vld [vmem:[%s9041_s10 + $0x248] sm:$0xff] }
  0x35   : > { %7620 = vmatmul.mubr.msk.f32.gmra.mrb[16].mxu0 %vm433_vm3, %v350_v20  ;;  %v407_v20 = vld [vmem:[%s9041_s10 + $0x250] sm:$0xff] }
  0x36   : > { %7622 = vmatprep.mubr.msk.f32.mxu0 %vm433_vm3, %v351_v21  ;;  %v408_v21 = vld [vmem:[%s9041_s10 + $0x258] sm:$0xff] }
  0x39   : > { %7623 = vmatmul.mubr.msk.f32.gmra.mrb[18].mxu0 %vm433_vm3, %v352_v22  ;;  %v409_v22 = vld [vmem:[%s9041_s10 + $0x260] sm:$0xff] }
  0x3a   : > { %7625 = vmatprep.mubr.msk.f32.mxu0 %vm433_vm3, %v353_v23  ;;  %v410_v23 = vld [vmem:[%s9041_s10 + $0x268] sm:$0xff] }
  0x3d   : > { %7626 = vmatmul.mubr.msk.f32.gmra.mrb[20].mxu0 %vm433_vm3, %v354_v24  ;;  %v411_v24 = vld [vmem:[%s9041_s10 + $0x270] sm:$0xff] }
  0x3e   : > { %7628 = vmatprep.mubr.msk.f32.mxu0 %vm433_vm3, %v355_v25  ;;  %v412_v25 = vld [vmem:[%s9041_s10 + $0x278] sm:$0xff] }
  0x41   : > { %7629 = vmatmul.mubr.msk.f32.gmra.mrb[22].mxu0 %vm433_vm3, %v356_v26  ;;  %v413_v26 = vld [vmem:[%s9041_s10 + $0x280] sm:$0xff] }
  0x42   : > { %7631 = vmatprep.mubr.msk.f32.mxu0 %vm433_vm3, %v357_v27  ;;  %v414_v27 = vld [vmem:[%s9041_s10 + $0x288] sm:$0xff] }
  0x45   : > { %7632 = vmatmul.mubr.msk.f32.gmra.mrb[24].mxu0 %vm433_vm3, %v358_v28  ;;  %v415_v28 = vld [vmem:[%s9041_s10 + $0x290] sm:$0xff] }
  0x46   : > { %7634 = vmatprep.mubr.msk.f32.mxu0 %vm433_vm3, %v359_v29  ;;  %v416_v29 = vld [vmem:[%s9041_s10 + $0x298] sm:$0xff] }
  0x49   : > { %7635 = vmatmul.mubr.msk.f32.gmra.mrb[26].mxu0 %vm433_vm3, %v360_v30  ;;  %v417_v30 = vld [vmem:[%s9041_s10 + $0x2a0] sm:$0xff] }
  0x4a   : > { %7637 = vmatprep.mubr.msk.f32.mxu0 %vm433_vm3, %v361_v31  ;;  %v418_v31 = vld [vmem:[%s9041_s10 + $0x2a8] sm:$0xff] }
  0x4d   : > { %7638 = vmatmul.mubr.msk.f32.gmra.mrb[28].mxu0 %vm433_vm3, %v362_v32  ;;  %v419_v32 = vld [vmem:[%s9041_s10 + $0x2b0] sm:$0xff] }
  0x4e   : > { %7640 = vmatprep.mubr.msk.f32.mxu0 %vm433_vm3, %v363_v33  ;;  %v420_v33 = vld [vmem:[%s9041_s10 + $0x2b8] sm:$0xff] }
  0x51   : > { %7641 = vmatmul.mubr.msk.f32.gmra.mrb[30].mxu0 %vm433_vm3, %v364_v34  ;;  %v421_v34 = vld [vmem:[%s9041_s10 + $0x2c0] sm:$0xff] }
  0x52   : > { %7643 = vmatprep.mubr.msk.f32.mxu0 %vm433_vm3, %v365_v35  ;;  %v422_v35 = vld [vmem:[%s9041_s10 + $0x2c8] sm:$0xff] }
  0x55   : > { %7644 = vmatmul.mubr.msk.f32.gmra.mrb[32].mxu0 %vm433_vm3, %v366_v36  ;;  %v423_v36 = vld [vmem:[%s9041_s10 + $0x2d0] sm:$0xff] }
  0x56   : > { %7646 = vmatprep.mubr.msk.f32.mxu0 %vm433_vm3, %v367_v37  ;;  %v424_v37 = vld [vmem:[%s9041_s10 + $0x2d8] sm:$0xff] }
  0x59   : > { %7647 = vmatmul.mubr.msk.f32.gmra.mrb[34].mxu0 %vm433_vm3, %v368_v38  ;;  %v425_v38 = vld [vmem:[%s9041_s10 + $0x2e0] sm:$0xff] }
  0x5a   : > { %7649 = vmatprep.mubr.msk.f32.mxu0 %vm433_vm3, %v369_v39  ;;  %v426_v39 = vld [vmem:[%s9041_s10 + $0x2e8] sm:$0xff] }
  0x5d   : > { %7650 = vmatmul.mubr.msk.f32.gmra.mrb[36].mxu0 %vm433_vm3, %v370_v40  ;;  %v427_v40 = vld [vmem:[%s9041_s10 + $0x2f0] sm:$0xff] }
  0x5e   : > { %7652 = vmatprep.mubr.msk.f32.mxu0 %vm433_vm3, %v371_v41  ;;  %v428_v41 = vld [vmem:[%s9041_s10 + $0x2f8] sm:$0xff] }
  0x61   : > { %7653 = vmatmul.mubr.msk.f32.gmra.mrb[38].mxu0 %vm433_vm3, %v372_v42  ;;  %v429_v42 = vld [vmem:[%s9041_s10 + $0x300] sm:$0xff] }
  0x62   : > { %7655 = vmatprep.mubr.msk.f32.mxu0 %vm433_vm3, %v373_v43  ;;  %v430_v43 = vld [vmem:[%s9041_s10 + $0x308] sm:$0xff] }
  0x65   : > { %7656 = vmatmul.mubr.msk.f32.gmra.mrb[40].mxu0 %vm433_vm3, %v374_v44  ;;  %v1816_v44 = vld [vmem:[#allocation3 + $0x1] sm:$0xff] }
  0x66   : > { %7658 = vmatprep.mubr.msk.f32.mxu0 %vm433_vm3, %v375_v45  ;;  %v1817_v45 = vld [vmem:[#allocation3 + $0x9] sm:$0xff] }
  0x69   : > { %7659 = vmatmul.mubr.msk.f32.gmra.mrb[42].mxu0 %vm433_vm3, %v376_v46  ;;  %v1812_v46 = vld [vmem:[%s10686_s3] sm:$0xff] }
  0x6a   : > { %7661 = vmatprep.mubr.msk.f32.mxu0 %vm433_vm3, %v377_v47  ;;  %v1813_v47 = vld [vmem:[%s10686_s3 + $0x8] sm:$0xff] }
  0x6d   : > { %7662 = vmatmul.mubr.msk.f32.gmra.mrb[44].mxu0 %vm433_vm3, %v378_v48  ;;  %v8458_v48 = vpack.c.bf16 %v1813_v47, %v1812_v46 }
  0x6e   : > { %7664 = vmatprep.mubr.msk.f32.mxu0 %vm433_vm3, %v379_v49  ;;  %v1814_v49 = vld [vmem:[%s10686_s3 + $0x10] sm:$0xff] }
  0x6f   : > { %8666 = vmatprep.subr.bf16.mxu1 %v8458_v48  ;;  %8459 = vmatprep.subr.bf16.mxu0 %v8458_v48 }
  0x70   : > { %8668 = vmatpush3.bf16.msra.mxu1 %v8458_v48 }
  0x71   : > { %7665 = vmatmul.mubr.msk.f32.gmra.mrb[46].mxu0 %vm433_vm3, %v380_v50  ;;  %v1815_v50 = vld [vmem:[%s10686_s3 + $0x18] sm:$0xff] }
  0x72   : > { %7667 = vmatprep.mubr.msk.f32.mxu0 %vm433_vm3, %v381_v51  ;;  %v8462_v51 = vpack.c.bf16 %v1815_v50, %v1814_v49 }
  0x74   : > { %8667 = vmatprep.subr.bf16.mxu1 %v8462_v51 }
  0x75   : > { %7668 = vmatmul.mubr.msk.f32.gmra.mrb[48].mxu0 %vm433_vm3, %v382_v52  ;;  %8669 = vmatpush3.bf16.msra.mxu1 %v8462_v51 }
  0x76   : > { %7670 = vmatprep.mubr.msk.f32.mxu0 %vm433_vm3, %v383_v53 }
  0x79   : > { %7671 = vmatmul.mubr.msk.f32.gmra.mrb[50].mxu0 %vm433_vm3, %v384_v54 }
  0x7a   : > { %7673 = vmatprep.mubr.msk.f32.mxu0 %vm433_vm3, %v385_v55 }
  0x7d   : > { %7674 = vmatmul.mubr.msk.f32.gmra.mrb[52].mxu0 %vm433_vm3, %v386_v56 }
  0x7e   : > { %7676 = vmatprep.mubr.msk.f32.mxu0 %vm433_vm3, %v387_v57 }
  0x81   : > { %7677 = vmatmul.mubr.msk.f32.gmra.mrb[54].mxu0 %vm433_vm3, %v388_v58 }
  0x82   : > { %7679 = vmatprep.mubr.msk.f32.mxu0 %vm433_vm3, %v389_v59 }
  0x85   : > { %7680 = vmatmul.mubr.msk.f32.gmra.mrb[56].mxu0 %vm433_vm3, %v390_v0 }
  0x86   : > { %7682 = vmatprep.mubr.msk.f32.mxu0 %vm433_vm3, %v391_v1 }
  0x89   : > { %7683 = vmatmul.mubr.msk.f32.gmra.mrb[58].mxu0 %vm433_vm3, %v392_v5  ;;  %v9311_v5 = vld [vmem:[%s10685_s2] ss:$0 sm:$0xff] }
  0x8a   : > { %7685 = vmatprep.mubr.msk.f32.mxu0 %vm433_vm3, %v393_v6 }
  0x8d   : > { %7686 = vmatmul.mubr.msk.f32.gmra.mrb[60].mxu0 %vm433_vm3, %v394_v7 }
  0x8e   : > { %7688 = vmatprep.mubr.msk.f32.mxu0 %vm433_vm3, %v395_v8 }
  0x91   : > { %7689 = vmatmul.mubr.msk.f32.gmra.mrb[62].mxu0 %vm433_vm3, %v396_v9 }
  0x92   : > { %7691 = vmatprep.mubr.msk.f32.mxu0 %vm433_vm3, %v397_v10 }
  0x95   : > { %7692 = vmatmul.mubr.msk.f32.gmra.mrb[64].mxu0 %vm433_vm3, %v398_v11 }
  0x96   : > { %7694 = vmatprep.mubr.msk.f32.mxu0 %vm433_vm3, %v399_v12 }
  0x99   : > { %7695 = vmatmul.mubr.msk.f32.gmra.mrb[66].mxu0 %vm433_vm3, %v400_v13 }
  0x9a   : > { %7697 = vmatprep.mubr.msk.f32.mxu0 %vm433_vm3, %v401_v14 }
  0x9d   : > { %7698 = vmatmul.mubr.msk.f32.gmra.mrb[68].mxu0 %vm433_vm3, %v402_v15 }
  0x9e   : > { %7700 = vmatprep.mubr.msk.f32.mxu0 %vm433_vm3, %v403_v16 }
  0xa1   : > { %7701 = vmatmul.mubr.msk.f32.gmra.mrb[70].mxu0 %vm433_vm3, %v404_v17 }
  0xa2   : > { %7703 = vmatprep.mubr.msk.f32.mxu0 %vm433_vm3, %v405_v18 }
  0xa5   : > { %7704 = vmatmul.mubr.msk.f32.gmra.mrb[72].mxu0 %vm433_vm3, %v406_v19 }
  0xa6   : > { %7706 = vmatprep.mubr.msk.f32.mxu0 %vm433_vm3, %v407_v20 }
  0xa9   : > { %7707 = vmatmul.mubr.msk.f32.gmra.mrb[74].mxu0 %vm433_vm3, %v408_v21 }
  0xaa   : > { %7709 = vmatprep.mubr.msk.f32.mxu0 %vm433_vm3, %v409_v22 }
  0xad   : > { %7710 = vmatmul.mubr.msk.f32.gmra.mrb[76].mxu0 %vm433_vm3, %v410_v23 }
  0xae   : > { %7712 = vmatprep.mubr.msk.f32.mxu0 %vm433_vm3, %v411_v24 }
  0xb1   : > { %7713 = vmatmul.mubr.msk.f32.gmra.mrb[78].mxu0 %vm433_vm3, %v412_v25 }
  0xb2   : > { %7715 = vmatprep.mubr.msk.f32.mxu0 %vm433_vm3, %v413_v26 }
  0xb5   : > { %7716 = vmatmul.mubr.msk.f32.gmra.mrb[80].mxu0 %vm433_vm3, %v414_v27 }
  0xb6   : > { %7718 = vmatprep.mubr.msk.f32.mxu0 %vm433_vm3, %v415_v28 }
  0xb9   : > { %7719 = vmatmul.mubr.msk.f32.gmra.mrb[82].mxu0 %vm433_vm3, %v416_v29 }
  0xba   : > { %7721 = vmatprep.mubr.msk.f32.mxu0 %vm433_vm3, %v417_v30 }
  0xbd   : > { %7722 = vmatmul.mubr.msk.f32.gmra.mrb[84].mxu0 %vm433_vm3, %v418_v31 }
  0xbe   : > { %7724 = vmatprep.mubr.msk.f32.mxu0 %vm433_vm3, %v419_v32 }
  0xc1   : > { %7725 = vmatmul.mubr.msk.f32.gmra.mrb[86].mxu0 %vm433_vm3, %v420_v33 }
  0xc2   : > { %7727 = vmatprep.mubr.msk.f32.mxu0 %vm433_vm3, %v421_v34 }
  0xc5   : > { %7728 = vmatmul.mubr.msk.f32.gmra.mrb[88].mxu0 %vm433_vm3, %v422_v35 }
  0xc6   : > { %7730 = vmatprep.mubr.msk.f32.mxu0 %vm433_vm3, %v423_v36 }
  0xc9   : > { %7731 = vmatmul.mubr.msk.f32.gmra.mrb[90].mxu0 %vm433_vm3, %v424_v37 }
  0xca   : > { %7733 = vmatprep.mubr.msk.f32.mxu0 %vm433_vm3, %v425_v38 }
  0xcd   : > { %7734 = vmatmul.mubr.msk.f32.gmra.mrb[92].mxu0 %vm433_vm3, %v426_v39 }
  0xce   : > { %7736 = vmatprep.mubr.msk.f32.mxu0 %vm433_vm3, %v427_v40 }
  0xd1   : > { %7737 = vmatmul.mubr.msk.f32.gmra.mrb[94].mxu0 %vm433_vm3, %v428_v41 }
  0xd2   : > { %7739 = vmatprep.mubr.msk.f32.mxu0 %vm433_vm3, %v429_v42 }
  0xd5   : > { %7740 = vmatmul.mubr.msk.f32.gmra.mrb[96].mxu0 %vm433_vm3, %v430_v43 }
  0xd6   : > { %7750 = vmatprep.mubr.msk.f32.mxu0 %vm279_vm4, %v1816_v44 }
  0xd9   : > { %7751 = vmatmul.mubr.msk.f32.vlgmr.msra.gmra.mrb[98].mxu0 %vm279_vm4, %v1817_v45 }
  0xda   : > { %8461 = vmatpush3.bf16.msra.mxu0 %v8458_v48 }
  0xdb   : > { %8463 = vmatprep.subr.bf16.mxu0 %v8462_v51 }
  0xde   : > { %8465 = vmatpush3.bf16.msra.mxu0 %v8462_v51 }
  0xe8   : > { %v7597_v52 = vpop.f32.mrb[0].mxu0 }
  0xe9   : > { %1288 = vst.msk [vmem:[#allocation2 + $0x8] sm:$0xff] %vm279_vm4, %v7597_v52  ;;  %v798_v53 = vpop.f32.mrb[1].mxu0 }
  0xea   : > { %1287 = vst.msk [vmem:[#allocation2] sm:$0xff] %vm279_vm4, %v798_v53 }
  0xec   : > { %v7600_v54 = vpop.f32.mrb[2].mxu0 }
  0xed   : > { %1290 = vst.msk [vmem:[#allocation2 + $0x18] sm:$0xff] %vm279_vm4, %v7600_v54  ;;  %v808_v55 = vpop.f32.mrb[3].mxu0 }
  0xee   : > { %1289 = vst.msk [vmem:[#allocation2 + $0x10] sm:$0xff] %vm279_vm4, %v808_v55 }
  0xf0   : > { %v7603_v56 = vpop.f32.mrb[4].mxu0 }
  0xf1   : > { %1292 = vst.msk [vmem:[#allocation2 + $0x28] sm:$0xff] %vm279_vm4, %v7603_v56  ;;  %v818_v57 = vpop.f32.mrb[5].mxu0  ;;  %v1386_v60 = vld [vmem:[#allocation2] ss:$2 sm:$0xff]  ;;  %v1390_v61 = vld [vmem:[#allocation2 + $0x1] ss:$2 sm:$0xff] }
  0xf2   : > { %1291 = vst.msk [vmem:[#allocation2 + $0x20] sm:$0xff] %vm279_vm4, %v818_v57  ;;  %v1393_v2 = vmax.f32 %v1386_v60, %v1390_v61 }
  0xf4   : > { %v7606_v58 = vpop.f32.mrb[6].mxu0 }
  0xf5   : > { %1294 = vst.msk [vmem:[#allocation2 + $0x38] sm:$0xff] %vm279_vm4, %v7606_v58  ;;  %v828_v59 = vpop.f32.mrb[7].mxu0  ;;  %v1388_v4 = vld [vmem:[#allocation2 + $0x10] ss:$2 sm:$0x3f] }
  0xf6   : > { %1293 = vst.msk [vmem:[#allocation2 + $0x30] sm:$0xff] %vm279_vm4, %v828_v59  ;;  %v1392_v6 = vld [vmem:[#allocation2 + $0x11] ss:$2 sm:$0x3f] }
  0xf7   : > { %v1394_v13 = vmax.f32 %v1388_v4, %v1392_v6 }
  0xf8   : > { %v7609_v62 = vpop.f32.mrb[8].mxu0 }
  0xf9   : > { %v1396_v63 = vld [vmem:[#allocation2 + $0x1c] ss:$2 sm:$0xff]  ;;  %v1400_v0 = vld [vmem:[#allocation2 + $0x1d] ss:$2 sm:$0xff]  ;;  %1296 = vst.msk [vmem:[#allocation2 + $0x48] sm:$0xff] %vm279_vm4, %v7609_v62  ;;  %v838_v1 = vpop.f32.mrb[9].mxu0 }
  0xfa   : > { %v1403_v3 = vmax.f32 %v1396_v63, %v1400_v0  ;;  %1295 = vst.msk [vmem:[#allocation2 + $0x40] sm:$0xff] %vm279_vm4, %v838_v1 }
  0xfc   : > { %v1405_v7 = vmax.f32 %v1393_v2, %v1403_v3  ;;  %v7612_v8 = vpop.f32.mrb[10].mxu0 }
  0xfd   : > { %1298 = vst.msk [vmem:[#allocation2 + $0x58] sm:$0xff] %vm279_vm4, %v7612_v8  ;;  %v848_v9 = vpop.f32.mrb[11].mxu0  ;;  %v1398_v11 = vld [vmem:[#allocation2 + $0x2c] ss:$2 sm:$0x3f] }
  0xfe   : > { %v1413_v10 = vadd.f32 %v9311_v5, %v1405_v7  ;;  %v1402_v12 = vld [vmem:[#allocation2 + $0x2d] ss:$2 sm:$0x3f]  ;;  %1297 = vst.msk [vmem:[#allocation2 + $0x50] sm:$0xff] %vm279_vm4, %v848_v9 }
  0xff   : > { %v1404_v14 = vmax.f32 %v1398_v11, %v1402_v12 }
 0x100   : > { %v1415_v15 = vmax.f32 %v1413_v10, 0.0  ;;  %v7615_v16 = vpop.f32.mrb[12].mxu0 }
 0x101   : > { %v1406_v17 = vmax.f32 %v1394_v13, %v1404_v14  ;;  %1300 = vst.msk [vmem:[#allocation2 + $0x68] sm:$0xff] %vm279_vm4, %v7615_v16  ;;  %v858_v18 = vpop.f32.mrb[13].mxu0  ;;  %v1421_v23 = vld [vmem:[#allocation2 + $0x38] ss:$2 sm:$0xff]  ;;  %v1425_v25 = vld [vmem:[#allocation2 + $0x39] ss:$2 sm:$0xff] }
 0x102   : > { %1299 = vst.msk [vmem:[#allocation2 + $0x60] sm:$0xff] %vm279_vm4, %v858_v18  ;;  %1417 = vst.msk [vmem:[#allocation3 + $0x11] sm:$0xff] %vm279_vm4, %v1415_v15  ;;  %v1428_v34 = vmax.f32 %v1421_v23, %v1425_v25 }
 0x103   : > { %v1414_v19 = vadd.f32 %v9311_v5, %v1406_v17 }
 0x104   : > { %v7618_v20 = vpop.f32.mrb[14].mxu0 }
 0x105   : > { %v1416_v21 = vmax.f32 %v1414_v19, 0.0  ;;  %1302 = vst.msk [vmem:[#allocation2 + $0x78] sm:$0xff] %vm279_vm4, %v7618_v20  ;;  %v868_v22 = vpop.f32.mrb[15].mxu0  ;;  %v1423_v24 = vld [vmem:[#allocation2 + $0x48] ss:$2 sm:$0x3f] }
 0x106   : > { %1301 = vst.msk [vmem:[#allocation2 + $0x70] sm:$0xff] %vm279_vm4, %v868_v22  ;;  %v1427_v26 = vld [vmem:[#allocation2 + $0x49] ss:$2 sm:$0x3f] }
 0x107   : > { %1419 = vst.msk [vmem:[#allocation3 + $0x19] sm:$0x3f] %vm1418_vm5, %v1416_v21  ;;  %v1429_v35 = vmax.f32 %v1423_v24, %v1427_v26 }
 0x108   : > { %v7621_v27 = vpop.f32.mrb[16].mxu0 }
 0x109   : > { %v1431_v28 = vld [vmem:[#allocation2 + $0x54] ss:$2 sm:$0xff]  ;;  %v1433_v29 = vld [vmem:[#allocation2 + $0x64] ss:$2 sm:$0x3f]  ;;  %1304 = vst.msk [vmem:[#allocation2 + $0x88] sm:$0xff] %vm279_vm4, %v7621_v27 }
 0x10a   : > { %v878_v30 = vpop.f32.mrb[17].mxu0  ;;  %v1435_v31 = vld [vmem:[#allocation2 + $0x55] ss:$2 sm:$0xff]  ;;  %v1437_v32 = vld [vmem:[#allocation2 + $0x65] ss:$2 sm:$0x3f] }
 0x10b   : > { %1303 = vst.msk [vmem:[#allocation2 + $0x80] sm:$0xff] %vm279_vm4, %v878_v30  ;;  %v1818_v33 = vld [vmem:[#allocation3 + $0x11] sm:$0xff]  ;;  %v1438_v36 = vmax.f32 %v1431_v28, %v1435_v31  ;;  %v1439_v37 = vmax.f32 %v1433_v29, %v1437_v32 }
 0x10c   : > { %7753 = vmatprep.mubr.msk.f32.mxu0 %vm279_vm4, %v1818_v33  ;;  %v7624_v38 = vpop.f32.mrb[18].mxu0 }
 0x10d   : > { %v1440_v39 = vmax.f32 %v1428_v34, %v1438_v36  ;;  %v1441_v40 = vmax.f32 %v1429_v35, %v1439_v37  ;;  %1306 = vst.msk [vmem:[#allocation2 + $0x98] sm:$0xff] %vm279_vm4, %v7624_v38  ;;  %v888_v41 = vpop.f32.mrb[19].mxu0  ;;  %v1449_v49 = vld [vmem:[#allocation2 + $0x70] ss:$2 sm:$0xff]  ;;  %v1453_v50 = vld [vmem:[#allocation2 + $0x71] ss:$2 sm:$0xff] }
 0x10e   : > { %1305 = vst.msk [vmem:[#allocation2 + $0x90] sm:$0xff] %vm279_vm4, %v888_v41  ;;  %v1819_v42 = vld [vmem:[#allocation3 + $0x19] sm:$0xff]  ;;  %v1456_v55 = vmax.f32 %v1449_v49, %v1453_v50 }
 0x10f   : > { %v1442_v43 = vadd.f32 %v9311_v5, %v1440_v39  ;;  %v1443_v44 = vadd.f32 %v9311_v5, %v1441_v40  ;;  %7754 = vmatmul.mubr.msk.f32.gmra.mrb[100].mxu0 %vm279_vm4, %v1819_v42  ;;  %v6694_v40 = vld [vmem:[%s10686_s3 + $0x40] sm:$0xff]  ;;  %v6695_v41 = vld [vmem:[%s10686_s3 + $0x48] sm:$0xff] }
 0x110   : > { %v7627_v45 = vpop.f32.mrb[20].mxu0 }
 0x111   : > { %v1444_v46 = vmax.f32 %v1442_v43, 0.0  ;;  %v1445_v47 = vmax.f32 %v1443_v44, 0.0  ;;  %1308 = vst.msk [vmem:[#allocation2 + $0xa8] sm:$0xff] %vm279_vm4, %v7627_v45  ;;  %v898_v48 = vpop.f32.mrb[21].mxu0  ;;  %v9367_v44 = vpack.c.bf16 %v6695_v41, %v6694_v40 }
 0x112   : > { %1307 = vst.msk [vmem:[#allocation2 + $0xa0] sm:$0xff] %vm279_vm4, %v898_v48  ;;  %v1451_v57 = vld [vmem:[#allocation2 + $0x80] ss:$2 sm:$0x3f] }
 0x113   : > { %1446 = vst.msk [vmem:[#allocation3 + $0x21] sm:$0xff] %vm279_vm4, %v1444_v46  ;;  %v1455_v58 = vld [vmem:[#allocation2 + $0x81] ss:$2 sm:$0x3f]  ;;  %8467 = vmatprep.subr.bf16.mxu1 %v9367_v44 }
 0x114   : > { %1447 = vst.msk [vmem:[#allocation3 + $0x29] sm:$0x3f] %vm1418_vm5, %v1445_v47  ;;  %v7630_v51 = vpop.f32.mrb[22].mxu0  ;;  %v1457_v63 = vmax.f32 %v1451_v57, %v1455_v58 }
 0x115   : > { %v1459_v52 = vld [vmem:[#allocation2 + $0x8c] ss:$2 sm:$0xff]  ;;  %v1463_v53 = vld [vmem:[#allocation2 + $0x8d] ss:$2 sm:$0xff]  ;;  %1310 = vst.msk [vmem:[#allocation2 + $0xb8] sm:$0xff] %vm279_vm4, %v7630_v51  ;;  %v908_v54 = vpop.f32.mrb[23].mxu0 }
 0x116   : > { %v1466_v56 = vmax.f32 %v1459_v52, %v1463_v53  ;;  %1309 = vst.msk [vmem:[#allocation2 + $0xb0] sm:$0xff] %vm279_vm4, %v908_v54 }
 0x118   : > { %v1468_v59 = vmax.f32 %v1456_v55, %v1466_v56  ;;  %v7633_v60 = vpop.f32.mrb[24].mxu0 }
 0x119   : > { %v1461_v61 = vld [vmem:[#allocation2 + $0x9c] ss:$2 sm:$0x3f]  ;;  %v1465_v62 = vld [vmem:[#allocation2 + $0x9d] ss:$2 sm:$0x3f] }
 0x11a   : > { %1312 = vst.msk [vmem:[#allocation2 + $0xc8] sm:$0xff] %vm279_vm4, %v7633_v60  ;;  %v1470_v0 = vadd.f32 %v9311_v5, %v1468_v59  ;;  %v1467_v1 = vmax.f32 %v1461_v61, %v1465_v62  ;;  %v918_v2 = vpop.f32.mrb[25].mxu0  ;;  %v1820_v3 = vld [vmem:[#allocation3 + $0x21] sm:$0xff] }
 0x11b   : > { %v1821_v4 = vld [vmem:[#allocation3 + $0x29] sm:$0xff]  ;;  %1311 = vst.msk [vmem:[#allocation2 + $0xc0] sm:$0xff] %vm279_vm4, %v918_v2  ;;  %7756 = vmatprep.mubr.msk.f32.mxu0 %vm279_vm4, %v1820_v3 }
 0x11c   : > { %v1472_v6 = vmax.f32 %v1470_v0, 0.0  ;;  %v1469_v7 = vmax.f32 %v1457_v63, %v1467_v1  ;;  %7757 = vmatmul.mubr.msk.f32.gmra.mrb[102].mxu0 %vm279_vm4, %v1821_v4  ;;  %v7636_v8 = vpop.f32.mrb[26].mxu0 }
 0x11d   : > { %1314 = vst.msk [vmem:[#allocation2 + $0xd8] sm:$0xff] %vm279_vm4, %v7636_v8  ;;  %v928_v9 = vpop.f32.mrb[27].mxu0  ;;  %v1477_v14 = vld [vmem:[#allocation2 + $0xa8] ss:$2 sm:$0xff]  ;;  %v1481_v16 = vld [vmem:[#allocation2 + $0xa9] ss:$2 sm:$0xff] }
 0x11e   : > { %1474 = vst.msk [vmem:[#allocation3 + $0x31] sm:$0xff] %vm279_vm4, %v1472_v6  ;;  %v1471_v10 = vadd.f32 %v9311_v5, %v1469_v7  ;;  %1313 = vst.msk [vmem:[#allocation2 + $0xd0] sm:$0xff] %vm279_vm4, %v928_v9  ;;  %v1484_v25 = vmax.f32 %v1477_v14, %v1481_v16 }
 0x120   : > { %v1473_v11 = vmax.f32 %v1471_v10, 0.0  ;;  %v7639_v12 = vpop.f32.mrb[28].mxu0 }
 0x121   : > { %1316 = vst.msk [vmem:[#allocation2 + $0xe8] sm:$0xff] %vm279_vm4, %v7639_v12  ;;  %v938_v13 = vpop.f32.mrb[29].mxu0 }
 0x122   : > { %1475 = vst.msk [vmem:[#allocation3 + $0x39] sm:$0x3f] %vm1418_vm5, %v1473_v11  ;;  %v1479_v15 = vld [vmem:[#allocation2 + $0xb8] ss:$2 sm:$0x3f] }
 0x123   : > { %1315 = vst.msk [vmem:[#allocation2 + $0xe0] sm:$0xff] %vm279_vm4, %v938_v13  ;;  %v1483_v17 = vld [vmem:[#allocation2 + $0xb9] ss:$2 sm:$0x3f] }
 0x124   : > { %v7642_v18 = vpop.f32.mrb[30].mxu0  ;;  %v1485_v26 = vmax.f32 %v1479_v15, %v1483_v17 }
 0x125   : > { %v1487_v19 = vld [vmem:[#allocation2 + $0xc4] ss:$2 sm:$0xff]  ;;  %v1489_v20 = vld [vmem:[#allocation2 + $0xd4] ss:$2 sm:$0x3f]  ;;  %1318 = vst.msk [vmem:[#allocation2 + $0xf8] sm:$0xff] %vm279_vm4, %v7642_v18 }
 0x126   : > { %v948_v21 = vpop.f32.mrb[31].mxu0  ;;  %v1491_v22 = vld [vmem:[#allocation2 + $0xc5] ss:$2 sm:$0xff]  ;;  %v1493_v23 = vld [vmem:[#allocation2 + $0xd5] ss:$2 sm:$0x3f] }
 0x127   : > { %1317 = vst.msk [vmem:[#allocation2 + $0xf0] sm:$0xff] %vm279_vm4, %v948_v21  ;;  %v1822_v24 = vld [vmem:[#allocation3 + $0x31] sm:$0xff]  ;;  %v1494_v27 = vmax.f32 %v1487_v19, %v1491_v22  ;;  %v1495_v28 = vmax.f32 %v1489_v20, %v1493_v23 }
 0x128   : > { %7759 = vmatprep.mubr.msk.f32.mxu0 %vm279_vm4, %v1822_v24  ;;  %v7645_v29 = vpop.f32.mrb[32].mxu0 }
 0x129   : > { %v1496_v30 = vmax.f32 %v1484_v25, %v1494_v27  ;;  %v1497_v31 = vmax.f32 %v1485_v26, %v1495_v28  ;;  %1320 = vst.msk [vmem:[#allocation2 + $0x108] sm:$0xff] %vm279_vm4, %v7645_v29  ;;  %v958_v32 = vpop.f32.mrb[33].mxu0  ;;  %v1823_v33 = vld [vmem:[#allocation3 + $0x39] sm:$0xff] }
 0x12a   : > { %1319 = vst.msk [vmem:[#allocation2 + $0x100] sm:$0xff] %vm279_vm4, %v958_v32  ;;  %7760 = vmatmul.mubr.msk.f32.gmra.mrb[104].mxu0 %vm279_vm4, %v1823_v33  ;;  %v1505_v42 = vld [vmem:[#allocation2 + $0xe0] ss:$2 sm:$0xff]  ;;  %v1509_v43 = vld [vmem:[#allocation2 + $0xe1] ss:$2 sm:$0xff] }
 0x12b   : > { %v1498_v34 = vadd.f32 %v9311_v5, %v1496_v30  ;;  %v1499_v35 = vadd.f32 %v9311_v5, %v1497_v31  ;;  %v1512_v49 = vmax.f32 %v1505_v42, %v1509_v43 }
 0x12c   : > { %v7648_v36 = vpop.f32.mrb[34].mxu0 }
 0x12d   : > { %v1500_v37 = vmax.f32 %v1498_v34, 0.0  ;;  %v1501_v38 = vmax.f32 %v1499_v35, 0.0  ;;  %1322 = vst.msk [vmem:[#allocation2 + $0x118] sm:$0xff] %vm279_vm4, %v7648_v36  ;;  %v968_v39 = vpop.f32.mrb[35].mxu0 }
 0x12e   : > { %1321 = vst.msk [vmem:[#allocation2 + $0x110] sm:$0xff] %vm279_vm4, %v968_v39  ;;  %v1507_v51 = vld [vmem:[#allocation2 + $0xf0] ss:$2 sm:$0x3f] }
 0x12f   : > { %1502 = vst.msk [vmem:[#allocation3 + $0x41] sm:$0xff] %vm279_vm4, %v1500_v37  ;;  %v1511_v52 = vld [vmem:[#allocation2 + $0xf1] ss:$2 sm:$0x3f] }
 0x130   : > { %1503 = vst.msk [vmem:[#allocation3 + $0x49] sm:$0x3f] %vm1418_vm5, %v1501_v38  ;;  %v7651_v45 = vpop.f32.mrb[36].mxu0  ;;  %v1513_v57 = vmax.f32 %v1507_v51, %v1511_v52 }
 0x131   : > { %v1515_v46 = vld [vmem:[#allocation2 + $0xfc] ss:$2 sm:$0xff]  ;;  %v1519_v47 = vld [vmem:[#allocation2 + $0xfd] ss:$2 sm:$0xff]  ;;  %1324 = vst.msk [vmem:[#allocation2 + $0x128] sm:$0xff] %vm279_vm4, %v7651_v45  ;;  %v978_v48 = vpop.f32.mrb[37].mxu0 }
 0x132   : > { %v1522_v50 = vmax.f32 %v1515_v46, %v1519_v47  ;;  %1323 = vst.msk [vmem:[#allocation2 + $0x120] sm:$0xff] %vm279_vm4, %v978_v48 }
 0x134   : > { %v1524_v53 = vmax.f32 %v1512_v49, %v1522_v50  ;;  %v7654_v54 = vpop.f32.mrb[38].mxu0 }
 0x135   : > { %v1517_v55 = vld [vmem:[#allocation2 + $0x10c] ss:$2 sm:$0x3f]  ;;  %v1521_v56 = vld [vmem:[#allocation2 + $0x10d] ss:$2 sm:$0x3f] }
 0x136   : > { %1326 = vst.msk [vmem:[#allocation2 + $0x138] sm:$0xff] %vm279_vm4, %v7654_v54  ;;  %v1526_v58 = vadd.f32 %v9311_v5, %v1524_v53  ;;  %v1523_v59 = vmax.f32 %v1517_v55, %v1521_v56  ;;  %v988_v60 = vpop.f32.mrb[39].mxu0  ;;  %v1824_v61 = vld [vmem:[#allocation3 + $0x41] sm:$0xff] }
 0x137   : > { %v1825_v62 = vld [vmem:[#allocation3 + $0x49] sm:$0xff]  ;;  %1325 = vst.msk [vmem:[#allocation2 + $0x130] sm:$0xff] %vm279_vm4, %v988_v60  ;;  %7762 = vmatprep.mubr.msk.f32.mxu0 %vm279_vm4, %v1824_v61 }
 0x138   : > { %v1528_v63 = vmax.f32 %v1526_v58, 0.0  ;;  %v1525_v0 = vmax.f32 %v1513_v57, %v1523_v59  ;;  %7763 = vmatmul.mubr.msk.f32.gmra.mrb[106].mxu0 %vm279_vm4, %v1825_v62  ;;  %v7657_v1 = vpop.f32.mrb[40].mxu0 }
 0x139   : > { %1328 = vst.msk [vmem:[#allocation2 + $0x148] sm:$0xff] %vm279_vm4, %v7657_v1  ;;  %v998_v2 = vpop.f32.mrb[41].mxu0  ;;  %v1533_v8 = vld [vmem:[#allocation2 + $0x118] ss:$2 sm:$0xff]  ;;  %v1537_v10 = vld [vmem:[#allocation2 + $0x119] ss:$2 sm:$0xff] }
 0x13a   : > { %1530 = vst.msk [vmem:[#allocation3 + $0x51] sm:$0xff] %vm279_vm4, %v1528_v63  ;;  %v1527_v3 = vadd.f32 %v9311_v5, %v1525_v0  ;;  %1327 = vst.msk [vmem:[#allocation2 + $0x140] sm:$0xff] %vm279_vm4, %v998_v2  ;;  %v1540_v19 = vmax.f32 %v1533_v8, %v1537_v10 }
 0x13c   : > { %v1529_v4 = vmax.f32 %v1527_v3, 0.0  ;;  %v7660_v6 = vpop.f32.mrb[42].mxu0 }
 0x13d   : > { %1330 = vst.msk [vmem:[#allocation2 + $0x158] sm:$0xff] %vm279_vm4, %v7660_v6  ;;  %v1008_v7 = vpop.f32.mrb[43].mxu0  ;;  %v6697_v6 = vld [vmem:[%s10686_s3 + $0x58] sm:$0xff] }
 0x13e   : > { %1531 = vst.msk [vmem:[#allocation3 + $0x59] sm:$0x3f] %vm1418_vm5, %v1529_v4  ;;  %v1535_v9 = vld [vmem:[#allocation2 + $0x128] ss:$2 sm:$0x3f] }
 0x13f   : > { %1329 = vst.msk [vmem:[#allocation2 + $0x150] sm:$0xff] %vm279_vm4, %v1008_v7  ;;  %v1539_v11 = vld [vmem:[#allocation2 + $0x129] ss:$2 sm:$0x3f] }
 0x140   : > { %v7663_v12 = vpop.f32.mrb[44].mxu0  ;;  %v1541_v20 = vmax.f32 %v1535_v9, %v1539_v11  ;;  %v6696_v4 = vld [vmem:[%s10686_s3 + $0x50] sm:$0xff] }
 0x141   : > { %v1543_v13 = vld [vmem:[#allocation2 + $0x134] ss:$2 sm:$0xff]  ;;  %v1545_v14 = vld [vmem:[#allocation2 + $0x144] ss:$2 sm:$0x3f]  ;;  %1332 = vst.msk [vmem:[#allocation2 + $0x168] sm:$0xff] %vm279_vm4, %v7663_v12 }
 0x142   : > { %v1018_v15 = vpop.f32.mrb[45].mxu0  ;;  %v1547_v16 = vld [vmem:[#allocation2 + $0x135] ss:$2 sm:$0xff]  ;;  %v1549_v17 = vld [vmem:[#allocation2 + $0x145] ss:$2 sm:$0x3f] }
 0x143   : > { %1331 = vst.msk [vmem:[#allocation2 + $0x160] sm:$0xff] %vm279_vm4, %v1018_v15  ;;  %v1826_v18 = vld [vmem:[#allocation3 + $0x51] sm:$0xff]  ;;  %v1550_v21 = vmax.f32 %v1543_v13, %v1547_v16  ;;  %v1551_v22 = vmax.f32 %v1545_v14, %v1549_v17 }
 0x144   : > { %7765 = vmatprep.mubr.msk.f32.mxu0 %vm279_vm4, %v1826_v18  ;;  %v7666_v23 = vpop.f32.mrb[46].mxu0 }
 0x145   : > { %v1552_v24 = vmax.f32 %v1540_v19, %v1550_v21  ;;  %v1553_v25 = vmax.f32 %v1541_v20, %v1551_v22  ;;  %1334 = vst.msk [vmem:[#allocation2 + $0x178] sm:$0xff] %vm279_vm4, %v7666_v23  ;;  %v1028_v26 = vpop.f32.mrb[47].mxu0  ;;  %v1827_v27 = vld [vmem:[#allocation3 + $0x59] sm:$0xff]  ;;  %v8470_v23 = vpack.c.bf16 %v6697_v6, %v6696_v4 }
 0x146   : > { %1333 = vst.msk [vmem:[#allocation2 + $0x170] sm:$0xff] %vm279_vm4, %v1028_v26  ;;  %7766 = vmatmul.mubr.msk.f32.gmra.mrb[108].mxu0 %vm279_vm4, %v1827_v27  ;;  %v1561_v34 = vld [vmem:[#allocation2 + $0x150] ss:$2 sm:$0xff]  ;;  %v1565_v35 = vld [vmem:[#allocation2 + $0x151] ss:$2 sm:$0xff]  ;;  %v6727_v26 = vld [vmem:[%s10686_s3 + $0x68] sm:$0xff] }
 0x147   : > { %v1554_v28 = vadd.f32 %v9311_v5, %v1552_v24  ;;  %v1555_v29 = vadd.f32 %v9311_v5, %v1553_v25  ;;  %v1568_v40 = vmax.f32 %v1561_v34, %v1565_v35  ;;  %v6726_v25 = vld [vmem:[%s10686_s3 + $0x60] sm:$0xff] }
 0x148   : > { %v7669_v30 = vpop.f32.mrb[48].mxu0 }
 0x149   : > { %v1556_v31 = vmax.f32 %v1554_v28, 0.0  ;;  %v1557_v32 = vmax.f32 %v1555_v29, 0.0  ;;  %1336 = vst.msk [vmem:[#allocation2 + $0x188] sm:$0xff] %vm279_vm4, %v7669_v30  ;;  %v1038_v33 = vpop.f32.mrb[49].mxu0 }
 0x14a   : > { %1335 = vst.msk [vmem:[#allocation2 + $0x180] sm:$0xff] %vm279_vm4, %v1038_v33  ;;  %v1563_v42 = vld [vmem:[#allocation2 + $0x160] ss:$2 sm:$0x3f]  ;;  %v9452_v33 = vpack.c.bf16 %v6727_v26, %v6726_v25 }
 0x14b   : > { %1558 = vst.msk [vmem:[#allocation3 + $0x61] sm:$0xff] %vm279_vm4, %v1556_v31  ;;  %v1567_v43 = vld [vmem:[#allocation2 + $0x161] ss:$2 sm:$0x3f] }
 0x14c   : > { %1559 = vst.msk [vmem:[#allocation3 + $0x69] sm:$0x3f] %vm1418_vm5, %v1557_v32  ;;  %v7672_v36 = vpop.f32.mrb[50].mxu0  ;;  %v1569_v49 = vmax.f32 %v1563_v42, %v1567_v43 }
 0x14d   : > { %v1571_v37 = vld [vmem:[#allocation2 + $0x16c] ss:$2 sm:$0xff]  ;;  %v1575_v38 = vld [vmem:[#allocation2 + $0x16d] ss:$2 sm:$0xff]  ;;  %1338 = vst.msk [vmem:[#allocation2 + $0x198] sm:$0xff] %vm279_vm4, %v7672_v36  ;;  %v1048_v39 = vpop.f32.mrb[51].mxu0 }
 0x14e   : > { %v1578_v41 = vmax.f32 %v1571_v37, %v1575_v38  ;;  %1337 = vst.msk [vmem:[#allocation2 + $0x190] sm:$0xff] %vm279_vm4, %v1048_v39 }
 0x150   : > { %v1580_v45 = vmax.f32 %v1568_v40, %v1578_v41  ;;  %v7675_v46 = vpop.f32.mrb[52].mxu0 }
 0x151   : > { %v1573_v47 = vld [vmem:[#allocation2 + $0x17c] ss:$2 sm:$0x3f]  ;;  %v1577_v48 = vld [vmem:[#allocation2 + $0x17d] ss:$2 sm:$0x3f] }
 0x152   : > { %1340 = vst.msk [vmem:[#allocation2 + $0x1a8] sm:$0xff] %vm279_vm4, %v7675_v46  ;;  %v1582_v50 = vadd.f32 %v9311_v5, %v1580_v45  ;;  %v1579_v51 = vmax.f32 %v1573_v47, %v1577_v48  ;;  %v1058_v52 = vpop.f32.mrb[53].mxu0  ;;  %v9400_v53 = vld [vmem:[#allocation3 + $0x61] sm:$0xff] }
 0x153   : > { %v9402_v54 = vld [vmem:[#allocation3 + $0x69] sm:$0xff]  ;;  %1339 = vst.msk [vmem:[#allocation2 + $0x1a0] sm:$0xff] %vm279_vm4, %v1058_v52  ;;  %7768 = vmatprep.mubr.msk.f32.mxu0 %vm279_vm4, %v9400_v53 }
 0x154   : > { %v1584_v55 = vmax.f32 %v1582_v50, 0.0  ;;  %v1581_v56 = vmax.f32 %v1569_v49, %v1579_v51  ;;  %7769 = vmatmul.mubr.msk.f32.gmra.mrb[110].mxu0 %vm279_vm4, %v9402_v54  ;;  %v7678_v57 = vpop.f32.mrb[54].mxu0 }
 0x155   : > { %1342 = vst.msk [vmem:[#allocation2 + $0x1b8] sm:$0xff] %vm279_vm4, %v7678_v57  ;;  %v1068_v58 = vpop.f32.mrb[55].mxu0  ;;  %v1589_v63 = vld [vmem:[#allocation2 + $0x188] ss:$2 sm:$0xff]  ;;  %v1593_v1 = vld [vmem:[#allocation2 + $0x189] ss:$2 sm:$0xff] }
 0x156   : > { %1586 = vst.msk [vmem:[#allocation3 + $0x71] sm:$0xff] %vm279_vm4, %v1584_v55  ;;  %v1583_v59 = vadd.f32 %v9311_v5, %v1581_v56  ;;  %1341 = vst.msk [vmem:[#allocation2 + $0x1b0] sm:$0xff] %vm279_vm4, %v1068_v58  ;;  %v1596_v13 = vmax.f32 %v1589_v63, %v1593_v1 }
 0x158   : > { %v1585_v60 = vmax.f32 %v1583_v59, 0.0  ;;  %v7681_v61 = vpop.f32.mrb[56].mxu0 }
 0x159   : > { %1344 = vst.msk [vmem:[#allocation2 + $0x1c8] sm:$0xff] %vm279_vm4, %v7681_v61  ;;  %v1078_v62 = vpop.f32.mrb[57].mxu0 }
 0x15a   : > { %1587 = vst.msk [vmem:[#allocation3 + $0x79] sm:$0x3f] %vm1418_vm5, %v1585_v60  ;;  %v1591_v0 = vld [vmem:[#allocation2 + $0x198] ss:$2 sm:$0x3f] }
 0x15b   : > { %1343 = vst.msk [vmem:[#allocation2 + $0x1c0] sm:$0xff] %vm279_vm4, %v1078_v62  ;;  %v1595_v2 = vld [vmem:[#allocation2 + $0x199] ss:$2 sm:$0x3f] }
 0x15c   : > { %v7684_v3 = vpop.f32.mrb[58].mxu0  ;;  %v1597_v14 = vmax.f32 %v1591_v0, %v1595_v2 }
 0x15d   : > { %v1599_v7 = vld [vmem:[#allocation2 + $0x1a4] ss:$2 sm:$0xff]  ;;  %v1601_v8 = vld [vmem:[#allocation2 + $0x1b4] ss:$2 sm:$0x3f]  ;;  %1346 = vst.msk [vmem:[#allocation2 + $0x1d8] sm:$0xff] %vm279_vm4, %v7684_v3 }
 0x15e   : > { %v1088_v9 = vpop.f32.mrb[59].mxu0  ;;  %v1603_v10 = vld [vmem:[#allocation2 + $0x1a5] ss:$2 sm:$0xff]  ;;  %v1605_v11 = vld [vmem:[#allocation2 + $0x1b5] ss:$2 sm:$0x3f] }
 0x15f   : > { %1345 = vst.msk [vmem:[#allocation2 + $0x1d0] sm:$0xff] %vm279_vm4, %v1088_v9  ;;  %v9424_v12 = vld [vmem:[#allocation3 + $0x71] sm:$0xff]  ;;  %v1606_v15 = vmax.f32 %v1599_v7, %v1603_v10  ;;  %v1607_v16 = vmax.f32 %v1601_v8, %v1605_v11 }
 0x160   : > { %7771 = vmatprep.mubr.msk.f32.mxu0 %vm279_vm4, %v9424_v12  ;;  %v9428_v17 = vld [vmem:[#allocation3 + $0x70] sm:$0xff]  ;;  %v7687_v18 = vpop.f32.mrb[60].mxu0 }
 0x161   : > { %7821 = vmatprep.mubr.msk.f32.mxu1 %vm279_vm4, %v9428_v17  ;;  %v1608_v19 = vmax.f32 %v1596_v13, %v1606_v15  ;;  %v1609_v20 = vmax.f32 %v1597_v14, %v1607_v16  ;;  %1348 = vst.msk [vmem:[#allocation2 + $0x1e8] sm:$0xff] %vm279_vm4, %v7687_v18  ;;  %v1098_v21 = vpop.f32.mrb[61].mxu0  ;;  %v9433_v22 = vld [vmem:[#allocation3 + $0x79] sm:$0xff] }
 0x162   : > { %1347 = vst.msk [vmem:[#allocation2 + $0x1e0] sm:$0xff] %vm279_vm4, %v1098_v21  ;;  %7772 = vmatmul.mubr.msk.f32.gmra.mrb[112].mxu0 %vm279_vm4, %v9433_v22  ;;  %v9438_v24 = vld [vmem:[#allocation3 + $0x78] sm:$0xff] }
 0x163   : > { %v1610_v27 = vadd.f32 %v9311_v5, %v1608_v19  ;;  %v1611_v28 = vadd.f32 %v9311_v5, %v1609_v20  ;;  %7822 = vmatmul.mubr.msk.f32.vlgmr.msra.gmra.mrb[0].mxu1 %vm279_vm4, %v9438_v24  ;;  %v1617_v34 = vld [vmem:[#allocation2 + $0x1c0] ss:$2 sm:$0xff]  ;;  %v1621_v35 = vld [vmem:[#allocation2 + $0x1c1] ss:$2 sm:$0xff] }
 0x164   : > { %v7690_v29 = vpop.f32.mrb[62].mxu0  ;;  %8469 = vmatpush3.bf16.msra.mxu1 %v9367_v44  ;;  %v1624_v39 = vmax.f32 %v1617_v34, %v1621_v35 }
 0x165   : > { %v1612_v30 = vmax.f32 %v1610_v27, 0.0  ;;  %v1613_v31 = vmax.f32 %v1611_v28, 0.0  ;;  %1350 = vst.msk [vmem:[#allocation2 + $0x1f8] sm:$0xff] %vm279_vm4, %v7690_v29  ;;  %v1108_v32 = vpop.f32.mrb[63].mxu0  ;;  %8471 = vmatprep.subr.bf16.mxu1 %v8470_v23 }
 0x166   : > { %1349 = vst.msk [vmem:[#allocation2 + $0x1f0] sm:$0xff] %vm279_vm4, %v1108_v32  ;;  %v1619_v41 = vld [vmem:[#allocation2 + $0x1d0] ss:$2 sm:$0x3f] }
 0x167   : > { %1614 = vst.msk [vmem:[#allocation3 + $0x81] sm:$0xff] %vm279_vm4, %v1612_v30  ;;  %v1623_v42 = vld [vmem:[#allocation2 + $0x1d1] ss:$2 sm:$0x3f] }
 0x168   : > { %1615 = vst.msk [vmem:[#allocation3 + $0x89] sm:$0x3f] %vm1418_vm5, %v1613_v31  ;;  %v7693_v36 = vpop.f32.mrb[64].mxu0  ;;  %8473 = vmatpush3.bf16.msra.mxu1 %v8470_v23  ;;  %v1625_v48 = vmax.f32 %v1619_v41, %v1623_v42 }
 0x169   : > { %v1627_v37 = vld [vmem:[#allocation2 + $0x1dc] ss:$2 sm:$0xff]  ;;  %v1631_v44 = vld [vmem:[#allocation2 + $0x1dd] ss:$2 sm:$0xff]  ;;  %1352 = vst.msk [vmem:[#allocation2 + $0x208] sm:$0xff] %vm279_vm4, %v7693_v36  ;;  %v1118_v38 = vpop.f32.mrb[65].mxu0  ;;  %8475 = vmatprep.subr.bf16.mxu1 %v9452_v33 }
 0x16a   : > { %v1634_v40 = vmax.f32 %v1627_v37, %v1631_v44  ;;  %1351 = vst.msk [vmem:[#allocation2 + $0x200] sm:$0xff] %vm279_vm4, %v1118_v38 }
 0x16c   : > { %v1636_v43 = vmax.f32 %v1624_v39, %v1634_v40  ;;  %v7696_v45 = vpop.f32.mrb[66].mxu0 }
 0x16d   : > { %v1629_v46 = vld [vmem:[#allocation2 + $0x1ec] ss:$2 sm:$0x3f]  ;;  %v1633_v47 = vld [vmem:[#allocation2 + $0x1ed] ss:$2 sm:$0x3f] }
 0x16e   : > { %1354 = vst.msk [vmem:[#allocation2 + $0x218] sm:$0xff] %vm279_vm4, %v7696_v45  ;;  %v1638_v49 = vadd.f32 %v9311_v5, %v1636_v43  ;;  %v1635_v50 = vmax.f32 %v1629_v46, %v1633_v47  ;;  %v1128_v51 = vpop.f32.mrb[67].mxu0  ;;  %v9462_v52 = vld [vmem:[#allocation3 + $0x81] sm:$0xff] }
 0x16f   : > { %v9464_v55 = vld [vmem:[#allocation3 + $0x80] sm:$0xff]  ;;  %v9466_v56 = vld [vmem:[#allocation3 + $0x89] sm:$0xff]  ;;  %1353 = vst.msk [vmem:[#allocation2 + $0x210] sm:$0xff] %vm279_vm4, %v1128_v51  ;;  %7774 = vmatprep.mubr.msk.f32.mxu0 %vm279_vm4, %v9462_v52 }
 0x170   : > { %7824 = vmatprep.mubr.msk.f32.mxu1 %vm279_vm4, %v9464_v55  ;;  %v9473_v57 = vld [vmem:[#allocation3 + $0x88] sm:$0xff]  ;;  %v1640_v58 = vmax.f32 %v1638_v49, 0.0  ;;  %v1637_v59 = vmax.f32 %v1625_v48, %v1635_v50  ;;  %7775 = vmatmul.mubr.msk.f32.gmra.mrb[114].mxu0 %vm279_vm4, %v9466_v56  ;;  %v7699_v60 = vpop.f32.mrb[68].mxu0 }
 0x171   : > { %7825 = vmatmul.mubr.msk.f32.gmra.mrb[2].mxu1 %vm279_vm4, %v9473_v57  ;;  %1356 = vst.msk [vmem:[#allocation2 + $0x228] sm:$0xff] %vm279_vm4, %v7699_v60  ;;  %v1138_v61 = vpop.f32.mrb[69].mxu0  ;;  %v1645_v2 = vld [vmem:[#allocation2 + $0x1f8] ss:$2 sm:$0xff]  ;;  %v1649_v4 = vld [vmem:[#allocation2 + $0x1f9] ss:$2 sm:$0xff] }
 0x172   : > { %1642 = vst.msk [vmem:[#allocation3 + $0x91] sm:$0xff] %vm279_vm4, %v1640_v58  ;;  %v1639_v62 = vadd.f32 %v9311_v5, %v1637_v59  ;;  %1355 = vst.msk [vmem:[#allocation2 + $0x220] sm:$0xff] %vm279_vm4, %v1138_v61  ;;  %v1652_v15 = vmax.f32 %v1645_v2, %v1649_v4 }
 0x174   : > { %v1641_v63 = vmax.f32 %v1639_v62, 0.0  ;;  %v7702_v0 = vpop.f32.mrb[70].mxu0 }
 0x175   : > { %1358 = vst.msk [vmem:[#allocation2 + $0x238] sm:$0xff] %vm279_vm4, %v7702_v0  ;;  %v1148_v1 = vpop.f32.mrb[71].mxu0 }
 0x176   : > { %1643 = vst.msk [vmem:[#allocation3 + $0x99] sm:$0x3f] %vm1418_vm5, %v1641_v63  ;;  %v1647_v3 = vld [vmem:[#allocation2 + $0x208] ss:$2 sm:$0x3f] }
 0x177   : > { %1357 = vst.msk [vmem:[#allocation2 + $0x230] sm:$0xff] %vm279_vm4, %v1148_v1  ;;  %v1651_v6 = vld [vmem:[#allocation2 + $0x209] ss:$2 sm:$0x3f] }
 0x178   : > { %v7705_v7 = vpop.f32.mrb[72].mxu0  ;;  %v1653_v16 = vmax.f32 %v1647_v3, %v1651_v6 }
 0x179   : > { %v1655_v8 = vld [vmem:[#allocation2 + $0x214] ss:$2 sm:$0xff]  ;;  %v1657_v9 = vld [vmem:[#allocation2 + $0x224] ss:$2 sm:$0x3f]  ;;  %1360 = vst.msk [vmem:[#allocation2 + $0x248] sm:$0xff] %vm279_vm4, %v7705_v7 }
 0x17a   : > { %v1158_v10 = vpop.f32.mrb[73].mxu0  ;;  %v1659_v11 = vld [vmem:[#allocation2 + $0x215] ss:$2 sm:$0xff]  ;;  %v1661_v13 = vld [vmem:[#allocation2 + $0x225] ss:$2 sm:$0x3f] }
 0x17b   : > { %1359 = vst.msk [vmem:[#allocation2 + $0x240] sm:$0xff] %vm279_vm4, %v1158_v10  ;;  %v9488_v14 = vld [vmem:[#allocation3 + $0x91] sm:$0xff]  ;;  %v1662_v18 = vmax.f32 %v1655_v8, %v1659_v11  ;;  %v1663_v19 = vmax.f32 %v1657_v9, %v1661_v13 }
 0x17c   : > { %7777 = vmatprep.mubr.msk.f32.mxu0 %vm279_vm4, %v9488_v14  ;;  %v9492_v20 = vld [vmem:[#allocation3 + $0x90] sm:$0xff]  ;;  %v7708_v21 = vpop.f32.mrb[74].mxu0 }
 0x17d   : > { %7827 = vmatprep.mubr.msk.f32.mxu1 %vm279_vm4, %v9492_v20  ;;  %v1664_v23 = vmax.f32 %v1652_v15, %v1662_v18  ;;  %v1665_v25 = vmax.f32 %v1653_v16, %v1663_v19  ;;  %1362 = vst.msk [vmem:[#allocation2 + $0x258] sm:$0xff] %vm279_vm4, %v7708_v21  ;;  %v1168_v26 = vpop.f32.mrb[75].mxu0  ;;  %v9497_v27 = vld [vmem:[#allocation3 + $0x99] sm:$0xff] }
 0x17e   : > { %1361 = vst.msk [vmem:[#allocation2 + $0x250] sm:$0xff] %vm279_vm4, %v1168_v26  ;;  %7778 = vmatmul.mubr.msk.f32.gmra.mrb[116].mxu0 %vm279_vm4, %v9497_v27  ;;  %v9502_v28 = vld [vmem:[#allocation3 + $0x98] sm:$0xff]  ;;  %v1673_v36 = vld [vmem:[#allocation2 + $0x230] ss:$2 sm:$0xff]  ;;  %v1677_v37 = vld [vmem:[#allocation2 + $0x231] ss:$2 sm:$0xff] }
 0x17f   : > { %v1666_v29 = vadd.f32 %v9311_v5, %v1664_v23  ;;  %v1667_v30 = vadd.f32 %v9311_v5, %v1665_v25  ;;  %7828 = vmatmul.mubr.msk.f32.gmra.mrb[4].mxu1 %vm279_vm4, %v9502_v28  ;;  %v1680_v41 = vmax.f32 %v1673_v36, %v1677_v37 }
 0x180   : > { %v7711_v31 = vpop.f32.mrb[76].mxu0 }
 0x181   : > { %v1668_v32 = vmax.f32 %v1666_v29, 0.0  ;;  %v1669_v34 = vmax.f32 %v1667_v30, 0.0  ;;  %1364 = vst.msk [vmem:[#allocation2 + $0x268] sm:$0xff] %vm279_vm4, %v7711_v31  ;;  %v1178_v35 = vpop.f32.mrb[77].mxu0 }
 0x182   : > { %1363 = vst.msk [vmem:[#allocation2 + $0x260] sm:$0xff] %vm279_vm4, %v1178_v35  ;;  %v1675_v43 = vld [vmem:[#allocation2 + $0x240] ss:$2 sm:$0x3f] }
 0x183   : > { %1670 = vst.msk [vmem:[#allocation3 + $0xa1] sm:$0xff] %vm279_vm4, %v1668_v32  ;;  %v1679_v45 = vld [vmem:[#allocation2 + $0x241] ss:$2 sm:$0x3f] }
 0x184   : > { %1671 = vst.msk [vmem:[#allocation3 + $0xa9] sm:$0x3f] %vm1418_vm5, %v1669_v34  ;;  %v7714_v44 = vpop.f32.mrb[78].mxu0  ;;  %v1681_v50 = vmax.f32 %v1675_v43, %v1679_v45 }
 0x185   : > { %v1683_v38 = vld [vmem:[#allocation2 + $0x24c] ss:$2 sm:$0xff]  ;;  %v1687_v39 = vld [vmem:[#allocation2 + $0x24d] ss:$2 sm:$0xff]  ;;  %1366 = vst.msk [vmem:[#allocation2 + $0x278] sm:$0xff] %vm279_vm4, %v7714_v44  ;;  %v1188_v40 = vpop.f32.mrb[79].mxu0 }
 0x186   : > { %v1690_v42 = vmax.f32 %v1683_v38, %v1687_v39  ;;  %1365 = vst.msk [vmem:[#allocation2 + $0x270] sm:$0xff] %vm279_vm4, %v1188_v40 }
 0x188   : > { %v1692_v46 = vmax.f32 %v1680_v41, %v1690_v42  ;;  %v7717_v47 = vpop.f32.mrb[80].mxu0 }
 0x189   : > { %v1685_v48 = vld [vmem:[#allocation2 + $0x25c] ss:$2 sm:$0x3f]  ;;  %v1689_v49 = vld [vmem:[#allocation2 + $0x25d] ss:$2 sm:$0x3f] }
 0x18a   : > { %1368 = vst.msk [vmem:[#allocation2 + $0x288] sm:$0xff] %vm279_vm4, %v7717_v47  ;;  %v1694_v51 = vadd.f32 %v9311_v5, %v1692_v46  ;;  %v1691_v58 = vmax.f32 %v1685_v48, %v1689_v49  ;;  %v1198_v59 = vpop.f32.mrb[81].mxu0  ;;  %v9516_v60 = vld [vmem:[#allocation3 + $0xa1] sm:$0xff] }
 0x18b   : > { %v9518_v61 = vld [vmem:[#allocation3 + $0xa0] sm:$0xff]  ;;  %v9520_v62 = vld [vmem:[#allocation3 + $0xa9] sm:$0xff]  ;;  %1367 = vst.msk [vmem:[#allocation2 + $0x280] sm:$0xff] %vm279_vm4, %v1198_v59  ;;  %7780 = vmatprep.mubr.msk.f32.mxu0 %vm279_vm4, %v9516_v60 }
 0x18c   : > { %7830 = vmatprep.mubr.msk.f32.mxu1 %vm279_vm4, %v9518_v61  ;;  %v9527_v63 = vld [vmem:[#allocation3 + $0xa8] sm:$0xff]  ;;  %v1696_v0 = vmax.f32 %v1694_v51, 0.0  ;;  %v1693_v1 = vmax.f32 %v1681_v50, %v1691_v58  ;;  %7781 = vmatmul.mubr.msk.f32.gmra.mrb[118].mxu0 %vm279_vm4, %v9520_v62  ;;  %v7720_v2 = vpop.f32.mrb[82].mxu0 }
 0x18d   : > { %7831 = vmatmul.mubr.msk.f32.gmra.mrb[6].mxu1 %vm279_vm4, %v9527_v63  ;;  %1370 = vst.msk [vmem:[#allocation2 + $0x298] sm:$0xff] %vm279_vm4, %v7720_v2  ;;  %v1208_v3 = vpop.f32.mrb[83].mxu0  ;;  %v1701_v9 = vld [vmem:[#allocation2 + $0x268] ss:$2 sm:$0xff]  ;;  %v1705_v11 = vld [vmem:[#allocation2 + $0x269] ss:$2 sm:$0xff] }
 0x18e   : > { %1698 = vst.msk [vmem:[#allocation3 + $0xb1] sm:$0xff] %vm279_vm4, %v1696_v0  ;;  %v1695_v4 = vadd.f32 %v9311_v5, %v1693_v1  ;;  %1369 = vst.msk [vmem:[#allocation2 + $0x290] sm:$0xff] %vm279_vm4, %v1208_v3  ;;  %v1708_v26 = vmax.f32 %v1701_v9, %v1705_v11 }
 0x190   : > { %v1697_v6 = vmax.f32 %v1695_v4, 0.0  ;;  %v7723_v7 = vpop.f32.mrb[84].mxu0 }
 0x191   : > { %1372 = vst.msk [vmem:[#allocation2 + $0x2a8] sm:$0xff] %vm279_vm4, %v7723_v7  ;;  %v1218_v8 = vpop.f32.mrb[85].mxu0 }
 0x192   : > { %1699 = vst.msk [vmem:[#allocation3 + $0xb9] sm:$0x3f] %vm1418_vm5, %v1697_v6  ;;  %v1703_v10 = vld [vmem:[#allocation2 + $0x278] ss:$2 sm:$0x3f] }
 0x193   : > { %1371 = vst.msk [vmem:[#allocation2 + $0x2a0] sm:$0xff] %vm279_vm4, %v1218_v8  ;;  %v1707_v13 = vld [vmem:[#allocation2 + $0x279] ss:$2 sm:$0x3f] }
 0x194   : > { %v7726_v15 = vpop.f32.mrb[86].mxu0  ;;  %v1709_v29 = vmax.f32 %v1703_v10, %v1707_v13 }
 0x195   : > { %v1711_v16 = vld [vmem:[#allocation2 + $0x284] ss:$2 sm:$0xff]  ;;  %v1713_v18 = vld [vmem:[#allocation2 + $0x294] ss:$2 sm:$0x3f]  ;;  %1374 = vst.msk [vmem:[#allocation2 + $0x2b8] sm:$0xff] %vm279_vm4, %v7726_v15 }
 0x196   : > { %v1228_v19 = vpop.f32.mrb[87].mxu0  ;;  %v1715_v21 = vld [vmem:[#allocation2 + $0x285] ss:$2 sm:$0xff]  ;;  %v1717_v23 = vld [vmem:[#allocation2 + $0x295] ss:$2 sm:$0x3f] }
 0x197   : > { %1373 = vst.msk [vmem:[#allocation2 + $0x2b0] sm:$0xff] %vm279_vm4, %v1228_v19  ;;  %v9542_v25 = vld [vmem:[#allocation3 + $0xb1] sm:$0xff]  ;;  %v1718_v30 = vmax.f32 %v1711_v16, %v1715_v21  ;;  %v1719_v31 = vmax.f32 %v1713_v18, %v1717_v23  ;;  %v8969_v23 = vld [vmem:[%s10685_s2] ss:$0 sm:$0xff] }
 0x198   : > { %7783 = vmatprep.mubr.msk.f32.mxu0 %vm279_vm4, %v9542_v25  ;;  %v9546_v32 = vld [vmem:[#allocation3 + $0xb0] sm:$0xff]  ;;  %v7729_v34 = vpop.f32.mrb[88].mxu0 }
 0x199   : > { %7833 = vmatprep.mubr.msk.f32.mxu1 %vm279_vm4, %v9546_v32  ;;  %v1720_v35 = vmax.f32 %v1708_v26, %v1718_v30  ;;  %v1721_v36 = vmax.f32 %v1709_v29, %v1719_v31  ;;  %1376 = vst.msk [vmem:[#allocation2 + $0x2c8] sm:$0xff] %vm279_vm4, %v7729_v34  ;;  %v1238_v37 = vpop.f32.mrb[89].mxu0  ;;  %v9551_v44 = vld [vmem:[#allocation3 + $0xb9] sm:$0xff] }
 0x19a   : > { %1375 = vst.msk [vmem:[#allocation2 + $0x2c0] sm:$0xff] %vm279_vm4, %v1238_v37  ;;  %7784 = vmatmul.mubr.msk.f32.gmra.mrb[120].mxu0 %vm279_vm4, %v9551_v44  ;;  %v9556_v38 = vld [vmem:[#allocation3 + $0xb8] sm:$0xff] }
 0x19b   : > { %v1722_v39 = vadd.f32 %v9311_v5, %v1720_v35  ;;  %v1723_v40 = vadd.f32 %v9311_v5, %v1721_v36  ;;  %7834 = vmatmul.mubr.msk.f32.gmra.mrb[8].mxu1 %vm279_vm4, %v9556_v38  ;;  %v1729_v46 = vld [vmem:[#allocation2 + $0x2a0] ss:$2 sm:$0xff]  ;;  %v1733_v47 = vld [vmem:[#allocation2 + $0x2a1] ss:$2 sm:$0xff] }
 0x19c   : > { %v7732_v41 = vpop.f32.mrb[90].mxu0  ;;  %v1736_v58 = vmax.f32 %v1729_v46, %v1733_v47 }
 0x19d   : > { %v1724_v42 = vmax.f32 %v1722_v39, 0.0  ;;  %v1725_v43 = vmax.f32 %v1723_v40, 0.0  ;;  %1378 = vst.msk [vmem:[#allocation2 + $0x2d8] sm:$0xff] %vm279_vm4, %v7732_v41  ;;  %v1248_v45 = vpop.f32.mrb[91].mxu0 }
 0x19e   : > { %1377 = vst.msk [vmem:[#allocation2 + $0x2d0] sm:$0xff] %vm279_vm4, %v1248_v45  ;;  %v1731_v0 = vld [vmem:[#allocation2 + $0x2b0] ss:$2 sm:$0x3f] }
 0x19f   : > { %1726 = vst.msk [vmem:[#allocation3 + $0xc1] sm:$0xff] %vm279_vm4, %v1724_v42  ;;  %v1735_v1 = vld [vmem:[#allocation2 + $0x2b1] ss:$2 sm:$0x3f] }
 0x1a0   : > { %1727 = vst.msk [vmem:[#allocation3 + $0xc9] sm:$0x3f] %vm1418_vm5, %v1725_v43  ;;  %v7735_v48 = vpop.f32.mrb[92].mxu0  ;;  %v1737_v7 = vmax.f32 %v1731_v0, %v1735_v1  ;;  %v6729_v1 = vld [vmem:[%s10686_s3 + $0x78] sm:$0xff] }
 0x1a1   : > { %v1739_v49 = vld [vmem:[#allocation2 + $0x2bc] ss:$2 sm:$0xff]  ;;  %v1743_v50 = vld [vmem:[#allocation2 + $0x2bd] ss:$2 sm:$0xff]  ;;  %1380 = vst.msk [vmem:[#allocation2 + $0x2e8] sm:$0xff] %vm279_vm4, %v7735_v48  ;;  %v1258_v51 = vpop.f32.mrb[93].mxu0 }
 0x1a2   : > { %v1746_v59 = vmax.f32 %v1739_v49, %v1743_v50  ;;  %1379 = vst.msk [vmem:[#allocation2 + $0x2e0] sm:$0xff] %vm279_vm4, %v1258_v51  ;;  %v1784_v48 = vld [vmem:[#allocation3] sm:$0xff] }
 0x1a3   : > { %v2427_v49 = vld [vmem:[#allocation3 + $0x2] sm:$0xff] }
 0x1a4   : > { %v1748_v2 = vmax.f32 %v1736_v58, %v1746_v59  ;;  %v7738_v3 = vpop.f32.mrb[94].mxu0  ;;  %v6728_v50 = vld [vmem:[%s10686_s3 + $0x70] sm:$0xff] }
 0x1a5   : > { %v1741_v4 = vld [vmem:[#allocation2 + $0x2cc] ss:$2 sm:$0x3f]  ;;  %v1745_v6 = vld [vmem:[#allocation2 + $0x2cd] ss:$2 sm:$0x3f] }
 0x1a6   : > { %1382 = vst.msk [vmem:[#allocation2 + $0x2f8] sm:$0xff] %vm279_vm4, %v7738_v3  ;;  %v1750_v8 = vadd.f32 %v9311_v5, %v1748_v2  ;;  %v1747_v9 = vmax.f32 %v1741_v4, %v1745_v6  ;;  %v9570_v10 = vld [vmem:[#allocation3 + $0xc1] sm:$0xff]  ;;  %v1268_v13 = vpop.f32.mrb[95].mxu0  ;;  %v8478_v6 = vpack.c.bf16 %v6729_v1, %v6728_v50  ;;  %v9722_v1 = vld [vmem:[#allocation3 + $0x6a] sm:$0xff] }
 0x1a7   : > { %v9572_v11 = vld [vmem:[#allocation3 + $0xc0] sm:$0xff]  ;;  %v9574_v15 = vld [vmem:[#allocation3 + $0xc9] sm:$0xff]  ;;  %7786 = vmatprep.mubr.msk.f32.mxu0 %vm279_vm4, %v9570_v10  ;;  %1381 = vst.msk [vmem:[#allocation2 + $0x2f0] sm:$0xff] %vm279_vm4, %v1268_v13 }
 0x1a8   : > { %7836 = vmatprep.mubr.msk.f32.mxu1 %vm279_vm4, %v9572_v11  ;;  %v9581_v16 = vld [vmem:[#allocation3 + $0xc8] sm:$0xff]  ;;  %v1752_v18 = vmax.f32 %v1750_v8, 0.0  ;;  %v1749_v5 = vmax.f32 %v1737_v7, %v1747_v9  ;;  %7787 = vmatmul.mubr.msk.f32.gmra.mrb[122].mxu0 %vm279_vm4, %v9574_v15  ;;  %v7741_v19 = vpop.f32.mrb[96].mxu0  ;;  %v9620_v13 = vld [vmem:[#allocation3 + $0x10] sm:$0xff]  ;;  %v9712_v50 = vld [vmem:[#allocation3 + $0x60] sm:$0xff] }
 0x1a9   : > { %7837 = vmatmul.mubr.msk.f32.gmra.mrb[10].mxu1 %vm279_vm4, %v9581_v16  ;;  %1384 = vst.msk [vmem:[#allocation2 + $0x308] sm:$0xff] %vm279_vm4, %v7741_v19  ;;  %v1278_v21 = vpop.f32.mrb[97].mxu0  ;;  %v1757_v34 = vld [vmem:[#allocation2 + $0x2d8] ss:$2 sm:$0xff]  ;;  %v1761_v35 = vld [vmem:[#allocation2 + $0x2d9] ss:$2 sm:$0xff] }
 0x1aa   : > { %1754 = vst.msk [vmem:[#allocation3 + $0xd1] sm:$0xff] %vm279_vm4, %v1752_v18  ;;  %v1751_v26 = vadd.f32 %v8969_v23, %v1749_v5  ;;  %1383 = vst.msk [vmem:[#allocation2 + $0x300] sm:$0xff] %vm279_vm4, %v1278_v21  ;;  %v1764_v45 = vmax.f32 %v1757_v34, %v1761_v35  ;;  %v1785_v4 = vld [vmem:[#allocation3 + $0x8] sm:$0xff]  ;;  %v6758_v18 = vld [vmem:[%s10686_s3 + $0x80] sm:$0xff] }
 0x1ab   : > { %v2428_v9 = vld [vmem:[#allocation3 + $0xa] sm:$0xff]  ;;  %v6759_v5 = vld [vmem:[%s10686_s3 + $0x88] sm:$0xff] }
 0x1ac   : > { %v1753_v29 = vmax.f32 %v1751_v26, 0.0  ;;  %v9633_v19 = vld [vmem:[#allocation3 + $0x12] sm:$0xff]  ;;  %v9641_v26 = vpack.c.bf16 %v6759_v5, %v6758_v18  ;;  %v9756_v18 = vld [vmem:[#allocation3 + $0xaa] sm:$0xff] }
 0x1ad   : > { %v9637_v21 = vld [vmem:[#allocation3 + $0x18] sm:$0xff]  ;;  %v9664_v34 = vld [vmem:[#allocation3 + $0x30] sm:$0xff]  ;;  %10718 = vst [vmem:[#allocation12_spill] sm:$0xff] %v9756_v18 }
 0x1ae   : > { %1755 = vst.msk [vmem:[#allocation3 + $0xd9] sm:$0x3f] %vm1418_vm5, %v1753_v29  ;;  %v1759_v30 = vld [vmem:[#allocation2 + $0x2e8] ss:$2 sm:$0x3f] }
 0x1af   : > { %v1763_v31 = vld [vmem:[#allocation2 + $0x2e9] ss:$2 sm:$0x3f] }
 0x1b0   : > { %v1765_v36 = vmax.f32 %v1759_v30, %v1763_v31  ;;  %v9649_v29 = vld [vmem:[#allocation3 + $0x22] sm:$0xff]  ;;  %v9657_v31 = vld [vmem:[#allocation3 + $0x2a] sm:$0xff]  ;;  %v9666_v35 = vld [vmem:[#allocation3 + $0x32] sm:$0xff] }
 0x1b1   : > { %v1767_v37 = vld [vmem:[#allocation2 + $0x2f4] ss:$2 sm:$0xff]  ;;  %v1769_v39 = vld [vmem:[#allocation2 + $0x304] ss:$2 sm:$0x3f] }
 0x1b2   : > { %v9594_v40 = vld [vmem:[#allocation3 + $0xd1] sm:$0xff]  ;;  %v9655_v30 = vld [vmem:[#allocation3 + $0x28] sm:$0xff] }
 0x1b3   : > { %v1771_v41 = vld [vmem:[#allocation2 + $0x2f5] ss:$2 sm:$0xff]  ;;  %v1773_v42 = vld [vmem:[#allocation2 + $0x305] ss:$2 sm:$0x3f]  ;;  %7789 = vmatprep.mubr.msk.f32.mxu0 %vm279_vm4, %v9594_v40 }
 0x1b4   : > { %v9598_v43 = vld [vmem:[#allocation3 + $0xd0] sm:$0xff]  ;;  %v1774_v46 = vmax.f32 %v1767_v37, %v1771_v41  ;;  %v1775_v47 = vmax.f32 %v1769_v39, %v1773_v42  ;;  %v9674_v37 = vld [vmem:[#allocation3 + $0x3a] sm:$0xff]  ;;  %v9682_v41 = vld [vmem:[#allocation3 + $0x42] sm:$0xff] }
 0x1b5   : > { %7839 = vmatprep.mubr.msk.f32.mxu1 %vm279_vm4, %v9598_v43  ;;  %v9605_v59 = vld [vmem:[#allocation3 + $0xd9] sm:$0xff]  ;;  %v9688_v42 = vld [vmem:[#allocation3 + $0x48] sm:$0xff] }
 0x1b6   : > { %v1776_v51 = vmax.f32 %v1764_v45, %v1774_v46  ;;  %v1777_v58 = vmax.f32 %v1765_v36, %v1775_v47  ;;  %v9607_v0 = vld [vmem:[#allocation3 + $0xd8] sm:$0xff]  ;;  %7790 = vmatmul.mubr.msk.f32.gmra.mrb[124].mxu0 %vm279_vm4, %v9605_v59  ;;  %v9680_v39 = vld [vmem:[#allocation3 + $0x40] sm:$0xff]  ;;  %v9690_v45 = vld [vmem:[#allocation3 + $0x4a] sm:$0xff] }
 0x1b7   : > { %7840 = vmatmul.mubr.msk.f32.gmra.mrb[12].mxu1 %vm279_vm4, %v9607_v0  ;;  %7800 = vmatprep.mubr.msk.f32.mxu0 %vm279_vm4, %v1784_v48  ;;  %v9672_v36 = vld [vmem:[#allocation3 + $0x38] sm:$0xff]  ;;  %v9696_v46 = vld [vmem:[#allocation3 + $0x50] sm:$0xff] }
 0x1b8   : > { %v1778_v2 = vadd.f32 %v8969_v23, %v1776_v51  ;;  %v1779_v3 = vadd.f32 %v8969_v23, %v1777_v58  ;;  %7850 = vmatprep.mubr.msk.f32.mxu1 %vm279_vm4, %v2427_v49  ;;  %v9639_v23 = vld [vmem:[#allocation3 + $0x1a] sm:$0xff]  ;;  %v9698_v47 = vld [vmem:[#allocation3 + $0x52] sm:$0xff]  ;;  %v9714_v51 = vld [vmem:[#allocation3 + $0x62] sm:$0xff] }
 0x1b9   : > { %v9704_v48 = vld [vmem:[#allocation3 + $0x58] sm:$0xff]  ;;  %v9720_v58 = vld [vmem:[#allocation3 + $0x68] sm:$0xff] }
 0x1ba   : > { %v1780_v7 = vmax.f32 %v1778_v2, 0.0  ;;  %v1781_v8 = vmax.f32 %v1779_v3, 0.0  ;;  %7801 = vmatmul.mubr.msk.f32.vlgmr.msra.gmra.mrb[98].mxu0 %vm279_vm4, %v1785_v4  ;;  %v9706_v49 = vld [vmem:[#allocation3 + $0x5a] sm:$0xff]  ;;  %v9728_v2 = vld [vmem:[#allocation3 + $0x72] sm:$0xff]  ;;  %v9736_v4 = vld [vmem:[#allocation3 + $0x82] sm:$0xff] }
 0x1bb   : > { %7851 = vmatmul.mubr.msk.f32.vlgmr.msra.gmra.mrb[14].mxu1 %vm279_vm4, %v2428_v9  ;;  %7803 = vmatprep.mubr.msk.f32.mxu0 %vm279_vm4, %v9620_v13  ;;  %v9732_v3 = vld [vmem:[#allocation3 + $0x7a] sm:$0xff]  ;;  %v9752_v9 = vld [vmem:[#allocation3 + $0xa2] sm:$0xff]  ;;  %v9760_v5 = vld [vmem:[#allocation3 + $0xb2] sm:$0xff] }
 0x1bc   : > { %1782 = vst.msk [vmem:[#allocation3 + $0xe1] sm:$0xff] %vm279_vm4, %v1780_v7  ;;  %8477 = vmatpush3.bf16.msra.mxu1 %v9452_v33  ;;  %7853 = vmatprep.mubr.msk.f32.mxu1 %vm279_vm4, %v9633_v19  ;;  %v9647_v33 = vld [vmem:[#allocation3 + $0x20] sm:$0xff]  ;;  %v9744_v7 = vld [vmem:[#allocation3 + $0x92] sm:$0xff]  ;;  %10717 = vst [vmem:[#allocation11_spill] sm:$0xff] %v9752_v9 }
 0x1bd   : > { %1783 = vst.msk [vmem:[#allocation3 + $0xe9] sm:$0x3f] %vm1418_vm5, %v1781_v8  ;;  %8479 = vmatprep.subr.bf16.mxu1 %v8478_v6  ;;  %10715 = vst [vmem:[#allocation9_spill] sm:$0xff] %v9744_v7  ;;  %v9748_v8 = vld [vmem:[#allocation3 + $0x9a] sm:$0xff] }
 0x1be   : > { %7804 = vmatmul.mubr.msk.f32.gmra.mrb[100].mxu0 %vm279_vm4, %v9637_v21  ;;  %10716 = vst [vmem:[#allocation10_spill] sm:$0xff] %v9748_v8  ;;  %10719 = vst [vmem:[#allocation13_spill] sm:$0xff] %v9760_v5 }
 0x1bf   : > { %7854 = vmatmul.mubr.msk.f32.gmra.mrb[16].mxu1 %vm279_vm4, %v9639_v23  ;;  %7806 = vmatprep.mubr.msk.f32.mxu0 %vm279_vm4, %v9647_v33 }
 0x1c0   : > { %7856 = vmatprep.mubr.msk.f32.mxu1 %vm279_vm4, %v9649_v29  ;;  %8481 = vmatpush3.bf16.msra.mxu1 %v8478_v6  ;;  %v9740_v6 = vld [vmem:[#allocation3 + $0x8a] sm:$0xff] }
 0x1c1   : > { %8483 = vmatprep.subr.bf16.mxu1 %v9641_v26  ;;  %10714 = vst [vmem:[#allocation8_spill] sm:$0xff] %v9740_v6 }
 0x1c2   : > { %7807 = vmatmul.mubr.msk.f32.gmra.mrb[102].mxu0 %vm279_vm4, %v9655_v30 }
 0x1c3   : > { %7857 = vmatmul.mubr.msk.f32.gmra.mrb[18].mxu1 %vm279_vm4, %v9657_v31  ;;  %7809 = vmatprep.mubr.msk.f32.mxu0 %vm279_vm4, %v9664_v34 }
 0x1c4   : > { %7859 = vmatprep.mubr.msk.f32.mxu1 %vm279_vm4, %v9666_v35 }
 0x1c6   : > { %7810 = vmatmul.mubr.msk.f32.gmra.mrb[104].mxu0 %vm279_vm4, %v9672_v36 }
 0x1c7   : > { %7860 = vmatmul.mubr.msk.f32.gmra.mrb[20].mxu1 %vm279_vm4, %v9674_v37  ;;  %7812 = vmatprep.mubr.msk.f32.mxu0 %vm279_vm4, %v9680_v39 }
 0x1c8   : > { %7862 = vmatprep.mubr.msk.f32.mxu1 %vm279_vm4, %v9682_v41 }
 0x1ca   : > { %7813 = vmatmul.mubr.msk.f32.gmra.mrb[106].mxu0 %vm279_vm4, %v9688_v42 }
 0x1cb   : > { %7863 = vmatmul.mubr.msk.f32.gmra.mrb[22].mxu1 %vm279_vm4, %v9690_v45  ;;  %7815 = vmatprep.mubr.msk.f32.mxu0 %vm279_vm4, %v9696_v46 }
 0x1cc   : > { %7865 = vmatprep.mubr.msk.f32.mxu1 %vm279_vm4, %v9698_v47 }
 0x1ce   : > { %7816 = vmatmul.mubr.msk.f32.gmra.mrb[108].mxu0 %vm279_vm4, %v9704_v48 }
 0x1cf   : > { %7866 = vmatmul.mubr.msk.f32.gmra.mrb[24].mxu1 %vm279_vm4, %v9706_v49  ;;  %7818 = vmatprep.mubr.msk.f32.mxu0 %vm279_vm4, %v9712_v50 }
 0x1d0   : > { %7868 = vmatprep.mubr.msk.f32.mxu1 %vm279_vm4, %v9714_v51 }
 0x1d2   : > { %7819 = vmatmul.mubr.msk.f32.gmra.mrb[110].mxu0 %vm279_vm4, %v9720_v58 }
 0x1d3   : > { %7869 = vmatmul.mubr.msk.f32.gmra.mrb[26].mxu1 %vm279_vm4, %v9722_v1 }
 0x1d4   : > { %7871 = vmatprep.mubr.msk.f32.mxu1 %vm279_vm4, %v9728_v2 }
 0x1d7   : > { %7872 = vmatmul.mubr.msk.f32.gmra.mrb[0].mxu1 %vm279_vm4, %v9732_v3 }
 0x1d8   : > { %7874 = vmatprep.mubr.msk.f32.mxu1 %vm279_vm4, %v9736_v4 }
 0x1db   : > { %7875 = vmatmul.mubr.msk.f32.gmra.mrb[2].mxu1 %vm279_vm4, %v9740_v6  ;;  %v6791_v6 = vld [vmem:[%s10686_s3 + $0xa8] sm:$0xff] }
 0x1dc   : > { %7877 = vmatprep.mubr.msk.f32.mxu1 %vm279_vm4, %v9744_v7  ;;  %v9764_v7 = vld [vmem:[#allocation3 + $0xba] sm:$0xff] }
 0x1dd   : > { %10720 = vst [vmem:[#allocation14_spill] sm:$0xff] %v9764_v7 }
 0x1df   : > { %7878 = vmatmul.mubr.msk.f32.gmra.mrb[4].mxu1 %vm279_vm4, %v9748_v8  ;;  %v9768_v8 = vld [vmem:[#allocation3 + $0xc2] sm:$0xff] }
 0x1e0   : > { %7880 = vmatprep.mubr.msk.f32.mxu1 %vm279_vm4, %v9752_v9  ;;  %10721 = vst [vmem:[#allocation15_spill] sm:$0xff] %v9768_v8  ;;  %v9772_v9 = vld [vmem:[#allocation3 + $0xca] sm:$0xff] }
 0x1e1   : > { %10722 = vst [vmem:[#allocation16_spill] sm:$0xff] %v9772_v9 }
 0x1e3   : > { %7881 = vmatmul.mubr.msk.f32.gmra.mrb[6].mxu1 %vm279_vm4, %v9756_v18  ;;  %v9776_v18 = vld [vmem:[#allocation3 + $0xd2] sm:$0xff] }
 0x1e4   : > { %7883 = vmatprep.mubr.msk.f32.mxu1 %vm279_vm4, %v9760_v5  ;;  %10723 = vst [vmem:[#allocation17_spill] sm:$0xff] %v9776_v18  ;;  %v9780_v5 = vld [vmem:[#allocation3 + $0xda] sm:$0xff] }
 0x1e5   : > { %10724 = vst [vmem:[#allocation18_spill] sm:$0xff] %v9780_v5 }
 0x1e7   : > { %7884 = vmatmul.mubr.msk.f32.gmra.mrb[8].mxu1 %vm279_vm4, %v9764_v7  ;;  %v6760_v7 = vld [vmem:[%s10686_s3 + $0x90] sm:$0xff] }
 0x1e8   : > { %7886 = vmatprep.mubr.msk.f32.mxu1 %vm279_vm4, %v9768_v8  ;;  %v6761_v8 = vld [vmem:[%s10686_s3 + $0x98] sm:$0xff] }
 0x1eb   : > { %7887 = vmatmul.mubr.msk.f32.gmra.mrb[10].mxu1 %vm279_vm4, %v9772_v9  ;;  %v8486_v9 = vpack.c.bf16 %v6761_v8, %v6760_v7  ;;  %v9875_v8 = vld [vmem:[#allocation3 + $0x29] sm:$0xff] }
 0x1ec   : > { %7889 = vmatprep.mubr.msk.f32.mxu1 %vm279_vm4, %v9776_v18  ;;  %v6790_v18 = vld [vmem:[%s10686_s3 + $0xa0] sm:$0xff] }
 0x1ef   : > { %7890 = vmatmul.mubr.msk.f32.gmra.mrb[12].mxu1 %vm279_vm4, %v9780_v5  ;;  %v8490_v5 = vpack.c.bf16 %v6791_v6, %v6790_v18  ;;  %v9871_v6 = vld [vmem:[#allocation3 + $0x21] sm:$0xff]  ;;  %v9883_v18 = vld [vmem:[#allocation3 + $0x39] sm:$0xff] }
 0x1f0   : > { %7900 = vmatprep.mubr.msk.f32.mxu1 %vm279_vm4, %v9620_v13  ;;  %v3128_v13 = vld [vmem:[#allocation3 + $0x19] sm:$0xff] }
 0x1f3   : > { %7901 = vmatmul.mubr.msk.f32.vlgmr.msra.gmra.mrb[14].mxu1 %vm279_vm4, %v9637_v21  ;;  %v6822_v21 = vld [vmem:[%s10686_s3 + $0xc0] sm:$0xff] }
 0x1f4   : > { %8485 = vmatpush3.bf16.msra.mxu1 %v9641_v26  ;;  %7903 = vmatprep.mubr.msk.f32.mxu1 %vm279_vm4, %v9647_v33  ;;  %v6823_v26 = vld [vmem:[%s10686_s3 + $0xc8] sm:$0xff] }
 0x1f5   : > { %8487 = vmatprep.subr.bf16.mxu1 %v8486_v9  ;;  %v8498_v7 = vpack.c.bf16 %v6823_v26, %v6822_v21 }
 0x1f7   : > { %7904 = vmatmul.mubr.msk.f32.gmra.mrb[16].mxu1 %vm279_vm4, %v9655_v30 }
 0x1f8   : > { %7906 = vmatprep.mubr.msk.f32.mxu1 %vm279_vm4, %v9664_v34  ;;  %8489 = vmatpush3.bf16.msra.mxu1 %v8486_v9  ;;  %v9879_v9 = vld [vmem:[#allocation3 + $0x31] sm:$0xff] }
 0x1f9   : > { %8491 = vmatprep.subr.bf16.mxu1 %v8490_v5 }
 0x1fb   : > { %7907 = vmatmul.mubr.msk.f32.gmra.mrb[18].mxu1 %vm279_vm4, %v9672_v36 }
 0x1fc   : > { %7909 = vmatprep.mubr.msk.f32.mxu1 %vm279_vm4, %v9680_v39 }
 0x1ff   : > { %7910 = vmatmul.mubr.msk.f32.gmra.mrb[20].mxu1 %vm279_vm4, %v9688_v42 }
 0x200   : > { %7912 = vmatprep.mubr.msk.f32.mxu1 %vm279_vm4, %v9696_v46 }
 0x203   : > { %7913 = vmatmul.mubr.msk.f32.gmra.mrb[22].mxu1 %vm279_vm4, %v9704_v48 }
 0x204   : > { %7915 = vmatprep.mubr.msk.f32.mxu1 %vm279_vm4, %v9712_v50 }
 0x207   : > { %7916 = vmatmul.mubr.msk.f32.gmra.mrb[24].mxu1 %vm279_vm4, %v9720_v58 }
 0x208   : > { %7918 = vmatprep.mubr.msk.f32.mxu1 %vm279_vm4, %v9428_v17  ;;  %v9849_v17 = vld [vmem:[#allocation3 + $0xe0] sm:$0xff] }
 0x20b   : > { %7919 = vmatmul.mubr.msk.f32.gmra.mrb[26].mxu1 %vm279_vm4, %v9438_v24  ;;  %v9853_v24 = vld [vmem:[#allocation3 + $0xe8] sm:$0xff] }
 0x20c   : > { %7921 = vmatprep.mubr.msk.f32.mxu1 %vm279_vm4, %v9464_v55  ;;  %v6792_v55 = vld [vmem:[%s10686_s3 + $0xb0] sm:$0xff] }
 0x20f   : > { %7922 = vmatmul.mubr.msk.f32.gmra.mrb[0].mxu1 %vm279_vm4, %v9473_v57  ;;  %v6793_v57 = vld [vmem:[%s10686_s3 + $0xb8] sm:$0xff] }
 0x210   : > { %7924 = vmatprep.mubr.msk.f32.mxu1 %vm279_vm4, %v9492_v20  ;;  %v3127_v20 = vld [vmem:[#allocation3 + $0x11] sm:$0xff] }
 0x213   : > { %7925 = vmatmul.mubr.msk.f32.gmra.mrb[2].mxu1 %vm279_vm4, %v9502_v28  ;;  %v8494_v28 = vpack.c.bf16 %v6793_v57, %v6792_v55  ;;  %v9893_v57 = vld [vmem:[#allocation3 + $0x49] sm:$0xff] }
 0x214   : > { %7927 = vmatprep.mubr.msk.f32.mxu1 %vm279_vm4, %v9518_v61 }
 0x217   : > { %7928 = vmatmul.mubr.msk.f32.gmra.mrb[4].mxu1 %vm279_vm4, %v9527_v63 }
 0x218   : > { %7930 = vmatprep.mubr.msk.f32.mxu1 %vm279_vm4, %v9546_v32 }
 0x21b   : > { %7931 = vmatmul.mubr.msk.f32.gmra.mrb[6].mxu1 %vm279_vm4, %v9556_v38 }
 0x21c   : > { %7933 = vmatprep.mubr.msk.f32.mxu1 %vm279_vm4, %v9572_v11 }
 0x21f   : > { %7934 = vmatmul.mubr.msk.f32.gmra.mrb[8].mxu1 %vm279_vm4, %v9581_v16 }
 0x220   : > { %7936 = vmatprep.mubr.msk.f32.mxu1 %vm279_vm4, %v9598_v43 }
 0x223   : > { %7937 = vmatmul.mubr.msk.f32.gmra.mrb[10].mxu1 %vm279_vm4, %v9607_v0 }
 0x224   : > { %7939 = vmatprep.mubr.msk.f32.mxu1 %vm279_vm4, %v9849_v17 }
 0x227   : > { %7940 = vmatmul.mubr.msk.f32.gmra.mrb[12].mxu1 %vm279_vm4, %v9853_v24 }
 0x228   : > { %7950 = vmatprep.mubr.msk.f32.mxu1 %vm279_vm4, %v3127_v20 }
 0x22b   : > { %7951 = vmatmul.mubr.msk.f32.vlgmr.msra.gmra.mrb[14].mxu1 %vm279_vm4, %v3128_v13  ;;  %v9903_v13 = vld [vmem:[#allocation3 + $0x59] sm:$0xff] }
 0x22c   : > { %8493 = vmatpush3.bf16.msra.mxu1 %v8490_v5  ;;  %7953 = vmatprep.mubr.msk.f32.mxu1 %vm279_vm4, %v9871_v6  ;;  %v9887_v5 = vld [vmem:[#allocation3 + $0x41] sm:$0xff] }
 0x22d   : > { %8495 = vmatprep.subr.bf16.mxu1 %v8494_v28 }
 0x22f   : > { %7954 = vmatmul.mubr.msk.f32.gmra.mrb[16].mxu1 %vm279_vm4, %v9875_v8 }
 0x230   : > { %7956 = vmatprep.mubr.msk.f32.mxu1 %vm279_vm4, %v9879_v9  ;;  %8497 = vmatpush3.bf16.msra.mxu1 %v8494_v28  ;;  %v9899_v28 = vld [vmem:[#allocation3 + $0x51] sm:$0xff] }
 0x231   : > { %8499 = vmatprep.subr.bf16.mxu1 %v8498_v7 }
 0x233   : > { %7957 = vmatmul.mubr.msk.f32.gmra.mrb[18].mxu1 %vm279_vm4, %v9883_v18 }
 0x234   : > { %7959 = vmatprep.mubr.msk.f32.mxu1 %vm279_vm4, %v9887_v5 }
 0x235   : > { %v9891_v55 = vpop.f32.mrb[112].mxu0 }
 0x236   : > { %10725 = vst [vmem:[#allocation19_spill] sm:$0xff] %v9891_v55  ;;  %v9895_v20 = vpop.f32.mrb[113].mxu0 }
 0x237   : > { %10726 = vst [vmem:[#allocation20_spill] sm:$0xff] %v9895_v20  ;;  %7960 = vmatmul.mubr.msk.f32.gmra.mrb[20].mxu1 %vm279_vm4, %v9893_v57  ;;  %v10750_v20 = vld [vmem:[#allocation17_spill] sm:$0xff] }
 0x238   : > { %7962 = vmatprep.mubr.msk.f32.mxu1 %vm279_vm4, %v9899_v28 }
 0x23b   : > { %7963 = vmatmul.mubr.msk.f32.gmra.mrb[22].mxu1 %vm279_vm4, %v9903_v13 }
 0x23c   : > { %7965 = vmatprep.mubr.msk.f32.mxu1 %vm279_vm4, %v9400_v53 }
 0x23f   : > { %7966 = vmatmul.mubr.msk.f32.gmra.mrb[24].mxu1 %vm279_vm4, %v9402_v54 }
 0x240   : > { %7968 = vmatprep.mubr.msk.f32.mxu1 %vm279_vm4, %v9424_v12  ;;  %v9947_v12 = vld [vmem:[#allocation3 + $0xe1] sm:$0xff] }
 0x243   : > { %7969 = vmatmul.mubr.msk.f32.gmra.mrb[26].mxu1 %vm279_vm4, %v9433_v22  ;;  %v9915_v21 = vpop.f32.mrb[114].mxu0  ;;  %v9951_v22 = vld [vmem:[#allocation3 + $0xe9] sm:$0xff] }
 0x244   : > { %10727 = vst [vmem:[#allocation21_spill] sm:$0xff] %v9915_v21  ;;  %7971 = vmatprep.mubr.msk.f32.mxu1 %vm279_vm4, %v9462_v52  ;;  %v9919_v26 = vpop.f32.mrb[115].mxu0  ;;  %v6824_v52 = vld [vmem:[%s10686_s3 + $0xd0] sm:$0xff] }
 0x245   : > { %10728 = vst [vmem:[#allocation22_spill] sm:$0xff] %v9919_v26  ;;  %v10748_v26 = vld [vmem:[#allocation16_spill] sm:$0xff] }
 0x247   : > { %7972 = vmatmul.mubr.msk.f32.gmra.mrb[0].mxu1 %vm279_vm4, %v9466_v56  ;;  %v6825_v56 = vld [vmem:[%s10686_s3 + $0xd8] sm:$0xff] }
 0x248   : > { %7974 = vmatprep.mubr.msk.f32.mxu1 %vm279_vm4, %v9488_v14 }
 0x24b   : > { %7975 = vmatmul.mubr.msk.f32.gmra.mrb[2].mxu1 %vm279_vm4, %v9497_v27 }
 0x24c   : > { %7977 = vmatprep.mubr.msk.f32.mxu1 %vm279_vm4, %v9516_v60  ;;  %v8502_v60 = vpack.c.bf16 %v6825_v56, %v6824_v52 }
 0x24f   : > { %7978 = vmatmul.mubr.msk.f32.gmra.mrb[4].mxu1 %vm279_vm4, %v9520_v62  ;;  %v6854_v62 = vld [vmem:[%s10686_s3 + $0xe0] sm:$0xff] }
 0x250   : > { %7980 = vmatprep.mubr.msk.f32.mxu1 %vm279_vm4, %v9542_v25  ;;  %v6855_v25 = vld [vmem:[%s10686_s3 + $0xe8] sm:$0xff] }
 0x251   : > { %v9933_v53 = vpop.f32.mrb[116].mxu0 }
 0x252   : > { %10729 = vst [vmem:[#allocation23_spill] sm:$0xff] %v9933_v53  ;;  %v9935_v54 = vpop.f32.mrb[117].mxu0 }
 0x253   : > { %10730 = vst [vmem:[#allocation24_spill] sm:$0xff] %v9935_v54  ;;  %7981 = vmatmul.mubr.msk.f32.gmra.mrb[6].mxu1 %vm279_vm4, %v9551_v44  ;;  %v10746_v54 = vld [vmem:[#allocation15_spill] sm:$0xff] }
 0x254   : > { %7983 = vmatprep.mubr.msk.f32.mxu1 %vm279_vm4, %v9570_v10 }
 0x257   : > { %7984 = vmatmul.mubr.msk.f32.gmra.mrb[8].mxu1 %vm279_vm4, %v9574_v15 }
 0x258   : > { %7986 = vmatprep.mubr.msk.f32.mxu1 %vm279_vm4, %v9594_v40 }
 0x25b   : > { %7987 = vmatmul.mubr.msk.f32.gmra.mrb[10].mxu1 %vm279_vm4, %v9605_v59 }
 0x25c   : > { %7989 = vmatprep.mubr.msk.f32.mxu1 %vm279_vm4, %v9947_v12 }
 0x25f   : > { %7990 = vmatmul.mubr.msk.f32.gmra.mrb[12].mxu1 %vm279_vm4, %v9951_v22  ;;  %v9961_v14 = vpop.f32.mrb[118].mxu0 }
 0x260   : > { %10731 = vst [vmem:[#allocation25_spill] sm:$0xff] %v9961_v14  ;;  %8000 = vmatprep.mubr.msk.f32.mxu1 %vm279_vm4, %v9633_v19  ;;  %v9965_v27 = vpop.f32.mrb[119].mxu0  ;;  %v8506_v19 = vpack.c.bf16 %v6855_v25, %v6854_v62  ;;  %v10738_v62 = vld [vmem:[#allocation9_spill] sm:$0xff]  ;;  %v10739_v25 = vld [vmem:[#allocation10_spill] sm:$0xff] }
 0x261   : > { %10732 = vst [vmem:[#allocation26_spill] sm:$0xff] %v9965_v27  ;;  %v10745_v14 = vld [vmem:[#allocation14_spill] sm:$0xff] }
 0x263   : > { %8001 = vmatmul.mubr.msk.f32.vlgmr.msra.gmra.mrb[14].mxu1 %vm279_vm4, %v9639_v23 }
 0x264   : > { %8501 = vmatpush3.bf16.msra.mxu1 %v8498_v7  ;;  %8003 = vmatprep.mubr.msk.f32.mxu1 %vm279_vm4, %v9649_v29 }
 0x265   : > { %8503 = vmatprep.subr.bf16.mxu1 %v8502_v60 }
 0x267   : > { %8004 = vmatmul.mubr.msk.f32.gmra.mrb[16].mxu1 %vm279_vm4, %v9657_v31 }
 0x268   : > { %8006 = vmatprep.mubr.msk.f32.mxu1 %vm279_vm4, %v9666_v35  ;;  %8505 = vmatpush3.bf16.msra.mxu1 %v8502_v60  ;;  %v10737_v60 = vld [vmem:[#allocation8_spill] sm:$0xff] }
 0x269   : > { %8507 = vmatprep.subr.bf16.mxu1 %v8506_v19 }
 0x26b   : > { %8007 = vmatmul.mubr.msk.f32.gmra.mrb[18].mxu1 %vm279_vm4, %v9674_v37 }
 0x26c   : > { %8009 = vmatprep.mubr.msk.f32.mxu1 %vm279_vm4, %v9682_v41 }
 0x26d   : > { %v9985_v23 = vpop.f32.mrb[120].mxu0 }
 0x26e   : > { %10733 = vst [vmem:[#allocation27_spill] sm:$0xff] %v9985_v23  ;;  %v9987_v7 = vpop.f32.mrb[121].mxu0  ;;  %v10741_v23 = vld [vmem:[#allocation12_spill] sm:$0xff] }
 0x26f   : > { %10734 = vst [vmem:[#allocation28_spill] sm:$0xff] %v9987_v7  ;;  %8010 = vmatmul.mubr.msk.f32.gmra.mrb[20].mxu1 %vm279_vm4, %v9690_v45  ;;  %v10740_v7 = vld [vmem:[#allocation11_spill] sm:$0xff] }
 0x270   : > { %8012 = vmatprep.mubr.msk.f32.mxu1 %vm279_vm4, %v9698_v47 }
 0x273   : > { %8013 = vmatmul.mubr.msk.f32.gmra.mrb[22].mxu1 %vm279_vm4, %v9706_v49 }
 0x274   : > { %8015 = vmatprep.mubr.msk.f32.mxu1 %vm279_vm4, %v9714_v51 }
 0x277   : > { %8016 = vmatmul.mubr.msk.f32.gmra.mrb[24].mxu1 %vm279_vm4, %v9722_v1 }
 0x278   : > { %8018 = vmatprep.mubr.msk.f32.mxu1 %vm279_vm4, %v9728_v2 }
 0x27b   : > { %8019 = vmatmul.mubr.msk.f32.gmra.mrb[26].mxu1 %vm279_vm4, %v9732_v3  ;;  %v10003_v52 = vpop.f32.mrb[122].mxu0 }
 0x27c   : > { %10735 = vst [vmem:[#allocation29_spill] sm:$0xff] %v10003_v52  ;;  %8021 = vmatprep.mubr.msk.f32.mxu1 %vm279_vm4, %v9736_v4  ;;  %v10007_v56 = vpop.f32.mrb[123].mxu0  ;;  %v10742_v52 = vld [vmem:[#allocation13_spill] sm:$0xff] }
 0x27d   : > { %10736 = vst [vmem:[#allocation30_spill] sm:$0xff] %v10007_v56 }
 0x27f   : > { %8022 = vmatmul.mubr.msk.f32.gmra.mrb[0].mxu1 %vm279_vm4, %v10737_v60 }
 0x280   : > { %8024 = vmatprep.mubr.msk.f32.mxu1 %vm279_vm4, %v10738_v62 }
 0x283   : > { %8025 = vmatmul.mubr.msk.f32.gmra.mrb[2].mxu1 %vm279_vm4, %v10739_v25 }
 0x284   : > { %8027 = vmatprep.mubr.msk.f32.mxu1 %vm279_vm4, %v10740_v7 }
 0x287   : > { %8028 = vmatmul.mubr.msk.f32.gmra.mrb[4].mxu1 %vm279_vm4, %v10741_v23 }
 0x288   : > { %8030 = vmatprep.mubr.msk.f32.mxu1 %vm279_vm4, %v10742_v52 }
 0x289   : > { %v10021_v27 = vpop.f32.mrb[124].mxu0 }
 0x28a   : > { %10743 = vst [vmem:[#allocation8_spill] sm:$0xff] %v10021_v27  ;;  %v10023_v56 = vpop.f32.mrb[125].mxu0 }
 0x28b   : > { %10744 = vst [vmem:[#allocation9_spill] sm:$0xff] %v10023_v56  ;;  %8031 = vmatmul.mubr.msk.f32.gmra.mrb[6].mxu1 %vm279_vm4, %v10745_v14  ;;  %v10753_v56 = vld [vmem:[#allocation18_spill] sm:$0xff]  ;;  %v10043_v14 = vld [vmem:[#allocation3 + $0xe2] sm:$0xff] }
 0x28c   : > { %8033 = vmatprep.mubr.msk.f32.mxu1 %vm279_vm4, %v10746_v54  ;;  %10754 = vst [vmem:[#allocation31_spill] sm:$0xff] %v10043_v14 }
 0x28d   : > { %v10029_v53 = vpop.f32.mrb[98].mxu0 }
 0x28e   : > { %10747 = vst [vmem:[#allocation10_spill] sm:$0xff] %v10029_v53  ;;  %v10033_v21 = vpop.f32.mrb[99].mxu0 }
 0x28f   : > { %8034 = vmatmul.mubr.msk.f32.gmra.mrb[8].mxu1 %vm279_vm4, %v10748_v26  ;;  %10749 = vst [vmem:[#allocation11_spill] sm:$0xff] %v10033_v21  ;;  %v10049_v26 = vld [vmem:[#allocation3 + $0xea] sm:$0xff]  ;;  %v6856_v21 = vld [vmem:[%s10686_s3 + $0xf0] sm:$0xff] }
 0x290   : > { %8036 = vmatprep.mubr.msk.f32.mxu1 %vm279_vm4, %v10750_v20  ;;  %v6887_v20 = vld [vmem:[%s10686_s3 + $0x108] sm:$0xff] }
 0x291   : > { %v10037_v55 = vpop.f32.mrb[100].mxu0 }
 0x292   : > { %10751 = vst [vmem:[#allocation12_spill] sm:$0xff] %v10037_v55  ;;  %v10039_v27 = vpop.f32.mrb[101].mxu0 }
 0x293   : > { %10752 = vst [vmem:[#allocation13_spill] sm:$0xff] %v10039_v27  ;;  %8037 = vmatmul.mubr.msk.f32.gmra.mrb[10].mxu1 %vm279_vm4, %v10753_v56  ;;  %v6857_v27 = vld [vmem:[%s10686_s3 + $0xf8] sm:$0xff]  ;;  %v6886_v56 = vld [vmem:[%s10686_s3 + $0x100] sm:$0xff] }
 0x294   : > { %8039 = vmatprep.mubr.msk.f32.mxu1 %vm279_vm4, %v10043_v14  ;;  %v8510_v14 = vpack.c.bf16 %v6857_v27, %v6856_v21 }
 0x295   : > { %v10047_v53 = vpop.f32.mrb[102].mxu0 }
 0x296   : > { %10755 = vst [vmem:[#allocation32_spill] sm:$0xff] %v10047_v53  ;;  %v10057_v55 = vpop.f32.mrb[103].mxu0 }
 0x297   : > { %8040 = vmatmul.mubr.msk.f32.gmra.mrb[12].mxu1 %vm279_vm4, %v10049_v26 }
 0x298   : > { %8050 = vmatprep.mubr.msk.f32.mxu1 %vm279_vm4, %v9647_v33  ;;  %v8514_v33 = vpack.c.bf16 %v6887_v20, %v6886_v56 }
 0x299   : > { %v10063_v53 = vpop.f32.mrb[104].mxu0 }
 0x29a   : > { %v10071_v54 = vpop.f32.mrb[105].mxu0 }
 0x29b   : > { %10756 = vst [vmem:[#allocation33_spill] sm:$0xff] %v10071_v54  ;;  %8051 = vmatmul.mubr.msk.f32.vlgmr.msra.gmra.mrb[14].mxu1 %vm279_vm4, %v9655_v30 }
 0x29c   : > { %8509 = vmatpush3.bf16.msra.mxu1 %v8506_v19  ;;  %8053 = vmatprep.mubr.msk.f32.mxu1 %vm279_vm4, %v9664_v34  ;;  %v5019_v19 = vld [vmem:[%s10688_s5 + $0x8] sm:$0xff] }
 0x29d   : > { %8511 = vmatprep.subr.bf16.mxu1 %v8510_v14  ;;  %v10077_v21 = vpop.f32.mrb[106].mxu0 }
 0x29e   : > { %v10079_v27 = vpop.f32.mrb[107].mxu0 }
 0x29f   : > { %8054 = vmatmul.mubr.msk.f32.gmra.mrb[16].mxu1 %vm279_vm4, %v9672_v36  ;;  %v3837_v36 = vld [vmem:[#allocation3 + $0x70] sm:$0xff] }
 0x2a0   : > { %8056 = vmatprep.mubr.msk.f32.mxu1 %vm279_vm4, %v9680_v39  ;;  %8513 = vmatpush3.bf16.msra.mxu1 %v8510_v14  ;;  %v3838_v39 = vld [vmem:[#allocation3 + $0x78] sm:$0xff]  ;;  %v3841_v14 = vld [vmem:[#allocation3 + $0x90] sm:$0xff] }
 0x2a1   : > { %8515 = vmatprep.subr.bf16.mxu1 %v8514_v33  ;;  %v10085_v54 = vpop.f32.mrb[108].mxu0 }
 0x2a2   : > { %v10087_v30 = vpop.f32.mrb[109].mxu0 }
 0x2a3   : > { %8057 = vmatmul.mubr.msk.f32.gmra.mrb[18].mxu1 %vm279_vm4, %v9688_v42  ;;  %v3839_v42 = vld [vmem:[#allocation3 + $0x80] sm:$0xff] }
 0x2a4   : > { %8059 = vmatprep.mubr.msk.f32.mxu1 %vm279_vm4, %v9696_v46  ;;  %v3840_v46 = vld [vmem:[#allocation3 + $0x88] sm:$0xff] }
 0x2a5   : > { %v10093_v34 = vpop.f32.mrb[110].mxu0 }
 0x2a6   : > { %v10095_v20 = vpop.f32.mrb[111].mxu0 }
 0x2a7   : > { %8060 = vmatmul.mubr.msk.f32.gmra.mrb[20].mxu1 %vm279_vm4, %v9704_v48  ;;  %v3842_v48 = vld [vmem:[#allocation3 + $0x98] sm:$0xff] }
 0x2a8   : > { %8062 = vmatprep.mubr.msk.f32.mxu1 %vm279_vm4, %v9712_v50  ;;  %v8970_v50 = vld [vmem:[#allocation7] sm:$0xff] }
 0x2a9   : > { %314 = vst.msk [vmem:[#allocation5] sm:$0xff] %vm313_vm6, %v8970_v50  ;;  %315 = vst.msk [vmem:[#allocation5 + $0x8] sm:$0xff] %vm313_vm6, %v8970_v50 }
 0x2aa   : > { %316 = vst.msk [vmem:[#allocation5 + $0x10] sm:$0xff] %vm313_vm6, %v8970_v50  ;;  %317 = vst.msk [vmem:[#allocation5 + $0x18] sm:$0xff] %vm313_vm6, %v8970_v50 }
 0x2ab   : > { %8063 = vmatmul.mubr.msk.f32.gmra.mrb[22].mxu1 %vm279_vm4, %v9720_v58  ;;  %318 = vst.msk [vmem:[#allocation5 + $0x20] sm:$0xff] %vm313_vm6, %v8970_v50  ;;  %319 = vst.msk [vmem:[#allocation5 + $0x28] sm:$0xff] %vm313_vm6, %v8970_v50  ;;  %v4188_v58 = vld [vmem:[#allocation3 + $0x79] sm:$0xff] }
 0x2ac   : > { %8065 = vmatprep.mubr.msk.f32.mxu1 %vm279_vm4, %v3837_v36  ;;  %320 = vst.msk [vmem:[#allocation5 + $0x30] sm:$0xff] %vm313_vm6, %v8970_v50  ;;  %321 = vst.msk [vmem:[#allocation5 + $0x38] sm:$0xff] %vm313_vm6, %v8970_v50  ;;  %v10765_v36 = vld [vmem:[#allocation12_spill] sm:$0xff] }
 0x2ad   : > { %322 = vst.msk [vmem:[#allocation5 + $0x40] sm:$0xff] %vm313_vm6, %v8970_v50  ;;  %323 = vst.msk [vmem:[#allocation5 + $0x48] sm:$0xff] %vm313_vm6, %v8970_v50 }
 0x2ae   : > { %324 = vst.msk [vmem:[#allocation5 + $0x50] sm:$0xff] %vm313_vm6, %v8970_v50  ;;  %v10767_v50 = vld [vmem:[#allocation32_spill] sm:$0xff] }
 0x2af   : > { %8066 = vmatmul.mubr.msk.f32.gmra.mrb[24].mxu1 %vm279_vm4, %v3838_v39 }
 0x2b0   : > { %8068 = vmatprep.mubr.msk.f32.mxu1 %vm279_vm4, %v3839_v42 }
 0x2b3   : > { %8069 = vmatmul.mubr.msk.f32.gmra.mrb[26].mxu1 %vm279_vm4, %v3840_v46  ;;  %v10766_v46 = vld [vmem:[#allocation13_spill] sm:$0xff] }
 0x2b4   : > { %8071 = vmatprep.mubr.msk.f32.mxu1 %vm279_vm4, %v3841_v14 }
 0x2b7   : > { %8072 = vmatmul.mubr.msk.f32.gmra.mrb[0].mxu1 %vm279_vm4, %v3842_v48 }
 0x2b8   : > { %8074 = vmatprep.mubr.msk.f32.mxu1 %vm279_vm4, %v9518_v61  ;;  %v3853_v61 = vld [vmem:[#allocation3 + $0xf0] sm:$0xff] }
 0x2bb   : > { %8075 = vmatmul.mubr.msk.f32.gmra.mrb[2].mxu1 %vm279_vm4, %v9527_v63  ;;  %v3854_v63 = vld [vmem:[#allocation3 + $0xf8] sm:$0xff] }
 0x2bc   : > { %8077 = vmatprep.mubr.msk.f32.mxu1 %vm279_vm4, %v9546_v32  ;;  %v6888_v32 = vld [vmem:[%s10686_s3 + $0x110] sm:$0xff] }
 0x2bf   : > { %8078 = vmatmul.mubr.msk.f32.gmra.mrb[4].mxu1 %vm279_vm4, %v9556_v38  ;;  %v6889_v38 = vld [vmem:[%s10686_s3 + $0x118] sm:$0xff] }
 0x2c0   : > { %8080 = vmatprep.mubr.msk.f32.mxu1 %vm279_vm4, %v9572_v11  ;;  %v8518_v11 = vpack.c.bf16 %v6889_v38, %v6888_v32 }
 0x2c3   : > { %8081 = vmatmul.mubr.msk.f32.gmra.mrb[6].mxu1 %vm279_vm4, %v9581_v16  ;;  %v4185_v16 = vld [vmem:[#allocation3 + $0x61] sm:$0xff] }
 0x2c4   : > { %8083 = vmatprep.mubr.msk.f32.mxu1 %vm279_vm4, %v9598_v43  ;;  %v4186_v43 = vld [vmem:[#allocation3 + $0x69] sm:$0xff] }
 0x2c7   : > { %8084 = vmatmul.mubr.msk.f32.gmra.mrb[8].mxu1 %vm279_vm4, %v9607_v0  ;;  %v4187_v0 = vld [vmem:[#allocation3 + $0x71] sm:$0xff] }
 0x2c8   : > { %8086 = vmatprep.mubr.msk.f32.mxu1 %vm279_vm4, %v9849_v17  ;;  %v4189_v17 = vld [vmem:[#allocation3 + $0x81] sm:$0xff] }
 0x2cb   : > { %8087 = vmatmul.mubr.msk.f32.gmra.mrb[10].mxu1 %vm279_vm4, %v9853_v24  ;;  %v4190_v24 = vld [vmem:[#allocation3 + $0x89] sm:$0xff] }
 0x2cc   : > { %8089 = vmatprep.mubr.msk.f32.mxu1 %vm279_vm4, %v3853_v61 }
 0x2cf   : > { %8090 = vmatmul.mubr.msk.f32.gmra.mrb[12].mxu1 %vm279_vm4, %v3854_v63 }
 0x2d0   : > { %8100 = vmatprep.mubr.msk.f32.mxu1 %vm279_vm4, %v9871_v6  ;;  %v4191_v6 = vld [vmem:[#allocation3 + $0x91] sm:$0xff] }
 0x2d3   : > { %8101 = vmatmul.mubr.msk.f32.vlgmr.msra.gmra.mrb[14].mxu1 %vm279_vm4, %v9875_v8  ;;  %v4192_v8 = vld [vmem:[#allocation3 + $0x99] sm:$0xff] }
 0x2d4   : > { %8517 = vmatpush3.bf16.msra.mxu1 %v8514_v33  ;;  %8103 = vmatprep.mubr.msk.f32.mxu1 %vm279_vm4, %v9879_v9  ;;  %v4193_v9 = vld [vmem:[#allocation3 + $0xa1] sm:$0xff] }
 0x2d5   : > { %8519 = vmatprep.subr.bf16.mxu1 %v8518_v11 }
 0x2d7   : > { %8104 = vmatmul.mubr.msk.f32.gmra.mrb[16].mxu1 %vm279_vm4, %v9883_v18  ;;  %v4194_v18 = vld [vmem:[#allocation3 + $0xa9] sm:$0xff] }
 0x2d8   : > { %8106 = vmatprep.mubr.msk.f32.mxu1 %vm279_vm4, %v9887_v5  ;;  %8521 = vmatpush3.bf16.msra.mxu1 %v8518_v11  ;;  %v4195_v5 = vld [vmem:[#allocation3 + $0xb1] sm:$0xff] }
 0x2db   : > { %8107 = vmatmul.mubr.msk.f32.gmra.mrb[18].mxu1 %vm279_vm4, %v9893_v57  ;;  %v4203_v57 = vld [vmem:[#allocation3 + $0xf1] sm:$0xff] }
 0x2dc   : > { %8109 = vmatprep.mubr.msk.f32.mxu1 %vm279_vm4, %v9899_v28  ;;  %v6925_v28 = vld [vmem:[%s10688_s5 + $0x70] sm:$0xff] }
 0x2df   : > { %8110 = vmatmul.mubr.msk.f32.gmra.mrb[20].mxu1 %vm279_vm4, %v9903_v13  ;;  %v6926_v13 = vld [vmem:[%s10688_s5 + $0x78] sm:$0xff] }
 0x2e0   : > { %8112 = vmatprep.mubr.msk.f32.mxu1 %vm279_vm4, %v4185_v16 }
 0x2e3   : > { %8113 = vmatmul.mubr.msk.f32.gmra.mrb[22].mxu1 %vm279_vm4, %v4186_v43 }
 0x2e4   : > { %8115 = vmatprep.mubr.msk.f32.mxu1 %vm279_vm4, %v4187_v0 }
 0x2e7   : > { %8116 = vmatmul.mubr.msk.f32.gmra.mrb[24].mxu1 %vm279_vm4, %v4188_v58  ;;  %v10768_v58 = vld [vmem:[#allocation33_spill] sm:$0xff] }
 0x2e8   : > { %8118 = vmatprep.mubr.msk.f32.mxu1 %vm279_vm4, %v4189_v17 }
 0x2eb   : > { %8119 = vmatmul.mubr.msk.f32.gmra.mrb[26].mxu1 %vm279_vm4, %v4190_v24 }
 0x2ec   : > { %8121 = vmatprep.mubr.msk.f32.mxu1 %vm279_vm4, %v4191_v6 }
 0x2ef   : > { %8122 = vmatmul.mubr.msk.f32.gmra.mrb[0].mxu1 %vm279_vm4, %v4192_v8 }
 0x2f0   : > { %8124 = vmatprep.mubr.msk.f32.mxu1 %vm279_vm4, %v4193_v9 }
 0x2f3   : > { %8125 = vmatmul.mubr.msk.f32.gmra.mrb[2].mxu1 %vm279_vm4, %v4194_v18  ;;  %v10298_v18 = vld [vmem:[%s10687_s4] ss:$0 sm:$0xff] }
 0x2f4   : > { %8127 = vmatprep.mubr.msk.f32.mxu1 %vm279_vm4, %v4195_v5 }
 0x2f7   : > { %8128 = vmatmul.mubr.msk.f32.gmra.mrb[4].mxu1 %vm279_vm4, %v9551_v44  ;;  %v4204_v44 = vld [vmem:[#allocation3 + $0xf9] sm:$0xff] }
 0x2f8   : > { %8130 = vmatprep.mubr.msk.f32.mxu1 %vm279_vm4, %v9570_v10  ;;  %v10757_v10 = vld [vmem:[#allocation14_spill] sm:$0xff] }
 0x2fb   : > { %8131 = vmatmul.mubr.msk.f32.gmra.mrb[6].mxu1 %vm279_vm4, %v9574_v15  ;;  %v10758_v15 = vld [vmem:[#allocation15_spill] sm:$0xff] }
 0x2fc   : > { %8133 = vmatprep.mubr.msk.f32.mxu1 %vm279_vm4, %v9594_v40  ;;  %v10759_v40 = vld [vmem:[#allocation16_spill] sm:$0xff] }
 0x2ff   : > { %8134 = vmatmul.mubr.msk.f32.gmra.mrb[8].mxu1 %vm279_vm4, %v9605_v59  ;;  %v10760_v59 = vld [vmem:[#allocation17_spill] sm:$0xff] }
 0x300   : > { %8136 = vmatprep.mubr.msk.f32.mxu1 %vm279_vm4, %v9947_v12  ;;  %v5026_v12 = vld [vmem:[#allocation5 + $0x1] sm:$0xff] }
 0x301   : > { %8208 = vmatprep.mubr.msk.f32.mxu0 %vm313_vm6, %v5026_v12 }
 0x303   : > { %8137 = vmatmul.mubr.msk.f32.gmra.mrb[10].mxu1 %vm279_vm4, %v9951_v22  ;;  %v5018_v22 = vld [vmem:[%s10688_s5] sm:$0xff] }
 0x304   : > { %8139 = vmatprep.mubr.msk.f32.mxu1 %vm279_vm4, %v4203_v57 }
 0x307   : > { %8140 = vmatmul.mubr.msk.f32.gmra.mrb[12].mxu1 %vm279_vm4, %v4204_v44 }
 0x308   : > { %8150 = vmatprep.mubr.msk.f32.mxu1 %vm279_vm4, %v9649_v29  ;;  %v10761_v29 = vld [vmem:[#allocation18_spill] sm:$0xff] }
 0x30b   : > { %8151 = vmatmul.mubr.msk.f32.vlgmr.msra.gmra.mrb[14].mxu1 %vm279_vm4, %v9657_v31  ;;  %v10762_v31 = vld [vmem:[#allocation31_spill] sm:$0xff] }
 0x30c   : > { %8153 = vmatprep.mubr.msk.f32.mxu1 %vm279_vm4, %v9666_v35  ;;  %v4553_v35 = vld [vmem:[#allocation3 + $0xf2] sm:$0xff] }
 0x30f   : > { %8154 = vmatmul.mubr.msk.f32.gmra.mrb[16].mxu1 %vm279_vm4, %v9674_v37  ;;  %v4554_v37 = vld [vmem:[#allocation3 + $0xfa] sm:$0xff] }
 0x310   : > { %8156 = vmatprep.mubr.msk.f32.mxu1 %vm279_vm4, %v9682_v41  ;;  %v6919_v41 = vld [vmem:[%s10688_s5 + $0x40] sm:$0xff] }
 0x313   : > { %8157 = vmatmul.mubr.msk.f32.gmra.mrb[18].mxu1 %vm279_vm4, %v9690_v45  ;;  %v6920_v45 = vld [vmem:[%s10688_s5 + $0x48] sm:$0xff] }
 0x314   : > { %8159 = vmatprep.mubr.msk.f32.mxu1 %vm279_vm4, %v9698_v47  ;;  %v8522_v47 = vpack.c.bf16 %v6920_v45, %v6919_v41 }
 0x316   : > { %8523 = vmatprep.subr.bf16.mxu0 %v8522_v47 }
 0x317   : > { %8160 = vmatmul.mubr.msk.f32.gmra.mrb[20].mxu1 %vm279_vm4, %v9706_v49  ;;  %8525 = vmatpush3.bf16.msra.mxu0 %v8522_v47  ;;  %v6921_v49 = vld [vmem:[%s10688_s5 + $0x50] sm:$0xff] }
 0x318   : > { %8162 = vmatprep.mubr.msk.f32.mxu1 %vm279_vm4, %v9714_v51  ;;  %v6922_v51 = vld [vmem:[%s10688_s5 + $0x58] sm:$0xff] }
 0x31b   : > { %8163 = vmatmul.mubr.msk.f32.gmra.mrb[22].mxu1 %vm279_vm4, %v9722_v1  ;;  %v8526_v1 = vpack.c.bf16 %v6922_v51, %v6921_v49 }
 0x31c   : > { %8165 = vmatprep.mubr.msk.f32.mxu1 %vm279_vm4, %v9728_v2  ;;  %v6923_v2 = vld [vmem:[%s10688_s5 + $0x60] sm:$0xff] }
 0x31d   : > { %8527 = vmatprep.subr.bf16.mxu0 %v8526_v1 }
 0x31e   : > { %8529 = vmatpush3.bf16.msra.mxu0 %v8526_v1 }
 0x31f   : > { %8166 = vmatmul.mubr.msk.f32.gmra.mrb[24].mxu1 %vm279_vm4, %v9732_v3  ;;  %v6924_v3 = vld [vmem:[%s10688_s5 + $0x68] sm:$0xff] }
 0x320   : > { %8168 = vmatprep.mubr.msk.f32.mxu1 %vm279_vm4, %v9736_v4  ;;  %v8530_v4 = vpack.c.bf16 %v6924_v3, %v6923_v2 }
 0x322   : > { %8531 = vmatprep.subr.bf16.mxu0 %v8530_v4 }
 0x323   : > { %8169 = vmatmul.mubr.msk.f32.gmra.mrb[26].mxu1 %vm279_vm4, %v10737_v60  ;;  %8533 = vmatpush3.bf16.msra.mxu0 %v8530_v4  ;;  %v5020_v4 = vld [vmem:[%s10688_s5 + $0x10] sm:$0xff] }
 0x324   : > { %8171 = vmatprep.mubr.msk.f32.mxu1 %vm279_vm4, %v10738_v62  ;;  %v10764_v62 = vld [vmem:[#allocation11_spill] sm:$0xff] }
 0x327   : > { %8172 = vmatmul.mubr.msk.f32.gmra.mrb[0].mxu1 %vm279_vm4, %v10739_v25 }
 0x328   : > { %8174 = vmatprep.mubr.msk.f32.mxu1 %vm279_vm4, %v10740_v7 }
 0x32b   : > { %8175 = vmatmul.mubr.msk.f32.gmra.mrb[2].mxu1 %vm279_vm4, %v10741_v23  ;;  %v10276_v23 = vpack.c.bf16 %v5019_v19, %v5018_v22  ;;  %v10770_v22 = vld [vmem:[#allocation20_spill] sm:$0xff] }
 0x32c   : > { %8177 = vmatprep.mubr.msk.f32.mxu1 %vm279_vm4, %v10742_v52  ;;  %v10763_v52 = vld [vmem:[#allocation10_spill] sm:$0xff] }
 0x32f   : > { %8178 = vmatmul.mubr.msk.f32.gmra.mrb[4].mxu1 %vm279_vm4, %v10757_v10 }
 0x330   : > { %8180 = vmatprep.mubr.msk.f32.mxu1 %vm279_vm4, %v10758_v15 }
 0x333   : > { %8181 = vmatmul.mubr.msk.f32.gmra.mrb[6].mxu1 %vm279_vm4, %v10759_v40 }
 0x334   : > { %8183 = vmatprep.mubr.msk.f32.mxu1 %vm279_vm4, %v10760_v59 }
 0x337   : > { %8184 = vmatmul.mubr.msk.f32.gmra.mrb[8].mxu1 %vm279_vm4, %v10761_v29 }
 0x338   : > { %8186 = vmatprep.mubr.msk.f32.mxu1 %vm279_vm4, %v10762_v31 }
 0x33b   : > { %8187 = vmatmul.mubr.msk.f32.gmra.mrb[10].mxu1 %vm279_vm4, %v10049_v26  ;;  %v8534_v26 = vpack.c.bf16 %v6926_v13, %v6925_v28  ;;  %v10769_v13 = vld [vmem:[#allocation19_spill] sm:$0xff] }
 0x33c   : > { %8189 = vmatprep.mubr.msk.f32.mxu1 %vm279_vm4, %v4553_v35 }
 0x33d   : > { %8535 = vmatprep.subr.bf16.mxu0 %v8534_v26 }
 0x33e   : > { %8537 = vmatpush3.bf16.msra.mxu0 %v8534_v26 }
 0x33f   : > { %8190 = vmatmul.mubr.msk.f32.gmra.mrb[12].mxu1 %vm279_vm4, %v4554_v37  ;;  %8539 = vmatprep.subr.bf16.mxu0 %v10276_v23 }
 0x3de   : > { %v8152_v7 = vpop.f32.mrb[14].mxu1 }
 0x3df   : > { %v8670_v56 = vadd.f32 %v8152_v7, %v10763_v52  ;;  %v4710_v60 = vpop.f32.mrb[15].mxu1 }
 0x3e0   : > { %v8671_v25 = vadd.f32 %v4710_v60, %v10764_v62 }
 0x3e1   : > { %4878 = vst.msk [vmem:[#allocation4 + $0x8] sm:$0xff] %vm313_vm6, %v8670_v56 }
 0x3e2   : > { %4877 = vst.msk [vmem:[#allocation4] sm:$0xff] %vm313_vm6, %v8671_v25  ;;  %v8155_v33 = vpop.f32.mrb[16].mxu1 }
 0x3e3   : > { %v8672_v39 = vadd.f32 %v8155_v33, %v10765_v36  ;;  %v4720_v42 = vpop.f32.mrb[17].mxu1  ;;  %v5022_v36 = vld [vmem:[%s10688_s5 + $0x20] sm:$0xff] }
 0x3e4   : > { %v8673_v14 = vadd.f32 %v4720_v42, %v10766_v46  ;;  %v10771_v42 = vld [vmem:[#allocation21_spill] sm:$0xff] }
 0x3e5   : > { %4880 = vst.msk [vmem:[#allocation4 + $0x18] sm:$0xff] %vm313_vm6, %v8672_v39  ;;  %v5023_v39 = vld [vmem:[%s10688_s5 + $0x28] sm:$0xff] }
 0x3e6   : > { %4879 = vst.msk [vmem:[#allocation4 + $0x10] sm:$0xff] %vm313_vm6, %v8673_v14  ;;  %v8158_v48 = vpop.f32.mrb[18].mxu1 }
 0x3e7   : > { %v8674_v61 = vadd.f32 %v8158_v48, %v10767_v50  ;;  %v4730_v63 = vpop.f32.mrb[19].mxu1  ;;  %v10772_v50 = vld [vmem:[#allocation22_spill] sm:$0xff] }
 0x3e8   : > { %v8675_v32 = vadd.f32 %v4730_v63, %v10057_v55  ;;  %v8546_v63 = vpack.c.bf16 %v5023_v39, %v5022_v36  ;;  %v10781_v39 = vld [vmem:[#allocation8_spill] sm:$0xff] }
 0x3e9   : > { %4882 = vst.msk [vmem:[#allocation4 + $0x28] sm:$0xff] %vm313_vm6, %v8674_v61  ;;  %v4906_v38 = vld [vmem:[#allocation4] ss:$2 sm:$0x7f] }
 0x3ea   : > { %4881 = vst.msk [vmem:[#allocation4 + $0x20] sm:$0xff] %vm313_vm6, %v8675_v32  ;;  %v8161_v11 = vpop.f32.mrb[20].mxu1  ;;  %v4908_v16 = vld [vmem:[#allocation4 + $0x1] ss:$2 sm:$0x7f] }
 0x3eb   : > { %v8676_v43 = vadd.f32 %v8161_v11, %v10063_v53  ;;  %v4740_v0 = vpop.f32.mrb[21].mxu1  ;;  %v4909_v8 = vmax.f32 %v4906_v38, %v4908_v16  ;;  %v5024_v16 = vld [vmem:[%s10688_s5 + $0x30] sm:$0xff] }
 0x3ec   : > { %v8677_v17 = vadd.f32 %v4740_v0, %v10768_v58 }
 0x3ed   : > { %v4911_v24 = vld [vmem:[#allocation4 + $0x10] ss:$2 sm:$0x7f]  ;;  %v4913_v6 = vld [vmem:[#allocation4 + $0x11] ss:$2 sm:$0x7f] }
 0x3ee   : > { %4884 = vst.msk [vmem:[#allocation4 + $0x38] sm:$0xff] %vm313_vm6, %v8676_v43  ;;  %v4914_v9 = vmax.f32 %v4911_v24, %v4913_v6  ;;  %4883 = vst.msk [vmem:[#allocation4 + $0x30] sm:$0xff] %vm313_vm6, %v8677_v17  ;;  %v8164_v55 = vpop.f32.mrb[22].mxu1  ;;  %v5025_v43 = vld [vmem:[%s10688_s5 + $0x38] sm:$0xff]  ;;  %v10774_v6 = vld [vmem:[#allocation24_spill] sm:$0xff] }
 0x3ef   : > { %v8678_v5 = vadd.f32 %v8164_v55, %v10077_v21  ;;  %v4750_v53 = vpop.f32.mrb[23].mxu1 }
 0x3f0   : > { %v4915_v57 = vmax.f32 %v4909_v8, %v4914_v9  ;;  %v8679_v44 = vadd.f32 %v4750_v53, %v10079_v27 }
 0x3f1   : > { %4886 = vst.msk [vmem:[#allocation4 + $0x48] sm:$0xff] %vm313_vm6, %v8678_v5  ;;  %v4927_v15 = vld [vmem:[#allocation4 + $0x20] ss:$2 sm:$0x7f]  ;;  %v8550_v5 = vpack.c.bf16 %v5025_v43, %v5024_v16 }
 0x3f2   : > { %v4922_v10 = vadd.f32 %v10298_v18, %v4915_v57  ;;  %4885 = vst.msk [vmem:[#allocation4 + $0x40] sm:$0xff] %vm313_vm6, %v8679_v44  ;;  %v8167_v40 = vpop.f32.mrb[24].mxu1  ;;  %v4929_v59 = vld [vmem:[#allocation4 + $0x21] ss:$2 sm:$0x7f] }
 0x3f3   : > { %v8680_v29 = vadd.f32 %v8167_v40, %v10085_v54  ;;  %v4760_v31 = vpop.f32.mrb[25].mxu1  ;;  %v4930_v27 = vmax.f32 %v4927_v15, %v4929_v59  ;;  %v6943_v15 = vld [vmem:[%s10688_s5 + $0x80] sm:$0xff]  ;;  %v6944_v40 = vld [vmem:[%s10688_s5 + $0x88] sm:$0xff]  ;;  %v10775_v59 = vld [vmem:[#allocation25_spill] sm:$0xff] }
 0x3f4   : > { %v4923_v35 = vmax.f32 %v4922_v10, 0.0  ;;  %v8681_v21 = vadd.f32 %v4760_v31, %v10087_v30 }
 0x3f5   : > { %v4932_v37 = vld [vmem:[#allocation4 + $0x30] ss:$2 sm:$0x7f]  ;;  %v4934_v41 = vld [vmem:[#allocation4 + $0x31] ss:$2 sm:$0x7f] }
 0x3f6   : > { %4888 = vst.msk [vmem:[#allocation4 + $0x58] sm:$0xff] %vm313_vm6, %v8680_v29  ;;  %v4935_v45 = vmax.f32 %v4932_v37, %v4934_v41  ;;  %4887 = vst.msk [vmem:[#allocation4 + $0x50] sm:$0xff] %vm313_vm6, %v8681_v21  ;;  %v8170_v47 = vpop.f32.mrb[26].mxu1  ;;  %v10776_v21 = vld [vmem:[#allocation26_spill] sm:$0xff]  ;;  %v10366_v41 = vpack.c.bf16 %v6944_v40, %v6943_v15  ;;  %v5010_v15 = vld [vmem:[#allocation5] sm:$0xff] }
 0x3f7   : > { %4925 = vst.msk [vmem:[#allocation5 + $0xa] sm:$0x7f] %vm4924_vm7, %v4923_v35  ;;  %v8682_v49 = vadd.f32 %v8170_v47, %v10093_v34  ;;  %v4770_v51 = vpop.f32.mrb[27].mxu1  ;;  %v5021_v34 = vld [vmem:[%s10688_s5 + $0x18] sm:$0xff]  ;;  %v6945_v40 = vld [vmem:[%s10688_s5 + $0x90] sm:$0xff] }
 0x3f8   : > { %v4936_v54 = vmax.f32 %v4930_v27, %v4935_v45  ;;  %v8683_v1 = vadd.f32 %v4770_v51, %v10095_v20  ;;  %v8542_v56 = vpack.c.bf16 %v5021_v34, %v5020_v4  ;;  %v10777_v51 = vld [vmem:[#allocation27_spill] sm:$0xff] }
 0x3f9   : > { %4890 = vst.msk [vmem:[#allocation4 + $0x68] sm:$0xff] %vm313_vm6, %v8682_v49  ;;  %v4941_v2 = vld [vmem:[#allocation4 + $0x40] ss:$2 sm:$0x7f] }
 0x3fa   : > { %v4937_v30 = vadd.f32 %v10298_v18, %v4936_v54  ;;  %4889 = vst.msk [vmem:[#allocation4 + $0x60] sm:$0xff] %vm313_vm6, %v8683_v1  ;;  %v8173_v3 = vpop.f32.mrb[0].mxu1  ;;  %v4943_v28 = vld [vmem:[#allocation4 + $0x41] ss:$2 sm:$0x7f] }
 0x3fb   : > { %v8684_v26 = vadd.f32 %v8173_v3, %v10769_v13  ;;  %v4780_v20 = vpop.f32.mrb[1].mxu1  ;;  %v4944_v60 = vmax.f32 %v4941_v2, %v4943_v28  ;;  %v10778_v2 = vld [vmem:[#allocation28_spill] sm:$0xff] }
 0x3fc   : > { %v4938_v12 = vmax.f32 %v4937_v30, 0.0  ;;  %v8685_v19 = vadd.f32 %v4780_v20, %v10770_v22 }
 0x3fd   : > { %v4946_v7 = vld [vmem:[#allocation4 + $0x50] ss:$2 sm:$0x7f]  ;;  %v4948_v52 = vld [vmem:[#allocation4 + $0x51] ss:$2 sm:$0x7f] }
 0x3fe   : > { %4892 = vst.msk [vmem:[#allocation4 + $0x78] sm:$0xff] %vm313_vm6, %v8684_v26  ;;  %v4949_v62 = vmax.f32 %v4946_v7, %v4948_v52  ;;  %4891 = vst.msk [vmem:[#allocation4 + $0x70] sm:$0xff] %vm313_vm6, %v8685_v19  ;;  %v8176_v25 = vpop.f32.mrb[2].mxu1  ;;  %v10325_v33 = vld [vmem:[#allocation5 + $0x9] sm:$0xff] }
 0x3ff   : > { %4939 = vst.msk [vmem:[#allocation5 + $0x13] sm:$0x7f] %vm4924_vm7, %v4938_v12  ;;  %v8686_v46 = vadd.f32 %v8176_v25, %v10771_v42  ;;  %8209 = vmatmul.mubr.msk.f32.vlgmr.msra.gmra.mrb[126].mxu0 %vm313_vm6, %v10325_v33  ;;  %v4790_v14 = vpop.f32.mrb[3].mxu1  ;;  %v10779_v12 = vld [vmem:[#allocation29_spill] sm:$0xff]  ;;  %v10780_v52 = vld [vmem:[#allocation30_spill] sm:$0xff] }
 0x400   : > { %v4950_v48 = vmax.f32 %v4944_v60, %v4949_v62  ;;  %v8687_v61 = vadd.f32 %v4790_v14, %v10772_v50  ;;  %8541 = vmatpush3.bf16.msra.mxu0 %v10276_v23  ;;  %v10773_v23 = vld [vmem:[#allocation23_spill] sm:$0xff] }
 0x401   : > { %4894 = vst.msk [vmem:[#allocation4 + $0x88] sm:$0xff] %vm313_vm6, %v8686_v46  ;;  %8543 = vmatprep.subr.bf16.mxu0 %v8542_v56  ;;  %v4955_v38 = vld [vmem:[#allocation4 + $0x60] ss:$2 sm:$0x7f] }
 0x402   : > { %v4951_v32 = vadd.f32 %v10298_v18, %v4950_v48  ;;  %4893 = vst.msk [vmem:[#allocation4 + $0x80] sm:$0xff] %vm313_vm6, %v8687_v61  ;;  %v8179_v11 = vpop.f32.mrb[4].mxu1  ;;  %v4957_v0 = vld [vmem:[#allocation4 + $0x61] ss:$2 sm:$0x7f] }
 0x403   : > { %v8688_v58 = vadd.f32 %v8179_v11, %v10773_v23  ;;  %v4800_v17 = vpop.f32.mrb[5].mxu1  ;;  %v4958_v53 = vmax.f32 %v4955_v38, %v4957_v0  ;;  %v10782_v48 = vld [vmem:[#allocation9_spill] sm:$0xff] }
 0x404   : > { %v4952_v24 = vmax.f32 %v4951_v32, 0.0  ;;  %v8689_v8 = vadd.f32 %v4800_v17, %v10774_v6  ;;  %8545 = vmatpush3.bf16.msra.mxu0 %v8542_v56 }
 0x405   : > { %v4960_v9 = vld [vmem:[#allocation4 + $0x70] ss:$2 sm:$0x7f]  ;;  %v4962_v55 = vld [vmem:[#allocation4 + $0x71] ss:$2 sm:$0x7f]  ;;  %8547 = vmatprep.subr.bf16.mxu0 %v8546_v63 }
 0x406   : > { %4896 = vst.msk [vmem:[#allocation4 + $0x98] sm:$0xff] %vm313_vm6, %v8688_v58  ;;  %v4963_v57 = vmax.f32 %v4960_v9, %v4962_v55  ;;  %4895 = vst.msk [vmem:[#allocation4 + $0x90] sm:$0xff] %vm313_vm6, %v8689_v8  ;;  %v8182_v44 = vpop.f32.mrb[6].mxu1  ;;  %v10353_v10 = vld [vmem:[#allocation5 + $0x11] sm:$0xff] }
 0x407   : > { %4953 = vst.msk [vmem:[#allocation5 + $0x1c] sm:$0x7f] %vm4924_vm7, %v4952_v24  ;;  %v8690_v29 = vadd.f32 %v8182_v44, %v10775_v59  ;;  %8211 = vmatprep.mubr.msk.f32.mxu0 %vm313_vm6, %v10353_v10  ;;  %v4810_v31 = vpop.f32.mrb[7].mxu1  ;;  %v6946_v59 = vld [vmem:[%s10688_s5 + $0x98] sm:$0xff] }
 0x408   : > { %v4964_v35 = vmax.f32 %v4958_v53, %v4963_v57  ;;  %v8691_v37 = vadd.f32 %v4810_v31, %v10776_v21  ;;  %8549 = vmatpush3.bf16.msra.mxu0 %v8546_v63  ;;  %v6947_v31 = vld [vmem:[%s10688_s5 + $0xa0] sm:$0xff]  ;;  %v5012_v21 = vld [vmem:[#allocation5 + $0x10] sm:$0xff] }
 0x409   : > { %4898 = vst.msk [vmem:[#allocation4 + $0xa8] sm:$0xff] %vm313_vm6, %v8690_v29  ;;  %8551 = vmatprep.subr.bf16.mxu0 %v8550_v5  ;;  %v4969_v45 = vld [vmem:[#allocation4 + $0x80] ss:$2 sm:$0x7f] }
 0x40a   : > { %v4965_v27 = vadd.f32 %v10298_v18, %v4964_v35  ;;  %4897 = vst.msk [vmem:[#allocation4 + $0xa0] sm:$0xff] %vm313_vm6, %v8691_v37  ;;  %v8185_v47 = vpop.f32.mrb[8].mxu1  ;;  %v4971_v49 = vld [vmem:[#allocation4 + $0x81] ss:$2 sm:$0x7f]  ;;  %v6948_v35 = vld [vmem:[%s10688_s5 + $0xa8] sm:$0xff] }
 0x40b   : > { %v8692_v54 = vadd.f32 %v8185_v47, %v10777_v51  ;;  %v4820_v1 = vpop.f32.mrb[9].mxu1  ;;  %v4972_v28 = vmax.f32 %v4969_v45, %v4971_v49  ;;  %v5011_v29 = vld [vmem:[#allocation5 + $0x8] sm:$0xff]  ;;  %v8562_v37 = vpack.c.bf16 %v6948_v35, %v6947_v31  ;;  %v6949_v45 = vld [vmem:[%s10688_s5 + $0xb0] sm:$0xff]  ;;  %v6950_v47 = vld [vmem:[%s10688_s5 + $0xb8] sm:$0xff] }
 0x40c   : > { %v4966_v30 = vmax.f32 %v4965_v27, 0.0  ;;  %v8693_v3 = vadd.f32 %v4820_v1, %v10778_v2  ;;  %8553 = vmatpush3.bf16.msra.mxu0 %v8550_v5  ;;  %v6960_v1 = vld [vmem:[%s10688_s5 + $0xc8] sm:$0xff]  ;;  %v5301_v2 = vld [vmem:[#allocation5 + $0x2] sm:$0xff] }
 0x40d   : > { %v4974_v4 = vld [vmem:[#allocation4 + $0x90] ss:$2 sm:$0x7f]  ;;  %v4976_v34 = vld [vmem:[#allocation4 + $0x91] ss:$2 sm:$0x7f]  ;;  %8555 = vmatprep.subr.bf16.mxu0 %v10366_v41 }
 0x40e   : > { %4900 = vst.msk [vmem:[#allocation4 + $0xb8] sm:$0xff] %vm313_vm6, %v8692_v54  ;;  %v4977_v13 = vmax.f32 %v4974_v4, %v4976_v34  ;;  %4899 = vst.msk [vmem:[#allocation4 + $0xb0] sm:$0xff] %vm313_vm6, %v8693_v3  ;;  %v8188_v26 = vpop.f32.mrb[10].mxu1  ;;  %v10376_v20 = vld [vmem:[#allocation5 + $0x19] sm:$0xff]  ;;  %v6959_v54 = vld [vmem:[%s10688_s5 + $0xc0] sm:$0xff] }
 0x40f   : > { %4967 = vst.msk [vmem:[#allocation5 + $0x25] sm:$0x7f] %vm4924_vm7, %v4966_v30  ;;  %v8694_v22 = vadd.f32 %v8188_v26, %v10779_v12  ;;  %8212 = vmatmul.mubr.msk.f32.gmra.mrb[128].mxu0 %vm313_vm6, %v10376_v20  ;;  %v4830_v19 = vpop.f32.mrb[11].mxu1  ;;  %v5013_v27 = vld [vmem:[#allocation5 + $0x18] sm:$0xff]  ;;  %v8570_v3 = vpack.c.bf16 %v6960_v1, %v6959_v54  ;;  %v5302_v26 = vld [vmem:[#allocation5 + $0xa] sm:$0xff]  ;;  %v7010_v31 = vld [vmem:[%s10688_s5 + $0x198] sm:$0xff] }
 0x410   : > { %v4978_v7 = vmax.f32 %v4972_v28, %v4977_v13  ;;  %v8695_v56 = vadd.f32 %v4830_v19, %v10780_v52  ;;  %v6961_v34 = vld [vmem:[%s10688_s5 + $0xd0] sm:$0xff]  ;;  %v6962_v28 = vld [vmem:[%s10688_s5 + $0xd8] sm:$0xff]  ;;  %v6963_v12 = vld [vmem:[%s10688_s5 + $0xe0] sm:$0xff] }
 0x411   : > { %4902 = vst.msk [vmem:[#allocation4 + $0xc8] sm:$0xff] %vm313_vm6, %v8694_v22  ;;  %v4983_v62 = vld [vmem:[#allocation4 + $0xa0] ss:$2 sm:$0x7f]  ;;  %v8574_v13 = vpack.c.bf16 %v6962_v28, %v6961_v34  ;;  %v6964_v22 = vld [vmem:[%s10688_s5 + $0xe8] sm:$0xff] }
 0x412   : > { %v4979_v60 = vadd.f32 %v10298_v18, %v4978_v7  ;;  %4901 = vst.msk [vmem:[#allocation4 + $0xc0] sm:$0xff] %vm313_vm6, %v8695_v56  ;;  %v8191_v25 = vpop.f32.mrb[12].mxu1  ;;  %v4985_v36 = vld [vmem:[#allocation4 + $0xa1] ss:$2 sm:$0x7f]  ;;  %v10454_v19 = vld [vmem:[#allocation5 + $0x12] sm:$0xff]  ;;  %v8578_v7 = vpack.c.bf16 %v6964_v22, %v6963_v12 }
 0x413   : > { %v8696_v42 = vadd.f32 %v8191_v25, %v10781_v39  ;;  %v4840_v46 = vpop.f32.mrb[13].mxu1  ;;  %v4986_v32 = vmax.f32 %v4983_v62, %v4985_v36  ;;  %v10458_v52 = vld [vmem:[#allocation5 + $0x1a] sm:$0xff]  ;;  %v6975_v39 = vld [vmem:[%s10688_s5 + $0x100] sm:$0xff] }
 0x414   : > { %v4980_v14 = vmax.f32 %v4979_v60, 0.0  ;;  %v8697_v50 = vadd.f32 %v4840_v46, %v10782_v48  ;;  %v6965_v56 = vld [vmem:[%s10688_s5 + $0xf0] sm:$0xff]  ;;  %v6966_v60 = vld [vmem:[%s10688_s5 + $0xf8] sm:$0xff]  ;;  %v5763_v35 = vld [vmem:[#allocation5 + $0xb] sm:$0xff] }
 0x415   : > { %v4988_v61 = vld [vmem:[#allocation4 + $0xb0] ss:$2 sm:$0x7f]  ;;  %v4990_v63 = vld [vmem:[#allocation4 + $0xb1] ss:$2 sm:$0x7f]  ;;  %v8582_v25 = vpack.c.bf16 %v6966_v60, %v6965_v56 }
 0x416   : > { %4904 = vst.msk [vmem:[#allocation4 + $0xd8] sm:$0xff] %vm313_vm6, %v8696_v42  ;;  %v4991_v38 = vmax.f32 %v4988_v61, %v4990_v63  ;;  %4903 = vst.msk [vmem:[#allocation4 + $0xd0] sm:$0xff] %vm313_vm6, %v8697_v50  ;;  %v10390_v11 = vld [vmem:[#allocation5 + $0x21] sm:$0xff]  ;;  %v6976_v42 = vld [vmem:[%s10688_s5 + $0x108] sm:$0xff] }
 0x417   : > { %4981 = vst.msk [vmem:[#allocation5 + $0x2e] sm:$0x7f] %vm4924_vm7, %v4980_v14  ;;  %8214 = vmatprep.mubr.msk.f32.mxu0 %vm313_vm6, %v10390_v11  ;;  %v5014_v49 = vld [vmem:[#allocation5 + $0x20] sm:$0xff]  ;;  %v8586_v14 = vpack.c.bf16 %v6976_v42, %v6975_v39  ;;  %v6977_v50 = vld [vmem:[%s10688_s5 + $0x110] sm:$0xff]  ;;  %v7028_v56 = vld [vmem:[%s10688_s5 + $0x1e8] sm:$0xff] }
 0x418   : > { %v4992_v16 = vmax.f32 %v4986_v32, %v4991_v38  ;;  %v10468_v62 = vld [vmem:[#allocation5 + $0x22] sm:$0xff]  ;;  %v6980_v38 = vld [vmem:[%s10688_s5 + $0x128] sm:$0xff] }
 0x419   : > { %v4997_v0 = vld [vmem:[#allocation4 + $0xc0] ss:$2 sm:$0x7f]  ;;  %v4999_v23 = vld [vmem:[#allocation4 + $0xc1] ss:$2 sm:$0x7f] }
 0x41a   : > { %v4993_v43 = vadd.f32 %v10298_v18, %v4992_v16  ;;  %v5000_v6 = vmax.f32 %v4997_v0, %v4999_v23  ;;  %v6978_v61 = vld [vmem:[%s10688_s5 + $0x118] sm:$0xff]  ;;  %v6979_v32 = vld [vmem:[%s10688_s5 + $0x120] sm:$0xff]  ;;  %v6992_v0 = vld [vmem:[%s10688_s5 + $0x148] sm:$0xff] }
 0x41b   : > { %v8590_v63 = vpack.c.bf16 %v6978_v61, %v6977_v50  ;;  %v8594_v16 = vpack.c.bf16 %v6980_v38, %v6979_v32  ;;  %v7014_v54 = vld [vmem:[%s10688_s5 + $0x1b8] sm:$0xff]  ;;  %v7040_v39 = vld [vmem:[%s10688_s5 + $0x208] sm:$0xff]  ;;  %v7043_v61 = vld [vmem:[%s10688_s5 + $0x220] sm:$0xff] }
 0x41c   : > { %v4994_v58 = vmax.f32 %v4993_v43, 0.0  ;;  %v6982_v43 = vld [vmem:[%s10688_s5 + $0x138] sm:$0xff]  ;;  %v7045_v38 = vld [vmem:[%s10688_s5 + $0x230] sm:$0xff] }
 0x41d   : > { %v5002_v17 = vld [vmem:[#allocation4 + $0xd0] ss:$2 sm:$0x7f]  ;;  %v5004_v24 = vld [vmem:[#allocation4 + $0xd1] ss:$2 sm:$0x7f] }
 0x41e   : > { %4995 = vst.msk [vmem:[#allocation5 + $0x37] sm:$0x7f] %vm4924_vm7, %v4994_v58  ;;  %v5005_v8 = vmax.f32 %v5002_v17, %v5004_v24  ;;  %v10396_v9 = vld [vmem:[#allocation5 + $0x29] sm:$0xff]  ;;  %v6993_v17 = vld [vmem:[%s10688_s5 + $0x150] sm:$0xff]  ;;  %v6994_v24 = vld [vmem:[%s10688_s5 + $0x158] sm:$0xff] }
 0x41f   : > { %8215 = vmatmul.mubr.msk.f32.gmra.mrb[130].mxu0 %vm313_vm6, %v10396_v9  ;;  %v5015_v51 = vld [vmem:[#allocation5 + $0x28] sm:$0xff]  ;;  %v7026_v12 = vld [vmem:[%s10688_s5 + $0x1d8] sm:$0xff] }
 0x420   : > { %v5006_v55 = vmax.f32 %v5000_v6, %v5005_v8  ;;  %v10472_v36 = vld [vmem:[#allocation5 + $0x2a] sm:$0xff]  ;;  %v8606_v6 = vpack.c.bf16 %v6994_v24, %v6993_v17 }
 0x421   : > { %v6995_v8 = vld [vmem:[%s10688_s5 + $0x160] sm:$0xff] }
 0x422   : > { %v5007_v5 = vadd.f32 %v10298_v18, %v5006_v55  ;;  %v8558_v18 = vpack.c.bf16 %v6946_v59, %v6945_v40  ;;  %v5767_v1 = vld [vmem:[#allocation5 + $0x2b] sm:$0xff] }
 0x424   : > { %v5008_v53 = vmax.f32 %v5007_v5, 0.0  ;;  %v6997_v5 = vld [vmem:[%s10688_s5 + $0x170] sm:$0xff] }
 0x425   : > { %v10401_v57 = vld [vmem:[#allocation5 + $0x31] sm:$0xff]  ;;  %v5033_v44 = vld [vmem:[#allocation5 + $0x39] sm:$0x7f] }
 0x426   : > { %8217 = vmatprep.mubr.msk.f32.mxu0 %vm313_vm6, %v10401_v57  ;;  %5009 = vst.msk [vmem:[#allocation5 + $0x40] sm:$0x7f] %vm4924_vm7, %v5008_v53  ;;  %v5016_v30 = vld [vmem:[#allocation5 + $0x30] sm:$0xff]  ;;  %v5017_v4 = vld [vmem:[#allocation5 + $0x38] sm:$0x7f]  ;;  %v6998_v53 = vld [vmem:[%s10688_s5 + $0x178] sm:$0xff] }
 0x427   : > { %8218 = vmatmul.mubr.msk.f32.gmra.mrb[132].mxu0 %vm313_vm6, %v5033_v44  ;;  %v10482_v46 = vld [vmem:[#allocation5 + $0x32] sm:$0xff]  ;;  %v7007_v44 = vld [vmem:[%s10688_s5 + $0x180] sm:$0xff] }
 0x428   : > { %8236 = vmatprep.mubr.msk.f32.mxu0 %vm313_vm6, %v5010_v15  ;;  %v7008_v15 = vld [vmem:[%s10688_s5 + $0x188] sm:$0xff] }
 0x429   : > { %v8618_v59 = vpack.c.bf16 %v7008_v15, %v7007_v44 }
 0x42b   : > { %8237 = vmatmul.mubr.msk.f32.vlgmr.msra.gmra.mrb[126].mxu0 %vm313_vm6, %v5011_v29  ;;  %v7009_v29 = vld [vmem:[%s10688_s5 + $0x190] sm:$0xff] }
 0x42c   : > { %8557 = vmatpush3.bf16.msra.mxu0 %v10366_v41  ;;  %8239 = vmatprep.mubr.msk.f32.mxu0 %vm313_vm6, %v5012_v21  ;;  %v8566_v41 = vpack.c.bf16 %v6950_v47, %v6949_v45  ;;  %v8622_v21 = vpack.c.bf16 %v7010_v31, %v7009_v29  ;;  %v7012_v45 = vld [vmem:[%s10688_s5 + $0x1a8] sm:$0xff]  ;;  %v10579_v47 = vld [vmem:[#allocation5 + $0x1b] sm:$0xff] }
 0x42d   : > { %8559 = vmatprep.subr.bf16.mxu0 %v8558_v18  ;;  %v5308_v48 = vld [vmem:[#allocation5 + $0x3a] sm:$0x7f]  ;;  %v5462_v58 = vld [vmem:[#allocation5 + $0x41] sm:$0x7f] }
 0x42e   : > { %v5461_v23 = vld [vmem:[#allocation5 + $0x39] sm:$0xff]  ;;  %v5923_v42 = vld [vmem:[#allocation5 + $0x42] sm:$0xff] }
 0x42f   : > { %8240 = vmatmul.mubr.msk.f32.gmra.mrb[128].mxu0 %vm313_vm6, %v5013_v27  ;;  %v10560_v40 = vld [vmem:[#allocation5 + $0x3a] sm:$0xff]  ;;  %v7011_v27 = vld [vmem:[%s10688_s5 + $0x1a0] sm:$0xff] }
 0x430   : > { %8561 = vmatpush3.bf16.msra.mxu0 %v8558_v18  ;;  %8242 = vmatprep.mubr.msk.f32.mxu0 %vm313_vm6, %v5014_v49  ;;  %v5616_v18 = vld [vmem:[#allocation5 + $0x42] sm:$0x7f]  ;;  %v8626_v49 = vpack.c.bf16 %v7012_v45, %v7011_v27 }
 0x431   : > { %8563 = vmatprep.subr.bf16.mxu0 %v8562_v37  ;;  %v5769_v34 = vld [vmem:[#allocation5 + $0x3b] sm:$0xff]  ;;  %v6231_v24 = vld [vmem:[#allocation5 + $0x44] sm:$0xff] }
 0x432   : > { %v6230_v17 = vld [vmem:[#allocation5 + $0x3c] sm:$0xff] }
 0x433   : > { %8243 = vmatmul.mubr.msk.f32.gmra.mrb[130].mxu0 %vm313_vm6, %v5015_v51  ;;  %v7013_v51 = vld [vmem:[%s10688_s5 + $0x1b0] sm:$0xff] }
 0x434   : > { %8565 = vmatpush3.bf16.msra.mxu0 %v8562_v37  ;;  %8245 = vmatprep.mubr.msk.f32.mxu0 %vm313_vm6, %v5016_v30  ;;  %v5764_v37 = vld [vmem:[#allocation5 + $0x13] sm:$0xff]  ;;  %v8630_v30 = vpack.c.bf16 %v7014_v54, %v7013_v51 }
 0x435   : > { %8567 = vmatprep.subr.bf16.mxu0 %v8566_v41 }
 0x437   : > { %8246 = vmatmul.mubr.msk.f32.gmra.mrb[132].mxu0 %vm313_vm6, %v5017_v4  ;;  %v7024_v4 = vld [vmem:[%s10688_s5 + $0x1c8] sm:$0xff] }
 0x438   : > { %8569 = vmatpush3.bf16.msra.mxu0 %v8566_v41  ;;  %8264 = vmatprep.mubr.msk.f32.mxu0 %vm313_vm6, %v5301_v2  ;;  %v5766_v41 = vld [vmem:[#allocation5 + $0x23] sm:$0xff]  ;;  %v5768_v2 = vld [vmem:[#allocation5 + $0x33] sm:$0xff] }
 0x439   : > { %8571 = vmatprep.subr.bf16.mxu0 %v8570_v3 }
 0x43b   : > { %8265 = vmatmul.mubr.msk.f32.vlgmr.msra.gmra.mrb[126].mxu0 %vm313_vm6, %v5302_v26 }
 0x43c   : > { %8573 = vmatpush3.bf16.msra.mxu0 %v8570_v3  ;;  %8267 = vmatprep.mubr.msk.f32.mxu0 %vm313_vm6, %v10454_v19  ;;  %v7023_v3 = vld [vmem:[%s10688_s5 + $0x1c0] sm:$0xff] }
 0x43d   : > { %8575 = vmatprep.subr.bf16.mxu0 %v8574_v13  ;;  %v8634_v28 = vpack.c.bf16 %v7024_v4, %v7023_v3  ;;  %v6424_v3 = vld [vmem:[#allocation7] ss:$2 sm:$0xf] }
 0x43f   : > { %8268 = vmatmul.mubr.msk.f32.gmra.mrb[128].mxu0 %vm313_vm6, %v10458_v52 }
 0x440   : > { %8577 = vmatpush3.bf16.msra.mxu0 %v8574_v13  ;;  %8270 = vmatprep.mubr.msk.f32.mxu0 %vm313_vm6, %v10468_v62  ;;  %v5770_v13 = vld [vmem:[#allocation5 + $0x43] sm:$0x7f] }
 0x441   : > { %8579 = vmatprep.subr.bf16.mxu0 %v8578_v7 }
 0x443   : > { %8271 = vmatmul.mubr.msk.f32.gmra.mrb[130].mxu0 %vm313_vm6, %v10472_v36 }
 0x444   : > { %8581 = vmatpush3.bf16.msra.mxu0 %v8578_v7  ;;  %8273 = vmatprep.mubr.msk.f32.mxu0 %vm313_vm6, %v10482_v46  ;;  %v7027_v7 = vld [vmem:[%s10688_s5 + $0x1e0] sm:$0xff] }
 0x445   : > { %8583 = vmatprep.subr.bf16.mxu0 %v8582_v25  ;;  %v8642_v60 = vpack.c.bf16 %v7028_v56, %v7027_v7 }
 0x447   : > { %8274 = vmatmul.mubr.msk.f32.gmra.mrb[132].mxu0 %vm313_vm6, %v5308_v48  ;;  %v7042_v48 = vld [vmem:[%s10688_s5 + $0x218] sm:$0xff] }
 0x448   : > { %8585 = vmatpush3.bf16.msra.mxu0 %v8582_v25  ;;  %8292 = vmatprep.mubr.msk.f32.mxu0 %vm313_vm6, %v10325_v33  ;;  %v6981_v33 = vld [vmem:[%s10688_s5 + $0x130] sm:$0xff]  ;;  %v7030_v25 = vld [vmem:[%s10688_s5 + $0x1f8] sm:$0xff] }
 0x449   : > { %8587 = vmatprep.subr.bf16.mxu0 %v8586_v14 }
 0x44b   : > { %8293 = vmatmul.mubr.msk.f32.vlgmr.msra.gmra.mrb[126].mxu0 %vm313_vm6, %v10353_v10  ;;  %v8598_v10 = vpack.c.bf16 %v6982_v43, %v6981_v33  ;;  %v6077_v43 = vld [vmem:[#allocation5 + $0x43] sm:$0xff] }
 0x44c   : > { %8589 = vmatpush3.bf16.msra.mxu0 %v8586_v14  ;;  %8295 = vmatprep.mubr.msk.f32.mxu0 %vm313_vm6, %v10376_v20  ;;  %v6991_v20 = vld [vmem:[%s10688_s5 + $0x140] sm:$0xff]  ;;  %v7041_v14 = vld [vmem:[%s10688_s5 + $0x210] sm:$0xff] }
 0x44d   : > { %8591 = vmatprep.subr.bf16.mxu0 %v8590_v63  ;;  %v8654_v50 = vpack.c.bf16 %v7042_v48, %v7041_v14 }
 0x44f   : > { %8296 = vmatmul.mubr.msk.f32.gmra.mrb[128].mxu0 %vm313_vm6, %v10390_v11  ;;  %v8602_v11 = vpack.c.bf16 %v6992_v0, %v6991_v20  ;;  %v6225_v20 = vld [vmem:[#allocation5 + $0x14] sm:$0xff]  ;;  %v6226_v0 = vld [vmem:[#allocation5 + $0x1c] sm:$0xff] }
 0x450   : > { %8593 = vmatpush3.bf16.msra.mxu0 %v8590_v63  ;;  %8298 = vmatprep.mubr.msk.f32.mxu0 %vm313_vm6, %v10396_v9  ;;  %v6996_v9 = vld [vmem:[%s10688_s5 + $0x168] sm:$0xff] }
 0x451   : > { %8595 = vmatprep.subr.bf16.mxu0 %v8594_v16  ;;  %v8610_v55 = vpack.c.bf16 %v6996_v9, %v6995_v8  ;;  %v7044_v63 = vld [vmem:[%s10688_s5 + $0x228] sm:$0xff]  ;;  %v7055_v8 = vld [vmem:[%s10689_s6] ss:$0 sm:$0xff] }
 0x452   : > { %v8658_v32 = vpack.c.bf16 %v7044_v63, %v7043_v61 }
 0x453   : > { %8299 = vmatmul.mubr.msk.f32.gmra.mrb[130].mxu0 %vm313_vm6, %v10401_v57  ;;  %v8614_v57 = vpack.c.bf16 %v6998_v53, %v6997_v5 }
 0x454   : > { %8597 = vmatpush3.bf16.msra.mxu0 %v8594_v16  ;;  %8301 = vmatprep.mubr.msk.f32.mxu0 %vm313_vm6, %v5461_v23  ;;  %v7046_v16 = vld [vmem:[%s10688_s5 + $0x238] sm:$0xff] }
 0x455   : > { %8599 = vmatprep.subr.bf16.mxu0 %v8598_v10  ;;  %v8662_v33 = vpack.c.bf16 %v7046_v16, %v7045_v38  ;;  %v6227_v23 = vld [vmem:[#allocation5 + $0x24] sm:$0xff] }
 0x457   : > { %8302 = vmatmul.mubr.msk.f32.gmra.mrb[132].mxu0 %vm313_vm6, %v5462_v58  ;;  %v6229_v58 = vld [vmem:[#allocation5 + $0x34] sm:$0xff] }
 0x458   : > { %8601 = vmatpush3.bf16.msra.mxu0 %v8598_v10  ;;  %8320 = vmatprep.mubr.msk.f32.mxu0 %vm313_vm6, %v5302_v26  ;;  %v7025_v26 = vld [vmem:[%s10688_s5 + $0x1d0] sm:$0xff]  ;;  %v6078_v10 = vld [vmem:[#allocation5 + $0x4b] sm:$0x7f] }
 0x459   : > { %8603 = vmatprep.subr.bf16.mxu0 %v8602_v11  ;;  %v8638_v22 = vpack.c.bf16 %v7026_v12, %v7025_v26 }
 0x45b   : > { %8321 = vmatmul.mubr.msk.f32.vlgmr.msra.gmra.mrb[126].mxu0 %vm313_vm6, %v10454_v19 }
 0x45c   : > { %8605 = vmatpush3.bf16.msra.mxu0 %v8602_v11  ;;  %8323 = vmatprep.mubr.msk.f32.mxu0 %vm313_vm6, %v10458_v52  ;;  %v6228_v11 = vld [vmem:[#allocation5 + $0x2c] sm:$0xff] }
 0x45d   : > { %8607 = vmatprep.subr.bf16.mxu0 %v8606_v6 }
 0x45f   : > { %8324 = vmatmul.mubr.msk.f32.gmra.mrb[128].mxu0 %vm313_vm6, %v10468_v62 }
 0x460   : > { %8609 = vmatpush3.bf16.msra.mxu0 %v8606_v6  ;;  %8326 = vmatprep.mubr.msk.f32.mxu0 %vm313_vm6, %v10472_v36  ;;  %v6232_v6 = vld [vmem:[#allocation5 + $0x4c] sm:$0x7f] }
 0x461   : > { %8611 = vmatprep.subr.bf16.mxu0 %v8610_v55 }
 0x463   : > { %8327 = vmatmul.mubr.msk.f32.gmra.mrb[130].mxu0 %vm313_vm6, %v10482_v46 }
 0x464   : > { %8613 = vmatpush3.bf16.msra.mxu0 %v8610_v55  ;;  %8329 = vmatprep.mubr.msk.f32.mxu0 %vm313_vm6, %v10560_v40 }
 0x465   : > { %8615 = vmatprep.subr.bf16.mxu0 %v8614_v57 }
 0x467   : > { %8330 = vmatmul.mubr.msk.f32.gmra.mrb[132].mxu0 %vm313_vm6, %v5616_v18 }
 0x468   : > { %8617 = vmatpush3.bf16.msra.mxu0 %v8614_v57  ;;  %8348 = vmatprep.mubr.msk.f32.mxu0 %vm313_vm6, %v5763_v35 }
 0x469   : > { %8619 = vmatprep.subr.bf16.mxu0 %v8618_v59 }
 0x46b   : > { %8349 = vmatmul.mubr.msk.f32.vlgmr.msra.gmra.mrb[126].mxu0 %vm313_vm6, %v5764_v37 }
 0x46c   : > { %8621 = vmatpush3.bf16.msra.mxu0 %v8618_v59  ;;  %8351 = vmatprep.mubr.msk.f32.mxu0 %vm313_vm6, %v10579_v47 }
 0x46d   : > { %8623 = vmatprep.subr.bf16.mxu0 %v8622_v21 }
 0x46f   : > { %8352 = vmatmul.mubr.msk.f32.gmra.mrb[128].mxu0 %vm313_vm6, %v5766_v41 }
 0x470   : > { %8625 = vmatpush3.bf16.msra.mxu0 %v8622_v21  ;;  %8354 = vmatprep.mubr.msk.f32.mxu0 %vm313_vm6, %v5767_v1 }
 0x471   : > { %8627 = vmatprep.subr.bf16.mxu0 %v8626_v49 }
 0x473   : > { %8355 = vmatmul.mubr.msk.f32.gmra.mrb[130].mxu0 %vm313_vm6, %v5768_v2 }
 0x474   : > { %8629 = vmatpush3.bf16.msra.mxu0 %v8626_v49  ;;  %8357 = vmatprep.mubr.msk.f32.mxu0 %vm313_vm6, %v5769_v34 }
 0x475   : > { %8631 = vmatprep.subr.bf16.mxu0 %v8630_v30 }
 0x477   : > { %8358 = vmatmul.mubr.msk.f32.gmra.mrb[132].mxu0 %vm313_vm6, %v5770_v13 }
 0x478   : > { %8633 = vmatpush3.bf16.msra.mxu0 %v8630_v30  ;;  %8376 = vmatprep.mubr.msk.f32.mxu0 %vm313_vm6, %v10454_v19  ;;  %v7029_v19 = vld [vmem:[%s10688_s5 + $0x1f0] sm:$0xff] }
 0x479   : > { %8635 = vmatprep.subr.bf16.mxu0 %v8634_v28 }
 0x47b   : > { %8377 = vmatmul.mubr.msk.f32.vlgmr.msra.gmra.mrb[126].mxu0 %vm313_vm6, %v10458_v52  ;;  %v8646_v52 = vpack.c.bf16 %v7030_v25, %v7029_v19 }
 0x47c   : > { %8637 = vmatpush3.bf16.msra.mxu0 %v8634_v28  ;;  %8379 = vmatprep.mubr.msk.f32.mxu0 %vm313_vm6, %v10468_v62  ;;  %v7039_v62 = vld [vmem:[%s10688_s5 + $0x200] sm:$0xff] }
 0x47d   : > { %8639 = vmatprep.subr.bf16.mxu0 %v8638_v22 }
 0x47f   : > { %8380 = vmatmul.mubr.msk.f32.gmra.mrb[128].mxu0 %vm313_vm6, %v10472_v36  ;;  %v5924_v36 = vld [vmem:[#allocation5 + $0x4a] sm:$0x7f] }
 0x480   : > { %8641 = vmatpush3.bf16.msra.mxu0 %v8638_v22  ;;  %8382 = vmatprep.mubr.msk.f32.mxu0 %vm313_vm6, %v10482_v46  ;;  %v8650_v46 = vpack.c.bf16 %v7040_v39, %v7039_v62 }
 0x481   : > { %8643 = vmatprep.subr.bf16.mxu0 %v8642_v60 }
 0x483   : > { %8383 = vmatmul.mubr.msk.f32.gmra.mrb[130].mxu0 %vm313_vm6, %v10560_v40 }
 0x484   : > { %8645 = vmatpush3.bf16.msra.mxu0 %v8642_v60  ;;  %8385 = vmatprep.mubr.msk.f32.mxu0 %vm313_vm6, %v5923_v42 }
 0x485   : > { %8647 = vmatprep.subr.bf16.mxu0 %v8646_v52 }
 0x487   : > { %8386 = vmatmul.mubr.msk.f32.gmra.mrb[132].mxu0 %vm313_vm6, %v5924_v36 }
 0x488   : > { %8649 = vmatpush3.bf16.msra.mxu0 %v8646_v52  ;;  %8404 = vmatprep.mubr.msk.f32.mxu0 %vm313_vm6, %v5764_v37 }
 0x489   : > { %8651 = vmatprep.subr.bf16.mxu0 %v8650_v46 }
 0x48b   : > { %8405 = vmatmul.mubr.msk.f32.vlgmr.msra.gmra.mrb[126].mxu0 %vm313_vm6, %v10579_v47 }
 0x48c   : > { %8653 = vmatpush3.bf16.msra.mxu0 %v8650_v46  ;;  %8407 = vmatprep.mubr.msk.f32.mxu0 %vm313_vm6, %v5766_v41 }
 0x48d   : > { %8655 = vmatprep.subr.bf16.mxu0 %v8654_v50 }
 0x48f   : > { %8408 = vmatmul.mubr.msk.f32.gmra.mrb[128].mxu0 %vm313_vm6, %v5767_v1 }
 0x490   : > { %8657 = vmatpush3.bf16.msra.mxu0 %v8654_v50  ;;  %8410 = vmatprep.mubr.msk.f32.mxu0 %vm313_vm6, %v5768_v2 }
 0x491   : > { %8659 = vmatprep.subr.bf16.mxu0 %v8658_v32 }
 0x493   : > { %8411 = vmatmul.mubr.msk.f32.gmra.mrb[130].mxu0 %vm313_vm6, %v5769_v34  ;;  %v6426_v34 = vld [vmem:[#allocation7 + $0x1] ss:$2 sm:$0xf] }
 0x494   : > { %8661 = vmatpush3.bf16.msra.mxu0 %v8658_v32  ;;  %8413 = vmatprep.mubr.msk.f32.mxu0 %vm313_vm6, %v6077_v43  ;;  %v6427_v13 = vmax.f32 %v6424_v3, %v6426_v34 }
 0x495   : > { %8663 = vmatprep.subr.bf16.mxu0 %v8662_v33 }
 0x497   : > { %8414 = vmatmul.mubr.msk.f32.gmra.mrb[132].mxu0 %vm313_vm6, %v6078_v10 }
 0x498   : > { %8665 = vmatpush3.bf16.msra.mxu0 %v8662_v33  ;;  %8432 = vmatprep.mubr.msk.f32.mxu0 %vm313_vm6, %v6225_v20 }
 0x49b   : > { %8433 = vmatmul.mubr.msk.f32.vlgmr.msra.gmra.mrb[126].mxu0 %vm313_vm6, %v6226_v0 }
 0x49c   : > { %8435 = vmatprep.mubr.msk.f32.mxu0 %vm313_vm6, %v6227_v23 }
 0x49f   : > { %8436 = vmatmul.mubr.msk.f32.gmra.mrb[128].mxu0 %vm313_vm6, %v6228_v11 }
 0x4a0   : > { %8438 = vmatprep.mubr.msk.f32.mxu0 %vm313_vm6, %v6229_v58 }
 0x4a3   : > { %8439 = vmatmul.mubr.msk.f32.gmra.mrb[130].mxu0 %vm313_vm6, %v6230_v17 }
 0x4a4   : > { %8441 = vmatprep.mubr.msk.f32.mxu0 %vm313_vm6, %v6231_v24 }
 0x4a7   : > { %8442 = vmatmul.mubr.msk.f32.gmra.mrb[132].mxu0 %vm313_vm6, %v6232_v6 }
 0x56e   : > { %v8434_v9 = vpop.f32.mrb[126].mxu0 }
 0x56f   : > { %v6387_v55 = vadd.f32 %v8434_v9, %v7055_v8  ;;  %v6332_v5 = vpop.f32.mrb[127].mxu0 }
 0x570   : > { %v6386_v53 = vadd.f32 %v7055_v8, %v6332_v5 }
 0x571   : > { %v6395_v57 = vmax.f32 %v6387_v55, 0.0 }
 0x572   : > { %v6394_v44 = vmax.f32 %v6386_v53, 0.0  ;;  %v8437_v15 = vpop.f32.mrb[128].mxu0 }
 0x573   : > { %6403 = vst [vmem:[#allocation6 + $0x8] sm:$0xff] %v6395_v57  ;;  %v6389_v40 = vadd.f32 %v8437_v15, %v7055_v8  ;;  %v6342_v59 = vpop.f32.mrb[129].mxu0 }
 0x574   : > { %6402 = vst [vmem:[#allocation6] sm:$0xff] %v6394_v44  ;;  %v6388_v18 = vadd.f32 %v7055_v8, %v6342_v59 }
 0x575   : > { %v6397_v29 = vmax.f32 %v6389_v40, 0.0 }
 0x576   : > { %v6396_v31 = vmax.f32 %v6388_v18, 0.0  ;;  %v8440_v35 = vpop.f32.mrb[130].mxu0 }
 0x577   : > { %6405 = vst [vmem:[#allocation6 + $0x18] sm:$0xff] %v6397_v29  ;;  %v6391_v21 = vadd.f32 %v8440_v35, %v7055_v8  ;;  %v6352_v37 = vpop.f32.mrb[131].mxu0 }
 0x578   : > { %6404 = vst [vmem:[#allocation6 + $0x10] sm:$0xff] %v6396_v31  ;;  %v6390_v27 = vadd.f32 %v7055_v8, %v6352_v37 }
 0x579   : > { %v6399_v45 = vmax.f32 %v6391_v21, 0.0 }
 0x57a   : > { %v6412_v47 = vld [vmem:[#allocation6 + $0x9] sm:$0x7f]  ;;  %v6398_v49 = vmax.f32 %v6390_v27, 0.0  ;;  %v8443_v41 = vpop.f32.mrb[132].mxu0 }
 0x57b   : > { %6413 = vst [vmem:[#allocation7 + $0x11] sm:$0x7f] %v6412_v47  ;;  %v6410_v51 = vld [vmem:[#allocation6] sm:$0x7f]  ;;  %6407 = vst [vmem:[#allocation6 + $0x28] sm:$0xff] %v6399_v45  ;;  %v6393_v54 = vadd.f32 %v8443_v41, %v7055_v8  ;;  %v6362_v1 = vpop.f32.mrb[133].mxu0 }
 0x57c   : > { %6411 = vst [vmem:[#allocation7 + $0x9] sm:$0x7f] %v6410_v51  ;;  %6406 = vst [vmem:[#allocation6 + $0x20] sm:$0xff] %v6398_v49  ;;  %v6392_v30 = vadd.f32 %v7055_v8, %v6362_v1 }
 0x57d   : > { %v6401_v2 = vmax.f32 %v6393_v54, 0.0 }
 0x57e   : > { %v6400_v4 = vmax.f32 %v6392_v30, 0.0 }
 0x57f   : > { %v6414_v28 = vld [vmem:[#allocation6 + $0x12] sm:$0x7f]  ;;  %6409 = vst [vmem:[#allocation6 + $0x38] sm:$0x7f] %v6401_v2 }
 0x580   : > { %6415 = vst [vmem:[#allocation7 + $0x19] sm:$0x7f] %v6414_v28  ;;  %6408 = vst [vmem:[#allocation6 + $0x30] sm:$0xff] %v6400_v4 }
 0x582   : > { %v6436_v60 = vld [vmem:[#allocation7 + $0x10] ss:$2 sm:$0xf]  ;;  %v6438_v19 = vld [vmem:[#allocation7 + $0x11] ss:$2 sm:$0xf] }
 0x583   : > { %v6429_v26 = vld [vmem:[#allocation7 + $0x8] ss:$2 sm:$0xf]  ;;  %v6431_v12 = vld [vmem:[#allocation7 + $0x9] ss:$2 sm:$0xf]  ;;  %v6439_v39 = vmax.f32 %v6436_v60, %v6438_v19 }
 0x584   : > { %v6432_v22 = vmax.f32 %v6429_v26, %v6431_v12  ;;  %v6416_v7 = vld [vmem:[#allocation6 + $0x1b] sm:$0x7f]  ;;  %v6418_v56 = vld [vmem:[#allocation6 + $0x24] sm:$0x7f] }
 0x585   : > { %6417 = vst [vmem:[#allocation7 + $0x21] sm:$0x7f] %v6416_v7  ;;  %6419 = vst [vmem:[#allocation7 + $0x29] sm:$0x7f] %v6418_v56 }
 0x586   : > { %v6433_v25 = vmax.f32 %v6427_v13, %v6432_v22 }
 0x587   : > { %v6441_v52 = vld [vmem:[#allocation7 + $0x18] ss:$2 sm:$0xf]  ;;  %v6443_v62 = vld [vmem:[#allocation7 + $0x19] ss:$2 sm:$0xf] }
 0x588   : > { %6434 = vst [vmem:[%s278_s30] sm:$0xf] %v6433_v25  ;;  %v6444_v42 = vmax.f32 %v6441_v52, %v6443_v62  ;;  %v6420_v36 = vld [vmem:[#allocation6 + $0x2d] sm:$0x7f]  ;;  %v6422_v46 = vld [vmem:[#allocation6 + $0x36] sm:$0x7f] }
 0x589   : > { %6421 = vst [vmem:[#allocation7 + $0x31] sm:$0x7f] %v6420_v36  ;;  %6423 = vst [vmem:[#allocation7 + $0x39] sm:$0x7f] %v6422_v46 }
 0x58a   : > { %v6445_v14 = vmax.f32 %v6439_v39, %v6444_v42 }
 0x58c   : > { %6446 = vst [vmem:[%s278_s30 + $0x4] sm:$0xf] %v6445_v14  ;;  %v6448_v48 = vld [vmem:[#allocation7 + $0x20] ss:$2 sm:$0xf] }
 0x58d   : > { %v6450_v50 = vld [vmem:[#allocation7 + $0x21] ss:$2 sm:$0xf]  ;;  %v6453_v63 = vld [vmem:[#allocation7 + $0x28] ss:$2 sm:$0xf] }
 0x58e   : > { %v6451_v61 = vmax.f32 %v6448_v48, %v6450_v50  ;;  %v6455_v32 = vld [vmem:[#allocation7 + $0x29] ss:$2 sm:$0xf] }
 0x58f   : > { %v6456_v38 = vmax.f32 %v6453_v63, %v6455_v32 }
 0x590   : > { %v6460_v33 = vld [vmem:[#allocation7 + $0x30] ss:$2 sm:$0xf]  ;;  %v6462_v43 = vld [vmem:[#allocation7 + $0x31] ss:$2 sm:$0xf] }
 0x591   : > { %v6457_v16 = vmax.f32 %v6451_v61, %v6456_v38  ;;  %v6463_v10 = vmax.f32 %v6460_v33, %v6462_v43  ;;  %v6465_v20 = vld [vmem:[#allocation7 + $0x38] ss:$2 sm:$0xf]  ;;  %v6467_v0 = vld [vmem:[#allocation7 + $0x39] ss:$2 sm:$0xf] }
 0x592   : > { %v6468_v23 = vmax.f32 %v6465_v20, %v6467_v0 }
 0x593   : > { %6458 = vst [vmem:[%s278_s30 + $0x8] sm:$0xf] %v6457_v16 }
 0x594   : > { %v6469_v11 = vmax.f32 %v6463_v10, %v6468_v23 }
 0x596   : > { %6470 = vst [vmem:[%s278_s30 + $0xc] sm:$0xf] %v6469_v11 }
 0x597 PF: > { %s17_s24 = sadd.s32 1, %s8977_s24  }
 0x598   : > { %p14_p4 = scmp.ge.s32.totalorder %s17_s24, 4  }
 0x59a   :  { %16 = sbr.rel (!%p14_p4) target bundleno = 1 (0x1), region = 247 }

</bundles_post_ra>
